<compile_context>
chip_gen: v7x
topology: tpu7x:2x2x1
jax: 0.10.0
libtpu: 0.0.40
codegen_flags: <defaults>
</compile_context>

<pallas_src>
import functools
import math

import jax
import jax.numpy as jnp
from jax import lax
from jax.experimental import pallas as pl
from jax.experimental.pallas import tpu as pltpu


# ----------------------------------------------------------------------------
# Stage 1: argmax-over-channels -> border-zeroed binary mask + contour edges
# ----------------------------------------------------------------------------
def _mask_edges_kernel(y_ref, interior_ref, mask_ref, vedge_ref, hedge_ref,
                       *, num_classes, width):
    # y_ref: (TM, C, N); interior_ref: (1, N); outputs: (TM, 1, N), all f32.
    n = y_ref.shape[-1]
    y0 = y_ref[:, 0, :]                                    # class-0 logits (TM, N)
    if num_classes > 1:
        best = y_ref[:, 1, :]
        for k in range(2, num_classes):                    # static unroll, C small
            best = jnp.maximum(best, y_ref[:, k, :])
        fg = best > y0        # argmax != 0 (matches np.argmax first-index tie rule)
    else:
        fg = jnp.zeros(y0.shape, jnp.bool_)

    # Zero the image border (reference sets mask[0,:]=mask[:,0]=mask[:,-1]=
    # mask[-1,:]=False before skeleton / contour extraction).
    mask = jnp.where(fg, interior_ref[...], jnp.float32(0.0))     # (TM, N)
    mask_ref[:, 0, :] = mask

    # Contour-edge indicators from the flat row-major layout:
    #   vedge[r, c] = |mask[r+1, c] - mask[r, c]|  -> contour point (r+0.5, c)
    #   hedge[r, c] = |mask[r, c+1] - mask[r, c]|  -> contour point (r, c+0.5)
    # The tails (last row / last column) are written as zero, which is also the
    # mathematically correct value because the border was zeroed above.
    nv = n - width
    nh = n - 1
    zeros = jnp.zeros_like(mask)
    vedge_ref[:, 0, :] = zeros
    hedge_ref[:, 0, :] = zeros
    vedge_ref[:, 0, :nv] = jnp.abs(mask[:, width:] - mask[:, :nv])
    hedge_ref[:, 0, :nh] = jnp.abs(mask[:, 1:] - mask[:, :nh])


def argmax_mask_edges(y):
    """y: (M, C, H, W) f32 -> (mask, vedge, hedge), each (M, H*W) f32."""
    m, c, h, w = y.shape
    n = h * w
    y_flat = y.reshape(m, c, n)

    # Interior (non-border) indicator, precomputed once in the wrapper so the
    # kernel needs no per-pixel div/mod.
    rows = jnp.arange(n, dtype=jnp.int32) // w
    cols = jnp.arange(n, dtype=jnp.int32) % w
    interior = ((rows > 0) & (rows < h - 1) & (cols > 0) & (cols < w - 1))
    interior = interior.astype(jnp.float32).reshape(1, n)

    # Batch as many samples per grid step as fit a modest VMEM budget
    # (input block + 3 output blocks, double-buffered).
    per_sample = (c + 3) * n * 4 * 2
    budget = 8 * 1024 * 1024
    tm = m
    while tm > 1 and tm * per_sample > budget:
        tm -= 1
        while m % tm:
            tm -= 1
    # TODO(synk): for very large images also tile the spatial axis inside the
    # block (v7x only has 64 MiB of physical VMEM).

    kern = functools.partial(_mask_edges_kernel, num_classes=c, width=w)
    out_struct = jax.ShapeDtypeStruct((m, 1, n), jnp.float32)
    mask, vedge, hedge = pl.pallas_call(
        kern,
        out_shape=(out_struct, out_struct, out_struct),
        grid_spec=pltpu.PrefetchScalarGridSpec(
            num_scalar_prefetch=0,
            grid=(m // tm,),
            in_specs=[
                pl.BlockSpec((tm, c, n), lambda i: (i, 0, 0)),
                pl.BlockSpec((1, n), lambda i: (0, 0)),
            ],
            out_specs=(
                pl.BlockSpec((tm, 1, n), lambda i: (i, 0, 0)),
                pl.BlockSpec((tm, 1, n), lambda i: (i, 0, 0)),
                pl.BlockSpec((tm, 1, n), lambda i: (i, 0, 0)),
            ),
        ),
        compiler_params=pltpu.CompilerParams(dimension_semantics=("parallel",)),
    )(y_flat, interior)
    return mask.reshape(m, n), vedge.reshape(m, n), hedge.reshape(m, n)


# ----------------------------------------------------------------------------
# Stage 2: sum over skeleton pixels of distance to the nearest contour point,
# with a tiled contour axis and a running-min accumulator in VMEM scratch.
# ----------------------------------------------------------------------------
def _min_dist_sum_kernel(cnt_c_ref, cnt_s_ref,
                         skel_ref, vedge_ref, hedge_ref,
                         rj_ref, cj_ref, ri_ref, ci_ref,
                         out_ref, dmin2_ref, sum_ref,
                         *, ts, tc, s_tiles, c_tiles):
    i = pl.program_id(0)          # sample
    s = pl.program_id(1)          # skeleton tile (sublane axis of the dist tile)
    c = pl.program_id(2)          # contour tile (lane axis of the dist tile)
    big = jnp.float32(1e18)

    @pl.when((s == 0) & (c == 0))
    def _init_sum():
        sum_ref[...] = jnp.zeros((1, 1), jnp.float32)

    @pl.when(c == 0)
    def _init_min():
        dmin2_ref[...] = jnp.full((ts, 1), big, jnp.float32)

    has_cont = cnt_c_ref[i * c_tiles + c] > 0
    has_skel = cnt_s_ref[i * s_tiles + s] > 0

    @pl.when(has_cont & has_skel)
    def _tile():
        rj = rj_ref[...]                 # (1, TC) contour-candidate rows
        cj = cj_ref[...]                 # (1, TC) contour-candidate cols
        ri = ri_ref[...]                 # (TS, 1) skeleton-pixel rows
        ci = ci_ref[...]                 # (TS, 1) skeleton-pixel cols
        vmask = vedge_ref[0] > 0.5       # (1, TC) lane-dense indicators
        hmask = hedge_ref[0] > 0.5
        dr = ri - rj                     # (TS, TC)
        dc = ci - cj
        dv2 = (dr - 0.5) * (dr - 0.5) + dc * dc        # point at (rj + 0.5, cj)
        dh2 = dr * dr + (dc - 0.5) * (dc - 0.5)        # point at (rj, cj + 0.5)
        d2 = jnp.minimum(jnp.where(vmask, dv2, big), jnp.where(hmask, dh2, big))
        tile_min = jnp.min(d2, axis=1, keepdims=True)  # (TS, 1), lane reduce (XLU)
        dmin2_ref[...] = jnp.minimum(dmin2_ref[...], tile_min)

    @pl.when((c == c_tiles - 1) & has_skel)
    def _accumulate():
        d = jnp.sqrt(dmin2_ref[...])                                # (TS, 1)
        part = jnp.sum(skel_ref[0] * d, axis=0, keepdims=True)      # (1, 1)
        sum_ref[...] = sum_ref[...] + part

    @pl.when((s == s_tiles - 1) & (c == c_tiles - 1))
    def _finalize():
        out_ref[0] = sum_ref[...]


def _round_up(x, k):
    return ((x + k - 1) // k) * k


def min_dist_sums(skel, vedge, hedge, *, width, ts=256, tc=512):
    """skel/vedge/hedge: (M, N) f32 -> (M,) sum over skeleton pixels of the
    Euclidean distance to the nearest contour point."""
    m, n = skel.shape
    ts = min(ts, _round_up(n, 8))          # skeleton tile (sublanes, mult of 8)
    tc = min(tc, _round_up(n, 128))        # contour tile (lanes, mult of 128)
    n_pad = _round_up(n, (ts * tc) // math.gcd(ts, tc))
    pad = n_pad - n
    skel_p = jnp.pad(skel, ((0, 0), (0, pad)))
    ve_p = jnp.pad(vedge, ((0, 0), (0, pad)))
    he_p = jnp.pad(hedge, ((0, 0), (0, pad)))
    s_tiles = n_pad // ts
    c_tiles = n_pad // tc

    # Per-tile point counts for sparse-tile skipping (scalar prefetch -> SMEM).
    cnt_c = jnp.sum((ve_p + he_p).reshape(m, c_tiles, tc) > 0.5,
                    axis=-1).astype(jnp.int32).reshape(m * c_tiles)
    cnt_s = jnp.sum(skel_p.reshape(m, s_tiles, ts) > 0.5,
                    axis=-1).astype(jnp.int32).reshape(m * s_tiles)

    # Per-axis pixel coordinates, precomputed once (exact in f32; avoids any
    # per-element iota/div/mod inside the kernel).
    rows = (jnp.arange(n_pad, dtype=jnp.int32) // width).astype(jnp.float32)
    cols = (jnp.arange(n_pad, dtype=jnp.int32) % width).astype(jnp.float32)
    rj_row = rows.reshape(1, n_pad)
    cj_row = cols.reshape(1, n_pad)
    ri_col = rows.reshape(n_pad, 1)
    ci_col = cols.reshape(n_pad, 1)

    skel_col = skel_p.reshape(m, n_pad, 1)     # (TS, 1) tiles for the finalize
    ve_row = ve_p.reshape(m, 1, n_pad)         # lane-dense (1, TC) tiles
    he_row = he_p.reshape(m, 1, n_pad)

    kern = functools.partial(_min_dist_sum_kernel, ts=ts, tc=tc,
                             s_tiles=s_tiles, c_tiles=c_tiles)
    out = pl.pallas_call(
        kern,
        out_shape=jax.ShapeDtypeStruct((m, 1, 1), jnp.float32),
        grid_spec=pltpu.PrefetchScalarGridSpec(
            num_scalar_prefetch=2,
            grid=(m, s_tiles, c_tiles),
            in_specs=[
                pl.BlockSpec((1, ts, 1), lambda i, s, c, cc, sc: (i, s, 0)),
                pl.BlockSpec((1, 1, tc), lambda i, s, c, cc, sc: (i, 0, c)),
                pl.BlockSpec((1, 1, tc), lambda i, s, c, cc, sc: (i, 0, c)),
                pl.BlockSpec((1, tc), lambda i, s, c, cc, sc: (0, c)),
                pl.BlockSpec((1, tc), lambda i, s, c, cc, sc: (0, c)),
                pl.BlockSpec((ts, 1), lambda i, s, c, cc, sc: (s, 0)),
                pl.BlockSpec((ts, 1), lambda i, s, c, cc, sc: (s, 0)),
            ],
            out_specs=pl.BlockSpec((1, 1, 1), lambda i, s, c, cc, sc: (i, 0, 0)),
            scratch_shapes=[pltpu.VMEM((ts, 1), jnp.float32),   # running min d^2
                            pltpu.VMEM((1, 1), jnp.float32)],   # per-sample sum
        ),
        compiler_params=pltpu.CompilerParams(
            dimension_semantics=("parallel", "arbitrary", "arbitrary"),
            vmem_limit_bytes=32 * 1024 * 1024,
        ),
    )(cnt_c, cnt_s, skel_col, ve_row, he_row, rj_row, cj_row, ri_col, ci_col)
    return out[:, 0, 0]


# ----------------------------------------------------------------------------
# Glue: Zhang-Suen thinning (approximates skimage.skeletonize)
# ----------------------------------------------------------------------------
# TODO(synk): skimage.morphology.skeletonize is approximated by fixed-iteration
# Zhang-Suen thinning in plain JAX; for large images this glue (not the Pallas
# kernels) dominates wall-clock and is a candidate for its own Pallas kernel.
def zhang_suen_thin(mask, num_iters):
    """mask: (M, H, W) float32 in {0,1}, border pixels already zero."""

    def shifts(img):
        p2 = jnp.roll(img, 1, axis=1)    # N
        p6 = jnp.roll(img, -1, axis=1)   # S
        p8 = jnp.roll(img, 1, axis=2)    # W
        p4 = jnp.roll(img, -1, axis=2)   # E
        p9 = jnp.roll(p2, 1, axis=2)     # NW
        p3 = jnp.roll(p2, -1, axis=2)    # NE
        p7 = jnp.roll(p6, 1, axis=2)     # SW
        p5 = jnp.roll(p6, -1, axis=2)    # SE
        return p2, p3, p4, p5, p6, p7, p8, p9

    def subiter(img, first):
        p2, p3, p4, p5, p6, p7, p8, p9 = shifts(img)
        bn = p2 + p3 + p4 + p5 + p6 + p7 + p8 + p9
        seq = [p2, p3, p4, p5, p6, p7, p8, p9, p2]
        a = jnp.zeros_like(img)
        for k in range(8):
            a = a + ((seq[k] < 0.5) & (seq[k + 1] > 0.5)).astype(img.dtype)
        cond = (img > 0.5) & (bn >= 2.0) & (bn <= 6.0) & (a == 1.0)
        if first:
            cond = cond & (p2 * p4 * p6 < 0.5) & (p4 * p6 * p8 < 0.5)
        else:
            cond = cond & (p2 * p4 * p8 < 0.5) & (p2 * p6 * p8 < 0.5)
        return jnp.where(cond, 0.0, img)

    def body(_, img):
        img = subiter(img, True)
        img = subiter(img, False)
        return img

    return lax.fori_loop(0, num_iters, body, mask)


# ----------------------------------------------------------------------------
# Full metric
# ----------------------------------------------------------------------------
@jax.jit
def radius_arteries_metric(y_pr, y_gt):
    b = y_pr.shape[0]
    h, w = y_pr.shape[2], y_pr.shape[3]
    stacked = jnp.concatenate([y_pr, y_gt], axis=0).astype(jnp.float32)

    mask, vedge, hedge = argmax_mask_edges(stacked)              # (2B, H*W) each
    skel = zhang_suen_thin(mask.reshape(-1, h, w),
                           num_iters=(h + w) // 2).reshape(-1, h * w)

    sum_d = min_dist_sums(skel, vedge, hedge, width=w)           # (2B,)
    n_skel = jnp.sum(skel, axis=-1)
    n_cont = jnp.sum(vedge + hedge, axis=-1)
    valid = (n_skel > 0.5) & (n_cont > 0.5)
    # TODO(synk): reference yields NaN (np.mean of empty list) when the
    # skeleton is empty but the contour is not; we return 0.0 for that case.
    diam = jnp.where(valid, 2.0 * sum_d / jnp.maximum(n_skel, 1.0), 0.0)
    return jnp.mean(jnp.abs(diam[:b] - diam[b:]))


if __name__ == "__main__":
    key = jax.random.PRNGKey(0)
    k1, k2 = jax.random.split(key)
    B, C, H, W = 2, 4, 16, 16
    y_pr = jax.random.normal(k1, (B, C, H, W), dtype=jnp.float32)
    y_gt = jax.random.normal(k2, (B, C, H, W), dtype=jnp.float32)

    result = radius_arteries_metric(y_pr, y_gt)
    jax.block_until_ready(result)
    print("KERNEL_OK")
</pallas_src>

<mosaic_0001>
module attributes {stable_mosaic.version = 11 : i64} {
  func.func @_mask_edges_kernel(%arg0: i32, %arg1: memref<4x4x256xf32, #tpu.memory_space<vmem>>, %arg2: memref<1x256xf32, #tpu.memory_space<vmem>>, %arg3: memref<4x1x256xf32, #tpu.memory_space<vmem>>, %arg4: memref<4x1x256xf32, #tpu.memory_space<vmem>>, %arg5: memref<4x1x256xf32, #tpu.memory_space<vmem>>) attributes {dimension_semantics = [#tpu.dimension_semantics<parallel>], iteration_bounds = array<i64: 1>, scalar_prefetch = 0 : i64, scratch_operands = 0 : i64, tpu.core_type = #tpu.core_type<tc>, window_params = [{transform_indices = @transform_0, window_bounds = array<i64: 4, 4, 256>}, {pipeline_mode = #tpu.pipeline_mode<synchronous>, transform_indices = @transform_1, window_bounds = array<i64: 1, 256>}, {transform_indices = @transform_2, window_bounds = array<i64: 4, 1, 256>}, {transform_indices = @transform_3, window_bounds = array<i64: 4, 1, 256>}, {transform_indices = @transform_4, window_bounds = array<i64: 4, 1, 256>}]} {
    %c0 = arith.constant 0 : index
    %c0_0 = arith.constant 0 : index
    %c0_1 = arith.constant 0 : index
    %0 = vector.load %arg1[%c0, %c0_0, %c0_1] : memref<4x4x256xf32, #tpu.memory_space<vmem>>, vector<4x1x256xf32>
    %1 = vector.shape_cast %0 : vector<4x1x256xf32> to vector<4x256xf32>
    %c0_2 = arith.constant 0 : index
    %c1 = arith.constant 1 : index
    %c0_3 = arith.constant 0 : index
    %2 = vector.load %arg1[%c0_2, %c1, %c0_3] : memref<4x4x256xf32, #tpu.memory_space<vmem>>, vector<4x1x256xf32>
    %3 = vector.shape_cast %2 : vector<4x1x256xf32> to vector<4x256xf32>
    %c0_4 = arith.constant 0 : index
    %c2 = arith.constant 2 : index
    %c0_5 = arith.constant 0 : index
    %4 = vector.load %arg1[%c0_4, %c2, %c0_5] : memref<4x4x256xf32, #tpu.memory_space<vmem>>, vector<4x1x256xf32>
    %5 = vector.shape_cast %4 : vector<4x1x256xf32> to vector<4x256xf32>
    %6 = arith.maximumf %3, %5 : vector<4x256xf32>
    %c0_6 = arith.constant 0 : index
    %c3 = arith.constant 3 : index
    %c0_7 = arith.constant 0 : index
    %7 = vector.load %arg1[%c0_6, %c3, %c0_7] : memref<4x4x256xf32, #tpu.memory_space<vmem>>, vector<4x1x256xf32>
    %8 = vector.shape_cast %7 : vector<4x1x256xf32> to vector<4x256xf32>
    %9 = arith.maximumf %6, %8 : vector<4x256xf32>
    %10 = arith.cmpf ogt, %9, %1 : vector<4x256xf32>
    %c0_8 = arith.constant 0 : index
    %c0_9 = arith.constant 0 : index
    %11 = vector.load %arg2[%c0_8, %c0_9] : memref<1x256xf32, #tpu.memory_space<vmem>>, vector<1x256xf32>
    %cst = arith.constant 0.000000e+00 : f32
    %12 = vector.shape_cast %11 : vector<1x256xf32> to vector<1x256xf32>
    %13 = vector.broadcast %12 : vector<1x256xf32> to vector<4x256xf32>
    %14 = vector.broadcast %cst : f32 to vector<4x256xf32>
    %15 = arith.select %10, %13, %14 : vector<4x256xi1>, vector<4x256xf32>
    %c0_10 = arith.constant 0 : index
    %c0_11 = arith.constant 0 : index
    %c0_12 = arith.constant 0 : index
    %16 = vector.load %arg3[%c0_10, %c0_11, %c0_12] : memref<4x1x256xf32, #tpu.memory_space<vmem>>, vector<4x1x256xf32>
    %17 = vector.shape_cast %16 : vector<4x1x256xf32> to vector<4x256xf32>
    %18 = vector.shape_cast %15 : vector<4x256xf32> to vector<4x1x256xf32>
    tpu.vector_store %arg3[%c0_10, %c0_11, %c0_12], %18 {strides = array<i32>} : memref<4x1x256xf32, #tpu.memory_space<vmem>>, vector<4x1x256xf32>,
    %cst_13 = arith.constant 0.000000e+00 : f32
    %19 = vector.broadcast %cst_13 : f32 to vector<4x256xf32>
    %c0_14 = arith.constant 0 : index
    %c0_15 = arith.constant 0 : index
    %c0_16 = arith.constant 0 : index
    %20 = vector.load %arg4[%c0_14, %c0_15, %c0_16] : memref<4x1x256xf32, #tpu.memory_space<vmem>>, vector<4x1x256xf32>
    %21 = vector.shape_cast %20 : vector<4x1x256xf32> to vector<4x256xf32>
    %22 = vector.shape_cast %19 : vector<4x256xf32> to vector<4x1x256xf32>
    tpu.vector_store %arg4[%c0_14, %c0_15, %c0_16], %22 {strides = array<i32>} : memref<4x1x256xf32, #tpu.memory_space<vmem>>, vector<4x1x256xf32>,
    %c0_17 = arith.constant 0 : index
    %c0_18 = arith.constant 0 : index
    %c0_19 = arith.constant 0 : index
    %23 = vector.load %arg5[%c0_17, %c0_18, %c0_19] : memref<4x1x256xf32, #tpu.memory_space<vmem>>, vector<4x1x256xf32>
    %24 = vector.shape_cast %23 : vector<4x1x256xf32> to vector<4x256xf32>
    %25 = vector.shape_cast %19 : vector<4x256xf32> to vector<4x1x256xf32>
    tpu.vector_store %arg5[%c0_17, %c0_18, %c0_19], %25 {strides = array<i32>} : memref<4x1x256xf32, #tpu.memory_space<vmem>>, vector<4x1x256xf32>,
    %26 = vector.extract_strided_slice %15 {offsets = [0, 16], sizes = [4, 240], strides = [1, 1]} : vector<4x256xf32> to vector<4x240xf32>
    %27 = vector.extract_strided_slice %15 {offsets = [0, 0], sizes = [4, 240], strides = [1, 1]} : vector<4x256xf32> to vector<4x240xf32>
    %28 = arith.subf %26, %27 : vector<4x240xf32>
    %29 = math.absf %28 : vector<4x240xf32>
    %c0_20 = arith.constant 0 : index
    %c0_21 = arith.constant 0 : index
    %c0_22 = arith.constant 0 : index
    %30 = vector.load %arg4[%c0_20, %c0_21, %c0_22] : memref<4x1x256xf32, #tpu.memory_space<vmem>>, vector<4x1x240xf32>
    %31 = vector.shape_cast %30 : vector<4x1x240xf32> to vector<4x240xf32>
    %32 = vector.shape_cast %29 : vector<4x240xf32> to vector<4x1x240xf32>
    tpu.vector_store %arg4[%c0_20, %c0_21, %c0_22], %32 {strides = array<i32>} : memref<4x1x256xf32, #tpu.memory_space<vmem>>, vector<4x1x240xf32>,
    %33 = vector.extract_strided_slice %15 {offsets = [0, 1], sizes = [4, 255], strides = [1, 1]} : vector<4x256xf32> to vector<4x255xf32>
    %34 = vector.extract_strided_slice %15 {offsets = [0, 0], sizes = [4, 255], strides = [1, 1]} : vector<4x256xf32> to vector<4x255xf32>
    %35 = arith.subf %33, %34 : vector<4x255xf32>
    %36 = math.absf %35 : vector<4x255xf32>
    %c0_23 = arith.constant 0 : index
    %c0_24 = arith.constant 0 : index
    %c0_25 = arith.constant 0 : index
    %37 = vector.load %arg5[%c0_23, %c0_24, %c0_25] : memref<4x1x256xf32, #tpu.memory_space<vmem>>, vector<4x1x255xf32>
    %38 = vector.shape_cast %37 : vector<4x1x255xf32> to vector<4x255xf32>
    %39 = vector.shape_cast %36 : vector<4x255xf32> to vector<4x1x255xf32>
    tpu.vector_store %arg5[%c0_23, %c0_24, %c0_25], %39 {strides = array<i32>} : memref<4x1x256xf32, #tpu.memory_space<vmem>>, vector<4x1x255xf32>,
    return
  }
  func.func @transform_0(%arg0: i32) -> (i32, i32, i32) {
    %c0_i32 = arith.constant 0 : i32
    %c0_i32_0 = arith.constant 0 : i32
    %c0_i32_1 = arith.constant 0 : i32
    return %arg0, %c0_i32, %c0_i32_0 : i32, i32, i32
  }
  func.func @transform_1(%arg0: i32) -> (i32, i32) {
    %c0_i32 = arith.constant 0 : i32
    %c0_i32_0 = arith.constant 0 : i32
    %c0_i32_1 = arith.constant 0 : i32
    return %c0_i32, %c0_i32_0 : i32, i32
  }
  func.func @transform_2(%arg0: i32) -> (i32, i32, i32) {
    %c0_i32 = arith.constant 0 : i32
    %c0_i32_0 = arith.constant 0 : i32
    %c0_i32_1 = arith.constant 0 : i32
    return %arg0, %c0_i32, %c0_i32_0 : i32, i32, i32
  }
  func.func @transform_3(%arg0: i32) -> (i32, i32, i32) {
    %c0_i32 = arith.constant 0 : i32
    %c0_i32_0 = arith.constant 0 : i32
    %c0_i32_1 = arith.constant 0 : i32
    return %arg0, %c0_i32, %c0_i32_0 : i32, i32, i32
  }
  func.func @transform_4(%arg0: i32) -> (i32, i32, i32) {
    %c0_i32 = arith.constant 0 : i32
    %c0_i32_0 = arith.constant 0 : i32
    %c0_i32_1 = arith.constant 0 : i32
    return %arg0, %c0_i32, %c0_i32_0 : i32, i32, i32
  }
}

module attributes {stable_mosaic.version = 11 : i64} {
  func.func @_min_dist_sum_kernel(%arg0: i32, %arg1: i32, %arg2: i32, %arg3: memref<4xi32, #tpu.memory_space<smem>>, %arg4: memref<4xi32, #tpu.memory_space<smem>>, %arg5: memref<1x256x1xf32, #tpu.memory_space<vmem>>, %arg6: memref<1x1x256xf32, #tpu.memory_space<vmem>>, %arg7: memref<1x1x256xf32, #tpu.memory_space<vmem>>, %arg8: memref<1x256xf32, #tpu.memory_space<vmem>>, %arg9: memref<1x256xf32, #tpu.memory_space<vmem>>, %arg10: memref<256x1xf32, #tpu.memory_space<vmem>>, %arg11: memref<256x1xf32, #tpu.memory_space<vmem>>, %arg12: memref<1x1x1xf32, #tpu.memory_space<vmem>>, %arg13: memref<256x1xf32, #tpu.memory_space<vmem>>, %arg14: memref<1x1xf32, #tpu.memory_space<vmem>>) attributes {dimension_semantics = [#tpu.dimension_semantics<parallel>, #tpu.dimension_semantics<arbitrary>, #tpu.dimension_semantics<arbitrary>], iteration_bounds = array<i64: 4, 1, 1>, scalar_prefetch = 2 : i64, scratch_operands = 2 : i64, tpu.core_type = #tpu.core_type<tc>, window_params = [{transform_indices = @transform_0, window_bounds = array<i64: 1, 256, 1>}, {transform_indices = @transform_1, window_bounds = array<i64: 1, 1, 256>}, {transform_indices = @transform_2, window_bounds = array<i64: 1, 1, 256>}, {transform_indices = @transform_3, window_bounds = array<i64: 1, 256>}, {transform_indices = @transform_4, window_bounds = array<i64: 1, 256>}, {transform_indices = @transform_5, window_bounds = array<i64: 256, 1>}, {transform_indices = @transform_6, window_bounds = array<i64: 256, 1>}, {transform_indices = @transform_7, window_bounds = array<i64: 1, 1, 1>}]} {
    %c0_i32 = arith.constant 0 : i32
    %0 = arith.cmpi eq, %arg1, %c0_i32 : i32
    %c0_i32_0 = arith.constant 0 : i32
    %1 = arith.cmpi eq, %arg2, %c0_i32_0 : i32
    %2 = arith.andi %0, %1 : i1
    %3 = arith.extui %2 : i1 to i32
    %c0_i32_1 = arith.constant 0 : i32
    %4 = arith.cmpi ne, %3, %c0_i32_1 : i32
    scf.if %4 {
      %cst_14 = arith.constant 0.000000e+00 : f32
      %30 = vector.broadcast %cst_14 : f32 to vector<1x1xf32>
      %c0 = arith.constant 0 : index
      %c0_15 = arith.constant 0 : index
      %31 = vector.load %arg14[%c0, %c0_15] : memref<1x1xf32, #tpu.memory_space<vmem>>, vector<1x1xf32>
      tpu.vector_store %arg14[%c0, %c0_15], %30 {strides = array<i32>} : memref<1x1xf32, #tpu.memory_space<vmem>>, vector<1x1xf32>,
    } else {
    }
    %c0_i32_2 = arith.constant 0 : i32
    %5 = arith.cmpi eq, %arg2, %c0_i32_2 : i32
    %6 = arith.extui %5 : i1 to i32
    %cst = arith.constant 9.99999984E+17 : f32
    %c0_i32_3 = arith.constant 0 : i32
    %7 = arith.cmpi ne, %6, %c0_i32_3 : i32
    scf.if %7 {
      %30 = vector.broadcast %cst : f32 to vector<256x1xf32>
      %c0 = arith.constant 0 : index
      %c0_14 = arith.constant 0 : index
      %31 = vector.load %arg13[%c0, %c0_14] : memref<256x1xf32, #tpu.memory_space<vmem>>, vector<256x1xf32>
      tpu.vector_store %arg13[%c0, %c0_14], %30 {strides = array<i32>} : memref<256x1xf32, #tpu.memory_space<vmem>>, vector<256x1xf32>,
    } else {
    }
    %c1_i32 = arith.constant 1 : i32
    %8 = arith.muli %arg0, %c1_i32 : i32
    %9 = arith.addi %8, %arg2 : i32
    %10 = arith.index_cast %9 : i32 to index
    %11 = memref.load %arg3[%10] : memref<4xi32, #tpu.memory_space<smem>>
    %c0_i32_4 = arith.constant 0 : i32
    %12 = arith.cmpi sgt, %11, %c0_i32_4 : i32
    %c1_i32_5 = arith.constant 1 : i32
    %13 = arith.muli %arg0, %c1_i32_5 : i32
    %14 = arith.addi %13, %arg1 : i32
    %15 = arith.index_cast %14 : i32 to index
    %16 = memref.load %arg4[%15] : memref<4xi32, #tpu.memory_space<smem>>
    %c0_i32_6 = arith.constant 0 : i32
    %17 = arith.cmpi sgt, %16, %c0_i32_6 : i32
    %18 = arith.andi %12, %17 : i1
    %19 = arith.extui %18 : i1 to i32
    %cst_7 = arith.constant 9.99999984E+17 : f32
    %c0_i32_8 = arith.constant 0 : i32
    %20 = arith.cmpi ne, %19, %c0_i32_8 : i32
    scf.if %20 {
      %c0 = arith.constant 0 : index
      %c0_14 = arith.constant 0 : index
      %30 = vector.load %arg8[%c0, %c0_14] : memref<1x256xf32, #tpu.memory_space<vmem>>, vector<1x256xf32>
      %c0_15 = arith.constant 0 : index
      %c0_16 = arith.constant 0 : index
      %31 = vector.load %arg9[%c0_15, %c0_16] : memref<1x256xf32, #tpu.memory_space<vmem>>, vector<1x256xf32>
      %c0_17 = arith.constant 0 : index
      %c0_18 = arith.constant 0 : index
      %32 = vector.load %arg10[%c0_17, %c0_18] : memref<256x1xf32, #tpu.memory_space<vmem>>, vector<256x1xf32>
      %c0_19 = arith.constant 0 : index
      %c0_20 = arith.constant 0 : index
      %33 = vector.load %arg11[%c0_19, %c0_20] : memref<256x1xf32, #tpu.memory_space<vmem>>, vector<256x1xf32>
      %c0_21 = arith.constant 0 : index
      %c0_22 = arith.constant 0 : index
      %c0_23 = arith.constant 0 : index
      %34 = vector.load %arg6[%c0_21, %c0_22, %c0_23] : memref<1x1x256xf32, #tpu.memory_space<vmem>>, vector<1x1x256xf32>
      %35 = vector.shape_cast %34 : vector<1x1x256xf32> to vector<1x256xf32>
      %cst_24 = arith.constant 5.000000e-01 : f32
      %36 = vector.broadcast %cst_24 : f32 to vector<1x256xf32>
      %37 = arith.cmpf ogt, %35, %36 : vector<1x256xf32>
      %c0_25 = arith.constant 0 : index
      %c0_26 = arith.constant 0 : index
      %c0_27 = arith.constant 0 : index
      %38 = vector.load %arg7[%c0_25, %c0_26, %c0_27] : memref<1x1x256xf32, #tpu.memory_space<vmem>>, vector<1x1x256xf32>
      %39 = vector.shape_cast %38 : vector<1x1x256xf32> to vector<1x256xf32>
      %cst_28 = arith.constant 5.000000e-01 : f32
      %40 = vector.broadcast %cst_28 : f32 to vector<1x256xf32>
      %41 = arith.cmpf ogt, %39, %40 : vector<1x256xf32>
      %42 = vector.broadcast %32 : vector<256x1xf32> to vector<256x256xf32>
      %43 = vector.broadcast %30 : vector<1x256xf32> to vector<256x256xf32>
      %44 = arith.subf %42, %43 : vector<256x256xf32>
      %45 = vector.broadcast %33 : vector<256x1xf32> to vector<256x256xf32>
      %46 = vector.broadcast %31 : vector<1x256xf32> to vector<256x256xf32>
      %47 = arith.subf %45, %46 : vector<256x256xf32>
      %cst_29 = arith.constant 5.000000e-01 : f32
      %48 = vector.broadcast %cst_29 : f32 to vector<256x256xf32>
      %49 = arith.subf %44, %48 : vector<256x256xf32>
      %cst_30 = arith.constant 5.000000e-01 : f32
      %50 = vector.broadcast %cst_30 : f32 to vector<256x256xf32>
      %51 = arith.subf %44, %50 : vector<256x256xf32>
      %52 = arith.mulf %49, %51 : vector<256x256xf32>
      %53 = arith.mulf %47, %47 : vector<256x256xf32>
      %54 = arith.addf %52, %53 : vector<256x256xf32>
      %55 = arith.mulf %44, %44 : vector<256x256xf32>
      %cst_31 = arith.constant 5.000000e-01 : f32
      %56 = vector.broadcast %cst_31 : f32 to vector<256x256xf32>
      %57 = arith.subf %47, %56 : vector<256x256xf32>
      %cst_32 = arith.constant 5.000000e-01 : f32
      %58 = vector.broadcast %cst_32 : f32 to vector<256x256xf32>
      %59 = arith.subf %47, %58 : vector<256x256xf32>
      %60 = arith.mulf %57, %59 : vector<256x256xf32>
      %61 = arith.addf %55, %60 : vector<256x256xf32>
      %62 = vector.shape_cast %37 : vector<1x256xi1> to vector<1x256xi1>
      %63 = vector.broadcast %62 : vector<1x256xi1> to vector<256x256xi1>
      %64 = vector.broadcast %cst_7 : f32 to vector<256x256xf32>
      %65 = arith.select %63, %54, %64 : vector<256x256xi1>, vector<256x256xf32>
      %66 = vector.shape_cast %41 : vector<1x256xi1> to vector<1x256xi1>
      %67 = vector.broadcast %66 : vector<1x256xi1> to vector<256x256xi1>
      %68 = vector.broadcast %cst_7 : f32 to vector<256x256xf32>
      %69 = arith.select %67, %61, %68 : vector<256x256xi1>, vector<256x256xf32>
      %70 = arith.minimumf %65, %69 : vector<256x256xf32>
      %cst_33 = arith.constant dense<0x7F800000> : vector<256xf32>
      %71 = vector.multi_reduction <minimumf>, %70, %cst_33 [1] : vector<256x256xf32> to vector<256xf32>
      %72 = vector.shape_cast %71 : vector<256xf32> to vector<256x1xf32>
      %c0_34 = arith.constant 0 : index
      %c0_35 = arith.constant 0 : index
      %73 = vector.load %arg13[%c0_34, %c0_35] : memref<256x1xf32, #tpu.memory_space<vmem>>, vector<256x1xf32>
      %74 = arith.minimumf %73, %72 : vector<256x1xf32>
      %c0_36 = arith.constant 0 : index
      %c0_37 = arith.constant 0 : index
      %75 = vector.load %arg13[%c0_36, %c0_37] : memref<256x1xf32, #tpu.memory_space<vmem>>, vector<256x1xf32>
      tpu.vector_store %arg13[%c0_36, %c0_37], %74 {strides = array<i32>} : memref<256x1xf32, #tpu.memory_space<vmem>>, vector<256x1xf32>,
    } else {
    }
    %c0_i32_9 = arith.constant 0 : i32
    %21 = arith.cmpi eq, %arg2, %c0_i32_9 : i32
    %22 = arith.andi %21, %17 : i1
    %23 = arith.extui %22 : i1 to i32
    %c0_i32_10 = arith.constant 0 : i32
    %24 = arith.cmpi ne, %23, %c0_i32_10 : i32
    scf.if %24 {
      %c0 = arith.constant 0 : index
      %c0_14 = arith.constant 0 : index
      %30 = vector.load %arg13[%c0, %c0_14] : memref<256x1xf32, #tpu.memory_space<vmem>>, vector<256x1xf32>
      %31 = math.sqrt %30 : vector<256x1xf32>
      %c0_15 = arith.constant 0 : index
      %c0_16 = arith.constant 0 : index
      %c0_17 = arith.constant 0 : index
      %32 = vector.load %arg5[%c0_15, %c0_16, %c0_17] : memref<1x256x1xf32, #tpu.memory_space<vmem>>, vector<1x256x1xf32>
      %33 = vector.shape_cast %32 : vector<1x256x1xf32> to vector<256x1xf32>
      %34 = arith.mulf %33, %31 : vector<256x1xf32>
      %cst_18 = arith.constant dense<0.000000e+00> : vector<1xf32>
      %35 = vector.multi_reduction <add>, %34, %cst_18 [0] : vector<256x1xf32> to vector<1xf32>
      %36 = vector.shape_cast %35 : vector<1xf32> to vector<1x1xf32>
      %c0_19 = arith.constant 0 : index
      %c0_20 = arith.constant 0 : index
      %37 = vector.load %arg14[%c0_19, %c0_20] : memref<1x1xf32, #tpu.memory_space<vmem>>, vector<1x1xf32>
      %38 = arith.addf %37, %36 : vector<1x1xf32>
      %c0_21 = arith.constant 0 : index
      %c0_22 = arith.constant 0 : index
      %39 = vector.load %arg14[%c0_21, %c0_22] : memref<1x1xf32, #tpu.memory_space<vmem>>, vector<1x1xf32>
      tpu.vector_store %arg14[%c0_21, %c0_22], %38 {strides = array<i32>} : memref<1x1xf32, #tpu.memory_space<vmem>>, vector<1x1xf32>,
    } else {
    }
    %c0_i32_11 = arith.constant 0 : i32
    %25 = arith.cmpi eq, %arg1, %c0_i32_11 : i32
    %c0_i32_12 = arith.constant 0 : i32
    %26 = arith.cmpi eq, %arg2, %c0_i32_12 : i32
    %27 = arith.andi %25, %26 : i1
    %28 = arith.extui %27 : i1 to i32
    %c0_i32_13 = arith.constant 0 : i32
    %29 = arith.cmpi ne, %28, %c0_i32_13 : i32
    scf.if %29 {
      %c0 = arith.constant 0 : index
      %c0_14 = arith.constant 0 : index
      %30 = vector.load %arg14[%c0, %c0_14] : memref<1x1xf32, #tpu.memory_space<vmem>>, vector<1x1xf32>
      %c0_15 = arith.constant 0 : index
      %c0_16 = arith.constant 0 : index
      %c0_17 = arith.constant 0 : index
      %31 = vector.load %arg12[%c0_15, %c0_16, %c0_17] : memref<1x1x1xf32, #tpu.memory_space<vmem>>, vector<1x1x1xf32>
      %32 = vector.shape_cast %31 : vector<1x1x1xf32> to vector<1x1xf32>
      %33 = vector.shape_cast %30 : vector<1x1xf32> to vector<1x1x1xf32>
      tpu.vector_store %arg12[%c0_15, %c0_16, %c0_17], %33 {strides = array<i32>} : memref<1x1x1xf32, #tpu.memory_space<vmem>>, vector<1x1x1xf32>,
    } else {
    }
    return
  }
  func.func @transform_0(%arg0: i32, %arg1: i32, %arg2: i32, %arg3: memref<4xi32, #tpu.memory_space<smem>>, %arg4: memref<4xi32, #tpu.memory_space<smem>>) -> (i32, i32, i32) {
    %c0_i32 = arith.constant 0 : i32
    %c0_i32_0 = arith.constant 0 : i32
    return %arg0, %arg1, %c0_i32 : i32, i32, i32
  }
  func.func @transform_1(%arg0: i32, %arg1: i32, %arg2: i32, %arg3: memref<4xi32, #tpu.memory_space<smem>>, %arg4: memref<4xi32, #tpu.memory_space<smem>>) -> (i32, i32, i32) {
    %c0_i32 = arith.constant 0 : i32
    %c0_i32_0 = arith.constant 0 : i32
    return %arg0, %c0_i32, %arg2 : i32, i32, i32
  }
  func.func @transform_2(%arg0: i32, %arg1: i32, %arg2: i32, %arg3: memref<4xi32, #tpu.memory_space<smem>>, %arg4: memref<4xi32, #tpu.memory_space<smem>>) -> (i32, i32, i32) {
    %c0_i32 = arith.constant 0 : i32
    %c0_i32_0 = arith.constant 0 : i32
    return %arg0, %c0_i32, %arg2 : i32, i32, i32
  }
  func.func @transform_3(%arg0: i32, %arg1: i32, %arg2: i32, %arg3: memref<4xi32, #tpu.memory_space<smem>>, %arg4: memref<4xi32, #tpu.memory_space<smem>>) -> (i32, i32) {
    %c0_i32 = arith.constant 0 : i32
    %c0_i32_0 = arith.constant 0 : i32
    return %c0_i32, %arg2 : i32, i32
  }
  func.func @transform_4(%arg0: i32, %arg1: i32, %arg2: i32, %arg3: memref<4xi32, #tpu.memory_space<smem>>, %arg4: memref<4xi32, #tpu.memory_space<smem>>) -> (i32, i32) {
    %c0_i32 = arith.constant 0 : i32
    %c0_i32_0 = arith.constant 0 : i32
    return %c0_i32, %arg2 : i32, i32
  }
  func.func @transform_5(%arg0: i32, %arg1: i32, %arg2: i32, %arg3: memref<4xi32, #tpu.memory_space<smem>>, %arg4: memref<4xi32, #tpu.memory_space<smem>>) -> (i32, i32) {
    %c0_i32 = arith.constant 0 : i32
    %c0_i32_0 = arith.constant 0 : i32
    return %arg1, %c0_i32 : i32, i32
  }
  func.func @transform_6(%arg0: i32, %arg1: i32, %arg2: i32, %arg3: memref<4xi32, #tpu.memory_space<smem>>, %arg4: memref<4xi32, #tpu.memory_space<smem>>) -> (i32, i32) {
    %c0_i32 = arith.constant 0 : i32
    %c0_i32_0 = arith.constant 0 : i32
    return %arg1, %c0_i32 : i32, i32
  }
  func.func @transform_7(%arg0: i32, %arg1: i32, %arg2: i32, %arg3: memref<4xi32, #tpu.memory_space<smem>>, %arg4: memref<4xi32, #tpu.memory_space<smem>>) -> (i32, i32, i32) {
    %c0_i32 = arith.constant 0 : i32
    %c0_i32_0 = arith.constant 0 : i32
    %c0_i32_1 = arith.constant 0 : i32
    return %arg0, %c0_i32, %c0_i32_0 : i32, i32, i32
  }
}

</mosaic_0001>

<bundles_post_ra>
// kernel: radius_arteries_metric.2
= control target key start
LH: loop header
LB: loop body
LE: loop exit
PB: predicated region body
PF: predicated region fallthrough
CT: control target
= control target key end

     0   :  { %v59_v0 = vlaneseq  ;;  %v273_v2 = vmov 1966171168   ;;  %s274_s22 = smov 16   ;;  %s275_s28 = smov 1   ;;  %v276_v47 = vmov 0.0   ;;  %vm132_vm5 = vcmask 130048   ;;  %s512_s0 = inlined_call_operand.vmem [shape: f32[4,4,256], index: 0, kind: input, shape index: {}]   ;;  %s513_s1 = inlined_call_operand.vmem [shape: f32[1,256], index: 1, kind: input, shape index: {}]   ;;  %s514_s2 = inlined_call_operand.vmem [shape: f32[4,1,256], index: 2, kind: output, shape index: {0}]   ;;  %s515_s3 = inlined_call_operand.vmem [shape: f32[4,1,256], index: 3, kind: output, shape index: {1}]   ;;  %s516_s4 = inlined_call_operand.vmem [shape: f32[4,1,256], index: 4, kind: output, shape index: {2}]  }
   0x1   :  { %v255_v1 = vld [vmem:[%s512_s0 + $0x1] ss:$4 sm:$0x3]  ;;  %v69_v3 = vunpack.c.l.s4 %v273_v2  ;;  %v259_v4 = vld [vmem:[%s512_s0 + $0x2] ss:$4 sm:$0x3] }
   0x2   :  { %v263_v5 = vld [vmem:[%s512_s0 + $0x3] ss:$4 sm:$0x3]  ;;  %v60_v6 = vshrl.u32 %v59_v0, 7  ;;  %v37_v8 = vmax.f32 %v255_v1, %v259_v4  ;;  %v57_v9 = vld [vmem:[%s513_s1] sm:$0x3] }
   0x3   :  { %v70_v7 = vunpack.c.0.s8 %v69_v3  ;;  %v257_v10 = vld [vmem:[%s512_s0 + $0x11] ss:$4 sm:$0x3]  ;;  %v261_v13 = vld [vmem:[%s512_s0 + $0x12] ss:$4 sm:$0x3] }
   0x4   :  { %v61_v11 = vsub.s32 0, %v60_v6  ;;  %v65_v12 = vsub.s32 1, %v60_v6  ;;  %v39_v14 = vmax.f32 %v257_v10, %v261_v13  ;;  %v265_v15 = vld [vmem:[%s512_s0 + $0x13] ss:$4 sm:$0x3]  ;;  %v49_v22 = vmax.f32 %v37_v8, %v263_v5  ;;  %s277_s19 = smov 112  }
   0x5   :  { %v73_v18 = vsub.s32 %v70_v7, %v60_v6  ;;  %v256_v19 = vld [vmem:[%s512_s0 + $0x9] ss:$4 sm:$0x3]  ;;  %v260_v20 = vld [vmem:[%s512_s0 + $0xa] ss:$4 sm:$0x3] }
   0x6   :  { %v62_v16 = vrot.slane %v57_v9, %v61_v11  ;;  %v66_v17 = vrot.slane %v57_v9, %v65_v12  ;;  %v14_v21 = vld [vmem:[%s512_s0] ss:$4 sm:$0x3]  ;;  %v38_v23 = vmax.f32 %v256_v19, %v260_v20  ;;  %v264_v24 = vld [vmem:[%s512_s0 + $0xb] ss:$4 sm:$0x3]  ;;  %v51_v28 = vmax.f32 %v39_v14, %v265_v15 }
   0x7   :  { %v258_v26 = vld [vmem:[%s512_s0 + $0x19] ss:$4 sm:$0x3]  ;;  %v262_v27 = vld [vmem:[%s512_s0 + $0x1a] ss:$4 sm:$0x3]  ;;  %vm53_vm0 = vcmp.gt.f32.partialorder %v49_v22, %v14_v21 }
   0x8   :  { %v67_v25 = vcombine.low %v62_v16, %v66_v17  ;;  %v50_v29 = vmax.f32 %v38_v23, %v264_v24  ;;  %v40_v30 = vmax.f32 %v258_v26, %v262_v27  ;;  %v266_v31 = vld [vmem:[%s512_s0 + $0x1b] ss:$4 sm:$0x3]  ;;  %v253_v33 = vld [vmem:[%s512_s0 + $0x10] ss:$4 sm:$0x3] }
   0x9   :  { %v252_v34 = vld [vmem:[%s512_s0 + $0x8] ss:$4 sm:$0x3]  ;;  %v254_v38 = vld [vmem:[%s512_s0 + $0x18] ss:$4 sm:$0x3]  ;;  %vm55_vm1 = vcmp.gt.f32.partialorder %v51_v28, %v253_v33 }
   0xa   :  { %v74_v32 = vrot.slane %v67_v25, %v73_v18  ;;  %v52_v35 = vmax.f32 %v40_v30, %v266_v31  ;;  %vm54_vm2 = vcmp.gt.f32.partialorder %v50_v29, %v252_v34  ;;  %vm357_vm3 = vcmp.lt.s32.totalorder %v59_v0, 256  ;;  %s278_s20 = smov 127  }
   0xb   :  { %108 = vst.msk [vmem:[%s515_s3] sm:$0x3] %vm357_vm3, %v276_v47  ;;  %109 = vst.msk [vmem:[%s515_s3 + $0x2] sm:$0x3] %vm357_vm3, %v276_v47  ;;  %vm192_vm6 = vcmask 7168   ;;  %vm165_vm7 = vcmask 916480  }
   0xc   :  { %v82_v36 = vrot.slane %v74_v32, %v73_v18  ;;  %v75_v37 = vcombine.high %v74_v32, %v74_v32  ;;  %vm56_vm4 = vcmp.gt.f32.partialorder %v52_v35, %v254_v38  ;;  %110 = vst.msk [vmem:[%s515_s3 + $0x4] sm:$0x3] %vm357_vm3, %v276_v47  ;;  %111 = vst.msk [vmem:[%s515_s3 + $0x6] sm:$0x3] %vm357_vm3, %v276_v47  ;;  %vm455_vm8 = vcmp.lt.s32.totalorder %v59_v0, 240 }
   0xd   :  { %112 = vst.msk [vmem:[%s516_s4] sm:$0x3] %vm357_vm3, %v276_v47  ;;  %113 = vst.msk [vmem:[%s516_s4 + $0x2] sm:$0x3] %vm357_vm3, %v276_v47  ;;  %vm225_vm9 = vcmask 1039360   ;;  %vm466_vm10 = vcmp.lt.s32.totalorder %v59_v0, 255 }
   0xe   :  { %v96_v39 = vsel %vm53_vm0, %v82_v36, 0.0  ;;  %v90_v41 = vcombine.high %v82_v36, %v82_v36  ;;  %v89_v42 = vrot.slane %v75_v37, %v73_v18  ;;  %114 = vst.msk [vmem:[%s516_s4 + $0x4] sm:$0x3] %vm357_vm3, %v276_v47  ;;  %115 = vst.msk [vmem:[%s516_s4 + $0x6] sm:$0x3] %vm357_vm3, %v276_v47 }
   0xf   :  { %120 = vrot.lane.b32.xlu0 %v96_v39, %s274_s22  ;;  %104 = vst.msk [vmem:[%s514_s2] sm:$0x3] %vm357_vm3, %v96_v39 }
  0x10   :  { %v366_v43 = vsel %vm55_vm1, %v90_v41, 0.0  ;;  %v368_v44 = vsel %vm54_vm2, %v89_v42, 0.0  ;;  %v91_v45 = vcombine.high %v89_v42, %v89_v42 }
  0x11   :  { %124 = vrot.lane.b32.xlu1 %v366_v43, %s274_s22  ;;  %106 = vst.msk [vmem:[%s514_s2 + $0x4] sm:$0x3] %vm357_vm3, %v366_v43  ;;  %105 = vst.msk [vmem:[%s514_s2 + $0x2] sm:$0x3] %vm357_vm3, %v368_v44 }
  0x12   :  { %v383_v46 = vsel %vm56_vm4, %v91_v45, 0.0 }
  0x13   :  { %180 = vrot.lane.b32.xlu0 %v96_v39, %s275_s28  ;;  %107 = vst.msk [vmem:[%s514_s2 + $0x6] sm:$0x3] %vm357_vm3, %v383_v46 }
  0x15   :  { %182 = vrot.lane.b32.xlu1 %v368_v44, %s275_s28 }
  0x17   :  { %122 = vrot.lane.b32.xlu0 %v368_v44, %s274_s22 }
  0x19   :  { %126 = vrot.lane.b32.xlu1 %v383_v46, %s274_s22 }
  0x1b   :  { %184 = vrot.lane.b32.xlu0 %v366_v43, %s275_s28 }
  0x1d   :  { %186 = vrot.lane.b32.xlu1 %v383_v46, %s275_s28 }
  0x81   :  { %v121_v48 = vpop.permute.xlu0 %120 }
  0x82   :  { %v128_v49 = vrot.slane %v121_v48, 7 }
  0x83   :  { %v125_v50 = vpop.permute.xlu1 %124 }
  0x84   :  { %v133_v51 = vsel %vm132_vm5, %v128_v49, %v121_v48  ;;  %v130_v52 = vrot.slane %v125_v50, 7 }
  0x85   :  { %v141_v53 = vsub.f32 %v96_v39, %v133_v51  ;;  %v181_v54 = vpop.permute.xlu0 %180 }
  0x86   :  { %v188_v55 = vrot.slane %v181_v54, 7  ;;  %v135_v59 = vsel %vm132_vm5, %v130_v52, %v125_v50 }
  0x87   :  { %v145_v56 = vand.u32 2147483647, %v141_v53  ;;  %v183_v57 = vpop.permute.xlu1 %182  ;;  %v143_v2 = vsub.f32 %v366_v43, %v135_v59 }
  0x88   :  { %v193_v58 = vsel %vm192_vm6, %v188_v55, %v181_v54  ;;  %v189_v60 = vrot.slane %v183_v57, 7 }
  0x89   :  { %v201_v61 = vsub.f32 %v96_v39, %v193_v58  ;;  %153 = vrot.lane.b32.xlu0 %v145_v56, %s277_s19  ;;  %v123_v62 = vpop.permute.xlu0 %122  ;;  %v147_v10 = vand.u32 2147483647, %v143_v2 }
  0x8a   :  { %v129_v63 = vrot.slane %v123_v62, 7  ;;  %v194_v5 = vsel %vm192_vm6, %v189_v60, %v183_v57 }
  0x8b   :  { %v205_v1 = vand.u32 2147483647, %v201_v61  ;;  %v127_v3 = vpop.permute.xlu1 %126  ;;  %v202_v12 = vsub.f32 %v368_v44, %v194_v5 }
  0x8c   :  { %v134_v4 = vsel %vm132_vm5, %v129_v63, %v123_v62  ;;  %v131_v6 = vrot.slane %v127_v3, 7 }
  0x8d   :  { %v142_v7 = vsub.f32 %v368_v44, %v134_v4  ;;  %213 = vrot.lane.b32.xlu0 %v205_v1, %s278_s20  ;;  %v185_v8 = vpop.permute.xlu0 %184  ;;  %v206_v18 = vand.u32 2147483647, %v202_v12 }
  0x8e   :  { %v190_v9 = vrot.slane %v185_v8, 7  ;;  %v136_v14 = vsel %vm132_vm5, %v131_v6, %v127_v3 }
  0x8f   :  { %v146_v11 = vand.u32 2147483647, %v142_v7  ;;  %v187_v13 = vpop.permute.xlu1 %186  ;;  %v144_v19 = vsub.f32 %v383_v46, %v136_v14 }
  0x90   :  { %v195_v15 = vsel %vm192_vm6, %v190_v9, %v185_v8  ;;  %v191_v16 = vrot.slane %v187_v13, 7 }
  0x91   :  { %157 = vrot.lane.b32.xlu0 %v147_v10, %s277_s19  ;;  %155 = vrot.lane.b32.xlu1 %v146_v11, %s277_s19  ;;  %v203_v17 = vsub.f32 %v366_v43, %v195_v15  ;;  %v148_v22 = vand.u32 2147483647, %v144_v19 }
  0x92   :  { %v196_v21 = vsel %vm192_vm6, %v191_v16, %v187_v13 }
  0x93   :  { %v207_v20 = vand.u32 2147483647, %v203_v17  ;;  %v204_v23 = vsub.f32 %v383_v46, %v196_v21 }
  0x95   :  { %215 = vrot.lane.b32.xlu1 %v206_v18, %s278_s20  ;;  %217 = vrot.lane.b32.xlu0 %v207_v20, %s278_s20  ;;  %v208_v24 = vand.u32 2147483647, %v204_v23 }
  0x99   :  { %159 = vrot.lane.b32.xlu1 %v148_v22, %s277_s19 }
  0x9d   :  { %219 = vrot.lane.b32.xlu1 %v208_v24, %s278_s20 }
  0xfb   :  { %v154_v25 = vpop.permute.xlu0 %153 }
  0xfc   :  { %v161_v27 = vrot.slane %v154_v25, 1 }
  0xfe   :  { %v166_v28 = vsel %vm165_vm7, %v154_v25, %v161_v27 }
  0xff   :  { %176 = vst.msk [vmem:[%s515_s3] sm:$0x3] %vm455_vm8, %v166_v28  ;;  %v214_v29 = vpop.permute.xlu0 %213 }
 0x100   :  { %v221_v31 = vrot.slane %v214_v29, 1 }
 0x102   :  { %v226_v32 = vsel %vm225_vm9, %v214_v29, %v221_v31 }
 0x103   :  { %236 = vst.msk [vmem:[%s516_s4] sm:$0x3] %vm466_vm10, %v226_v32  ;;  %v156_v33 = vpop.permute.xlu1 %155  ;;  %v158_v34 = vpop.permute.xlu0 %157 }
 0x104   :  { %v162_v35 = vrot.slane %v156_v33, 1  ;;  %v163_v36 = vrot.slane %v158_v34, 1 }
 0x106   :  { %v167_v37 = vsel %vm165_vm7, %v156_v33, %v162_v35  ;;  %v168_v0 = vsel %vm165_vm7, %v158_v34, %v163_v36 }
 0x107   :  { %177 = vst.msk [vmem:[%s515_s3 + $0x2] sm:$0x3] %vm455_vm8, %v167_v37  ;;  %178 = vst.msk [vmem:[%s515_s3 + $0x4] sm:$0x3] %vm455_vm8, %v168_v0  ;;  %v216_v38 = vpop.permute.xlu1 %215  ;;  %v218_v39 = vpop.permute.xlu0 %217 }
 0x108   :  { %v222_v40 = vrot.slane %v216_v38, 1  ;;  %v223_v41 = vrot.slane %v218_v39, 1 }
 0x10a   :  { %v227_v42 = vsel %vm225_vm9, %v216_v38, %v222_v40  ;;  %v228_v43 = vsel %vm225_vm9, %v218_v39, %v223_v41 }
 0x10b   :  { %237 = vst.msk [vmem:[%s516_s4 + $0x2] sm:$0x3] %vm466_vm10, %v227_v42  ;;  %v160_v44 = vpop.permute.xlu1 %159  ;;  %238 = vst.msk [vmem:[%s516_s4 + $0x4] sm:$0x3] %vm466_vm10, %v228_v43 }
 0x10c   :  { %v164_v45 = vrot.slane %v160_v44, 1 }
 0x10e   :  { %v169_v46 = vsel %vm165_vm7, %v160_v44, %v164_v45 }
 0x10f   :  { %179 = vst.msk [vmem:[%s515_s3 + $0x6] sm:$0x3] %vm455_vm8, %v169_v46  ;;  %v220_v47 = vpop.permute.xlu1 %219 }
 0x110   :  { %v224_v48 = vrot.slane %v220_v47, 1 }
 0x112   :  { %v229_v49 = vsel %vm225_vm9, %v220_v47, %v224_v48 }
 0x113   :  { %239 = vst.msk [vmem:[%s516_s4 + $0x6] sm:$0x3] %vm466_vm10, %v229_v49 }

// kernel: radius_arteries_metric.3
= control target key start
LH: loop header
LB: loop body
LE: loop exit
PB: predicated region body
PF: predicated region fallthrough
CT: control target
= control target key end

     0   :  { %s4882_s0 = inlined_call_operand.vmem [shape: s32[4], index: 0, kind: input, shape index: {}]   ;;  %s4883_s2 = inlined_call_operand.vmem [shape: f32[4,256,1], index: 2, kind: input, shape index: {}]   ;;  %s4884_s3 = inlined_call_operand.vmem [shape: f32[4,1,256], index: 3, kind: input, shape index: {}]   ;;  %s4885_s4 = inlined_call_operand.vmem [shape: f32[4,1,256], index: 4, kind: input, shape index: {}]   ;;  %s4886_s5 = inlined_call_operand.vmem [shape: f32[1,256], index: 5, kind: input, shape index: {}]   ;;  %s4887_s6 = inlined_call_operand.vmem [shape: f32[1,256], index: 6, kind: input, shape index: {}]   ;;  %s4888_s7 = inlined_call_operand.vmem [shape: f32[256,1], index: 7, kind: input, shape index: {}]   ;;  %s4889_s8 = inlined_call_operand.vmem [shape: f32[256,1], index: 8, kind: input, shape index: {}]   ;;  %s4890_s9 = inlined_call_operand.vmem [shape: f32[4,1,1], index: 9, kind: output, shape index: {}]   ;;  %s4891_s1 = inlined_call_operand.vmem [shape: s32[4], index: 1, kind: input, shape index: {}]  }
   0x1   :  { %s14_s11 = sshll.u32 %s4882_s0, 4  ;;  %s18_s14 = sshll.u32 %s4891_s1, 4  ;;  %s15_s11 = int_to_ptr.vmem [resolvable:$true] %s14_s11  ;;  %s19_s14 = int_to_ptr.vmem [resolvable:$true] %s18_s14 }
   0x2   :  { %s2776_s15 = scalar_lea.vmem %s15_s11, 16  ;;  %p2781_p1 = scmp.lt.s32.totalorder %s15_s11, %s15_s11 }
   0x3   :  { %p2777_p0 = scmp.ne.s32.totalorder %s15_s11, %s2776_s15  ;;  %p2782_p2 = scmp.lt.s32.totalorder %s2776_s15, %s2776_s15 }
   0x5   :  { %p2783_p3 = por %p2782_p2, %p2781_p1 }
   0x7   :  { %p2784_p4 = pnand %p2783_p3, %p2777_p0 }
   0x9   :  { %2787 = shalt.err (!%p2784_p4)  }
   0xa   :  { %s2826_s16 = smov [#allocation5]   ;;  %s2788_s17 = scalar_lea.vmem %s19_s14, 16 }
   0xb   :  { %17 = dma.vmem_to_smem %s15_s11, 16, %s2826_s16, [#allocation4] }
   0xc   :  { %p2789_p5 = scmp.ne.s32.totalorder %s19_s14, %s2788_s17  ;;  %p2793_p6 = scmp.lt.s32.totalorder %s19_s14, %s19_s14 }
   0xd   :  { %p2794_p7 = scmp.lt.s32.totalorder %s2788_s17, %s2788_s17 }
   0xf   :  { %p2795_p8 = por %p2794_p7, %p2793_p6 }
  0x11   :  { %p2796_p9 = pnand %p2795_p8, %p2789_p5 }
  0x13   :  { %2799 = shalt.err (!%p2796_p9)  }
  0x14   :  { %s2827_s0 = smov [#allocation6]  }
  0x15   :  { %21 = dma.vmem_to_smem %s19_s14, 16, %s2827_s0, [#allocation4] }
  0x16   :  { %2812 = dma.done.wait [#allocation4], 32 }
  0x17   :  { %2813 = vsyncadd [#allocation4], 4294967264 }
  0x18   :  { %23 = sfence }
  0x19   :  { %s2887_s1 = smov 0   ;;  %s2889_s18 = smov 0  }
  0x1a   :  { %s2891_s19 = smov 0  }
  0x1b LB: > { %s48_s20 = sadd.s32 1, %s2820_s18  ;;  %p2543_p10 = scmp.ge.s32.totalorder %s2824_s19, 1  ;;  %s2824_s19 = sphi %s2891_s19, %s29_s19   ;;  %s2820_s18 = sphi %s2889_s18, %s5133_s18   ;;  %s2816_s1 = sphi %s2887_s1, %s5132_s1  }
  0x1c   : > { %p50_p11 = scmp.ge.s32.totalorder %s48_s20, 4  ;;  %p349_p12 = scmp.lt.s32.totalorder %s2824_s19, 5 }
  0x1e   : > { %s5135_s20 = smov (%p50_p11, %s48_s20), 0  ;;  %p350_p13 = pnand %p2543_p10, %p349_p12 }
  0x1f   : > { %p418_p0 = scmp.lt.s32.totalorder (!%p350_p13), %s2816_s1, 3  ;;  %vm4892_vm0 = vcmask (!%p350_p13), 0   ;;  %vm4893_vm1 = vcmask (!%p350_p13), 7168   ;;  %v2828_v0 = vmov (!%p350_p13), 0.0   ;;  %v2829_v1 = vmov (!%p350_p13), 1e+18  }
  0x20   : > { %353 = sbr.rel (%p350_p13) target bundleno = 674 (0x2a2), region = 48  ;;  %477 = vst.msk [vmem:[#allocation3] sm:$0x1] (!%p350_p13), %vm4892_vm0, %v2828_v0  ;;  %s515_s21 = sld [smem:[#allocation5 + %s2816_s1]] (!%p350_p13) }
  0x21   : > { %482 = vst.msk [vmem:[#allocation2] sm:$0xff] (!%p350_p13), %vm4893_vm1, %v2829_v1  ;;  %483 = vst.msk [vmem:[#allocation2 + $0x8] sm:$0xff] (!%p350_p13), %vm4893_vm1, %v2829_v1  ;;  %s2943_s22 = sld [smem:[#allocation6 + %s2816_s1]] (!%p350_p13) }
  0x22   : > { %484 = vst.msk [vmem:[#allocation2 + $0x10] sm:$0xff] (!%p350_p13), %vm4893_vm1, %v2829_v1  ;;  %485 = vst.msk [vmem:[#allocation2 + $0x18] sm:$0xff] (!%p350_p13), %vm4893_vm1, %v2829_v1 }
  0x23   : > { %486 = vst.msk [vmem:[#allocation2 + $0x20] sm:$0xff] (!%p350_p13), %vm4893_vm1, %v2829_v1  ;;  %487 = vst.msk [vmem:[#allocation2 + $0x28] sm:$0xff] (!%p350_p13), %vm4893_vm1, %v2829_v1 }
  0x24   : > { %488 = vst.msk [vmem:[#allocation2 + $0x30] sm:$0xff] (!%p350_p13), %vm4893_vm1, %v2829_v1  ;;  %489 = vst.msk [vmem:[#allocation2 + $0x38] sm:$0xff] (!%p350_p13), %vm4893_vm1, %v2829_v1 }
  0x25   : > { %490 = vst.msk [vmem:[#allocation2 + $0x40] sm:$0xff] (!%p350_p13), %vm4893_vm1, %v2829_v1  ;;  %491 = vst.msk [vmem:[#allocation2 + $0x48] sm:$0xff] (!%p350_p13), %vm4893_vm1, %v2829_v1 }
  0x26   : > { %492 = vst.msk [vmem:[#allocation2 + $0x50] sm:$0xff] (!%p350_p13), %vm4893_vm1, %v2829_v1  ;;  %493 = vst.msk [vmem:[#allocation2 + $0x58] sm:$0xff] (!%p350_p13), %vm4893_vm1, %v2829_v1  ;;  %p516_p1 = scmp.gt.s32.totalorder (!%p350_p13), %s515_s21, 0 }
  0x27   : > { %494 = vst.msk [vmem:[#allocation2 + $0x60] sm:$0xff] %vm4893_vm1, %v2829_v1  ;;  %495 = vst.msk [vmem:[#allocation2 + $0x68] sm:$0xff] %vm4893_vm1, %v2829_v1  ;;  %s5137_s1 = smov (!%p418_p0, %s2816_s1), 3  ;;  %p519_p2 = scmp.gt.s32.totalorder %s2943_s22, 0 }
  0x28   : > { %496 = vst.msk [vmem:[#allocation2 + $0x70] sm:$0xff] %vm4893_vm1, %v2829_v1  ;;  %497 = vst.msk [vmem:[#allocation2 + $0x78] sm:$0xff] %vm4893_vm1, %v2829_v1  ;;  %s2679_s23 = sshll.u32 %s5137_s1, 8  ;;  %s2546_s24 = sshll.u32 %s5137_s1, 1 }
  0x29   : > { %498 = vst.msk [vmem:[#allocation2 + $0x80] sm:$0xff] %vm4893_vm1, %v2829_v1  ;;  %499 = vst.msk [vmem:[#allocation2 + $0x88] sm:$0xff] %vm4893_vm1, %v2829_v1  ;;  %s2955_s27 = scalar_lea.vmem %s4883_s2, %s2679_s23  ;;  %s2960_s30 = scalar_lea.vmem %s4884_s3, %s2546_s24 }
  0x2a   : > { %500 = vst.msk [vmem:[#allocation2 + $0x90] sm:$0xff] %vm4893_vm1, %v2829_v1  ;;  %501 = vst.msk [vmem:[#allocation2 + $0x98] sm:$0xff] %vm4893_vm1, %v2829_v1  ;;  %s2965_s12 = scalar_lea.vmem %s4885_s4, %s2546_s24  ;;  %s469_s15 = scalar_lea.vmem %s4890_s9, %s5137_s1 }
  0x2b   : > { %502 = vst.msk [vmem:[#allocation2 + $0xa0] sm:$0xff] %vm4893_vm1, %v2829_v1  ;;  %503 = vst.msk [vmem:[#allocation2 + $0xa8] sm:$0xff] %vm4893_vm1, %v2829_v1  ;;  %p520_p3 = pnand %p519_p2, %p516_p1 }
  0x2c   : > { %504 = vst.msk [vmem:[#allocation2 + $0xb0] sm:$0xff] %vm4893_vm1, %v2829_v1  ;;  %505 = vst.msk [vmem:[#allocation2 + $0xb8] sm:$0xff] %vm4893_vm1, %v2829_v1 }
  0x2d   : > { %506 = vst.msk [vmem:[#allocation2 + $0xc0] sm:$0xff] %vm4893_vm1, %v2829_v1  ;;  %507 = vst.msk [vmem:[#allocation2 + $0xc8] sm:$0xff] %vm4893_vm1, %v2829_v1  ;;  %523 = sbr.rel (%p520_p3) target bundleno = 557 (0x22d), region = 60 }
  0x2e   : > { %508 = vst.msk [vmem:[#allocation2 + $0xd0] sm:$0xff] %vm4893_vm1, %v2829_v1  ;;  %509 = vst.msk [vmem:[#allocation2 + $0xd8] sm:$0xff] %vm4893_vm1, %v2829_v1 }
  0x2f   : > { %510 = vst.msk [vmem:[#allocation2 + $0xe0] sm:$0xff] %vm4893_vm1, %v2829_v1  ;;  %511 = vst.msk [vmem:[#allocation2 + $0xe8] sm:$0xff] %vm4893_vm1, %v2829_v1 }
  0x30   : > { %512 = vst.msk [vmem:[#allocation2 + $0xf0] sm:$0xff] %vm4893_vm1, %v2829_v1  ;;  %513 = vst.msk [vmem:[#allocation2 + $0xf8] sm:$0xff] %vm4893_vm1, %v2829_v1 }
  0x34   : > { %v528_v2 = vld [vmem:[%s4888_s7 + $0x10] sm:$0xff]  ;;  %v2830_v3 = vmov 0   ;;  %v526_v4 = vld [vmem:[%s4888_s7] sm:$0xff]  ;;  %v529_v5 = vld [vmem:[%s4888_s7 + $0x18] sm:$0xff]  ;;  %v755_v61 = vlaneseq }
  0x35   : > { %2711 = vset.pattern.permute.xlu1 %v2830_v3  ;;  %2710 = vset.pattern.permute.xlu0 %v2830_v3  ;;  %v527_v6 = vld [vmem:[%s4888_s7 + $0x8] sm:$0xff]  ;;  %v530_v8 = vld [vmem:[%s4888_s7 + $0x20] sm:$0xff]  ;;  %v533_v9 = vld [vmem:[%s4888_s7 + $0x38] sm:$0xff] }
  0x36   : > { %606 = vperm.xlu1 %2711, %v528_v2   ;;  %596 = vperm.xlu0 %2710, %v526_v4   ;;  %v531_v7 = vld [vmem:[%s4888_s7 + $0x28] sm:$0xff]  ;;  %v532_v10 = vld [vmem:[%s4888_s7 + $0x30] sm:$0xff]  ;;  %v534_v12 = vld [vmem:[%s4888_s7 + $0x40] sm:$0xff]  ;;  %v756_v0 = vshrl.u32 %v755_v61, 7 }
  0x37   : > { %v535_v11 = vld [vmem:[%s4888_s7 + $0x48] sm:$0xff]  ;;  %v537_v13 = vld [vmem:[%s4888_s7 + $0x58] sm:$0xff]  ;;  %v536_v14 = vld [vmem:[%s4888_s7 + $0x50] sm:$0xff] }
  0x38   : > { %v539_v15 = vld [vmem:[%s4888_s7 + $0x68] sm:$0xff]  ;;  %v538_v16 = vld [vmem:[%s4888_s7 + $0x60] sm:$0xff]  ;;  %v541_v17 = vld [vmem:[%s4888_s7 + $0x78] sm:$0xff]  ;;  %v3162_v4 = vsub.s32 0, %v756_v0 }
  0x39   : > { %v540_v18 = vld [vmem:[%s4888_s7 + $0x70] sm:$0xff]  ;;  %v543_v19 = vld [vmem:[%s4888_s7 + $0x88] sm:$0xff]  ;;  %v542_v20 = vld [vmem:[%s4888_s7 + $0x80] sm:$0xff] }
  0x3a   : > { %611 = vperm.xlu1 %2711, %v529_v5   ;;  %601 = vperm.xlu0 %2710, %v527_v6   ;;  %v545_v21 = vld [vmem:[%s4888_s7 + $0x98] sm:$0xff]  ;;  %v544_v22 = vld [vmem:[%s4888_s7 + $0x90] sm:$0xff]  ;;  %v547_v23 = vld [vmem:[%s4888_s7 + $0xa8] sm:$0xff]  ;;  %v3164_v5 = vsub.s32 1, %v756_v0 }
  0x3b   : > { %v546_v24 = vld [vmem:[%s4888_s7 + $0xa0] sm:$0xff]  ;;  %v549_v25 = vld [vmem:[%s4888_s7 + $0xb8] sm:$0xff]  ;;  %v548_v26 = vld [vmem:[%s4888_s7 + $0xb0] sm:$0xff] }
  0x3c   : > { %v551_v27 = vld [vmem:[%s4888_s7 + $0xc8] sm:$0xff]  ;;  %v550_v28 = vld [vmem:[%s4888_s7 + $0xc0] sm:$0xff]  ;;  %v553_v29 = vld [vmem:[%s4888_s7 + $0xd8] sm:$0xff] }
  0x3d   : > { %v552_v30 = vld [vmem:[%s4888_s7 + $0xd0] sm:$0xff]  ;;  %v555_v31 = vld [vmem:[%s4888_s7 + $0xe8] sm:$0xff]  ;;  %v554_v32 = vld [vmem:[%s4888_s7 + $0xe0] sm:$0xff] }
  0x3e   : > { %621 = vperm.xlu1 %2711, %v531_v7   ;;  %616 = vperm.xlu0 %2710, %v530_v8   ;;  %v557_v33 = vld [vmem:[%s4888_s7 + $0xf8] sm:$0xff]  ;;  %v556_v34 = vld [vmem:[%s4888_s7 + $0xf0] sm:$0xff]  ;;  %v559_v35 = vld [vmem:[%s4889_s8 + $0x8] sm:$0xff] }
  0x3f   : > { %v558_v36 = vld [vmem:[%s4889_s8] sm:$0xff]  ;;  %v561_v37 = vld [vmem:[%s4889_s8 + $0x18] sm:$0xff]  ;;  %v560_v38 = vld [vmem:[%s4889_s8 + $0x10] sm:$0xff] }
  0x40   : > { %v563_v39 = vld [vmem:[%s4889_s8 + $0x28] sm:$0xff]  ;;  %v562_v40 = vld [vmem:[%s4889_s8 + $0x20] sm:$0xff]  ;;  %v565_v41 = vld [vmem:[%s4889_s8 + $0x38] sm:$0xff] }
  0x41   : > { %v564_v42 = vld [vmem:[%s4889_s8 + $0x30] sm:$0xff]  ;;  %v567_v43 = vld [vmem:[%s4889_s8 + $0x48] sm:$0xff]  ;;  %v566_v44 = vld [vmem:[%s4889_s8 + $0x40] sm:$0xff] }
  0x42   : > { %631 = vperm.xlu1 %2711, %v533_v9   ;;  %626 = vperm.xlu0 %2710, %v532_v10   ;;  %v569_v45 = vld [vmem:[%s4889_s8 + $0x58] sm:$0xff]  ;;  %v568_v46 = vld [vmem:[%s4889_s8 + $0x50] sm:$0xff]  ;;  %v571_v47 = vld [vmem:[%s4889_s8 + $0x68] sm:$0xff] }
  0x43   : > { %v570_v48 = vld [vmem:[%s4889_s8 + $0x60] sm:$0xff]  ;;  %v573_v49 = vld [vmem:[%s4889_s8 + $0x78] sm:$0xff]  ;;  %v572_v50 = vld [vmem:[%s4889_s8 + $0x70] sm:$0xff] }
  0x44   : > { %v575_v51 = vld [vmem:[%s4889_s8 + $0x88] sm:$0xff]  ;;  %v574_v52 = vld [vmem:[%s4889_s8 + $0x80] sm:$0xff]  ;;  %v577_v53 = vld [vmem:[%s4889_s8 + $0x98] sm:$0xff] }
  0x45   : > { %v576_v54 = vld [vmem:[%s4889_s8 + $0x90] sm:$0xff]  ;;  %v579_v55 = vld [vmem:[%s4889_s8 + $0xa8] sm:$0xff]  ;;  %v578_v56 = vld [vmem:[%s4889_s8 + $0xa0] sm:$0xff] }
  0x46   : > { %641 = vperm.xlu1 %2711, %v535_v11   ;;  %636 = vperm.xlu0 %2710, %v534_v12   ;;  %v581_v57 = vld [vmem:[%s4889_s8 + $0xb8] sm:$0xff]  ;;  %v580_v58 = vld [vmem:[%s4889_s8 + $0xb0] sm:$0xff]  ;;  %v583_v59 = vld [vmem:[%s4889_s8 + $0xc8] sm:$0xff] }
  0x47   : > { %v582_v60 = vld [vmem:[%s4889_s8 + $0xc0] sm:$0xff]  ;;  %v585_v62 = vld [vmem:[%s4889_s8 + $0xd8] sm:$0xff]  ;;  %v584_v63 = vld [vmem:[%s4889_s8 + $0xd0] sm:$0xff] }
  0x48   : > { %v587_v1 = vld [vmem:[%s4889_s8 + $0xe8] sm:$0xff]  ;;  %v586_v2 = vld [vmem:[%s4889_s8 + $0xe0] sm:$0xff]  ;;  %v589_v8 = vld [vmem:[%s4889_s8 + $0xf8] sm:$0xff] }
  0x49   : > { %v524_v6 = vld [vmem:[%s4886_s5] sm:$0x3]  ;;  %v588_v9 = vld [vmem:[%s4889_s8 + $0xf0] sm:$0xff] }
  0x4a   : > { %651 = vperm.xlu1 %2711, %v537_v13   ;;  %646 = vperm.xlu0 %2710, %v536_v14   ;;  %v590_v7 = vld [vmem:[%s2960_s30] sm:$0x3]  ;;  %v3178_v11 = vrot.slane %v524_v6, %v3162_v4  ;;  %v3181_v12 = vrot.slane %v524_v6, %v3164_v5 }
  0x4b   : > { %v592_v10 = vld [vmem:[%s2965_s12] sm:$0x3]  ;;  %vm591_vm2 = vcmp.gt.f32.partialorder %v590_v7, 0.5 }
  0x4c   : > { %vm593_vm3 = vcmp.gt.f32.partialorder %v592_v10, 0.5  ;;  %v525_v13 = vld [vmem:[%s4887_s6] sm:$0x3]  ;;  %v3187_v14 = vsel %vm591_vm2, 1, %v2830_v3 }
  0x4e   : > { %661 = vperm.xlu1 %2711, %v539_v15   ;;  %656 = vperm.xlu0 %2710, %v538_v16  }
  0x52   : > { %671 = vperm.xlu1 %2711, %v541_v17   ;;  %666 = vperm.xlu0 %2710, %v540_v18  }
  0x56   : > { %681 = vperm.xlu1 %2711, %v543_v19   ;;  %676 = vperm.xlu0 %2710, %v542_v20  }
  0x5a   : > { %691 = vperm.xlu1 %2711, %v545_v21   ;;  %686 = vperm.xlu0 %2710, %v544_v22   ;;  %v3194_v21 = vsel %vm593_vm3, 1, %v2830_v3  ;;  %v3197_v22 = vrot.slane %v525_v13, %v3162_v4 }
  0x5e   : > { %701 = vperm.xlu1 %2711, %v547_v23   ;;  %696 = vperm.xlu0 %2710, %v546_v24   ;;  %v3200_v23 = vrot.slane %v525_v13, %v3164_v5 }
  0x62   : > { %711 = vperm.xlu1 %2711, %v549_v25   ;;  %706 = vperm.xlu0 %2710, %v548_v26  }
  0x66   : > { %721 = vperm.xlu1 %2711, %v551_v27   ;;  %716 = vperm.xlu0 %2710, %v550_v28  }
  0x6a   : > { %731 = vperm.xlu1 %2711, %v553_v29   ;;  %726 = vperm.xlu0 %2710, %v552_v30  }
  0x6e   : > { %741 = vperm.xlu1 %2711, %v555_v31   ;;  %736 = vperm.xlu0 %2710, %v554_v32  }
  0x72   : > { %751 = vperm.xlu1 %2711, %v557_v33   ;;  %746 = vperm.xlu0 %2710, %v556_v34  }
  0x76   : > { %836 = vperm.xlu1 %2711, %v559_v35   ;;  %831 = vperm.xlu0 %2710, %v558_v36  }
  0x7a   : > { %846 = vperm.xlu1 %2711, %v561_v37   ;;  %841 = vperm.xlu0 %2710, %v560_v38  }
  0x7e   : > { %856 = vperm.xlu1 %2711, %v563_v39   ;;  %851 = vperm.xlu0 %2710, %v562_v40  }
  0x82   : > { %866 = vperm.xlu1 %2711, %v565_v41   ;;  %861 = vperm.xlu0 %2710, %v564_v42  }
  0x86   : > { %876 = vperm.xlu1 %2711, %v567_v43   ;;  %871 = vperm.xlu0 %2710, %v566_v44  }
  0x8a   : > { %886 = vperm.xlu1 %2711, %v569_v45   ;;  %881 = vperm.xlu0 %2710, %v568_v46  }
  0x8e   : > { %896 = vperm.xlu1 %2711, %v571_v47   ;;  %891 = vperm.xlu0 %2710, %v570_v48  }
  0x92   : > { %906 = vperm.xlu1 %2711, %v573_v49   ;;  %901 = vperm.xlu0 %2710, %v572_v50  }
  0x96   : > { %916 = vperm.xlu1 %2711, %v575_v51   ;;  %911 = vperm.xlu0 %2710, %v574_v52  }
  0x9a   : > { %926 = vperm.xlu1 %2711, %v577_v53   ;;  %921 = vperm.xlu0 %2710, %v576_v54  }
  0x9e   : > { %936 = vperm.xlu1 %2711, %v579_v55   ;;  %931 = vperm.xlu0 %2710, %v578_v56  }
  0xa2   : > { %946 = vperm.xlu1 %2711, %v581_v57   ;;  %941 = vperm.xlu0 %2710, %v580_v58  }
  0xa6   : > { %956 = vperm.xlu1 %2711, %v583_v59   ;;  %951 = vperm.xlu0 %2710, %v582_v60  }
  0xaa   : > { %966 = vperm.xlu1 %2711, %v585_v62   ;;  %961 = vperm.xlu0 %2710, %v584_v63  }
  0xae   : > { %976 = vperm.xlu1 %2711, %v587_v1   ;;  %971 = vperm.xlu0 %2710, %v586_v2  }
  0xb2   : > { %986 = vperm.xlu1 %2711, %v589_v8   ;;  %981 = vperm.xlu0 %2710, %v588_v9  }
  0xb5   : > { %v607_v15 = vpop.permute.xlu1 %606  ;;  %v597_v16 = vpop.permute.xlu0 %596 }
  0xb6   : > { %v769_v17 = vsub.f32 %v607_v15, %v3178_v11  ;;  %v770_v18 = vsub.f32 %v607_v15, %v3181_v12  ;;  %v765_v19 = vsub.f32 %v597_v16, %v3178_v11  ;;  %v766_v20 = vsub.f32 %v597_v16, %v3181_v12 }
  0xb8   : > { %v2552_v24 = vadd.f32 -0.5, %v769_v17  ;;  %v2553_v25 = vadd.f32 -0.5, %v770_v18  ;;  %v2548_v28 = vadd.f32 -0.5, %v765_v19  ;;  %v2549_v29 = vadd.f32 -0.5, %v766_v20 }
  0xb9   : > { %v612_v30 = vpop.permute.xlu1 %611  ;;  %v602_v34 = vpop.permute.xlu0 %601  ;;  %v3212_v35 = vmul.f32 %v769_v17, %v769_v17  ;;  %v3214_v36 = vmul.f32 %v770_v18, %v770_v18  ;;  %v3222_v41 = vmul.f32 %v765_v19, %v765_v19  ;;  %v3224_v42 = vmul.f32 %v766_v20, %v766_v20 }
  0xba   : > { %v771_v32 = vsub.f32 %v612_v30, %v3178_v11  ;;  %v772_v33 = vsub.f32 %v612_v30, %v3181_v12  ;;  %v767_v37 = vsub.f32 %v602_v34, %v3178_v11  ;;  %v768_v38 = vsub.f32 %v602_v34, %v3181_v12 }
  0xbb   : > { %v3218_v39 = vmul.f32 %v2552_v24, %v2552_v24  ;;  %v3220_v40 = vmul.f32 %v2553_v25, %v2553_v25  ;;  %v3226_v43 = vmul.f32 %v2548_v28, %v2548_v28  ;;  %v3228_v44 = vmul.f32 %v2549_v29, %v2549_v29 }
  0xbc   : > { %v2554_v45 = vadd.f32 -0.5, %v771_v32  ;;  %v2555_v46 = vadd.f32 -0.5, %v772_v33  ;;  %v2550_v48 = vadd.f32 -0.5, %v767_v37  ;;  %v2551_v49 = vadd.f32 -0.5, %v768_v38 }
  0xbd   : > { %v622_v47 = vpop.permute.xlu1 %621  ;;  %v617_v52 = vpop.permute.xlu0 %616  ;;  %v3232_v53 = vmul.f32 %v771_v32, %v771_v32  ;;  %v3234_v54 = vmul.f32 %v772_v33, %v772_v33  ;;  %v3238_v57 = vmul.f32 %v767_v37, %v767_v37  ;;  %v3240_v58 = vmul.f32 %v768_v38, %v768_v38 }
  0xbe   : > { %v775_v50 = vsub.f32 %v622_v47, %v3178_v11  ;;  %v776_v51 = vsub.f32 %v622_v47, %v3181_v12  ;;  %v773_v55 = vsub.f32 %v617_v52, %v3178_v11  ;;  %v774_v56 = vsub.f32 %v617_v52, %v3181_v12 }
  0xbf   : > { %v3242_v61 = vmul.f32 %v2554_v45, %v2554_v45  ;;  %v3244_v62 = vmul.f32 %v2555_v46, %v2555_v46  ;;  %v3246_v2 = vmul.f32 %v2550_v48, %v2550_v48  ;;  %v3248_v6 = vmul.f32 %v2551_v49, %v2551_v49 }
  0xc0   : > { %v2558_v59 = vadd.f32 -0.5, %v775_v50  ;;  %v2559_v60 = vadd.f32 -0.5, %v776_v51  ;;  %v2556_v63 = vadd.f32 -0.5, %v773_v55  ;;  %v2557_v0 = vadd.f32 -0.5, %v774_v56 }
  0xc1   : > { %v632_v1 = vpop.permute.xlu1 %631  ;;  %v627_v9 = vpop.permute.xlu0 %626  ;;  %v3252_v10 = vmul.f32 %v775_v50, %v775_v50  ;;  %v3254_v13 = vmul.f32 %v776_v51, %v776_v51  ;;  %v3262_v19 = vmul.f32 %v773_v55, %v773_v55  ;;  %v3264_v20 = vmul.f32 %v774_v56, %v774_v56 }
  0xc2   : > { %v779_v7 = vsub.f32 %v632_v1, %v3178_v11  ;;  %v780_v8 = vsub.f32 %v632_v1, %v3181_v12  ;;  %v777_v15 = vsub.f32 %v627_v9, %v3178_v11  ;;  %v778_v16 = vsub.f32 %v627_v9, %v3181_v12 }
  0xc3   : > { %v3258_v17 = vmul.f32 %v2558_v59, %v2558_v59  ;;  %v3260_v18 = vmul.f32 %v2559_v60, %v2559_v60  ;;  %v3266_v24 = vmul.f32 %v2556_v63, %v2556_v63  ;;  %v3268_v25 = vmul.f32 %v2557_v0, %v2557_v0 }
  0xc4   : > { %v2562_v28 = vadd.f32 -0.5, %v779_v7  ;;  %v2563_v29 = vadd.f32 -0.5, %v780_v8  ;;  %v2560_v32 = vadd.f32 -0.5, %v777_v15  ;;  %v2561_v33 = vadd.f32 -0.5, %v778_v16 }
  0xc5   : > { %v642_v30 = vpop.permute.xlu1 %641  ;;  %v637_v38 = vpop.permute.xlu0 %636  ;;  %v3272_v45 = vmul.f32 %v779_v7, %v779_v7  ;;  %v3274_v46 = vmul.f32 %v780_v8, %v780_v8  ;;  %v3278_v49 = vmul.f32 %v777_v15, %v777_v15  ;;  %v3280_v50 = vmul.f32 %v778_v16, %v778_v16 }
  0xc6   : > { %v783_v34 = vsub.f32 %v642_v30, %v3178_v11  ;;  %v784_v37 = vsub.f32 %v642_v30, %v3181_v12  ;;  %v781_v47 = vsub.f32 %v637_v38, %v3178_v11  ;;  %v782_v48 = vsub.f32 %v637_v38, %v3181_v12 }
  0xc7   : > { %v3282_v55 = vmul.f32 %v2562_v28, %v2562_v28  ;;  %v3284_v56 = vmul.f32 %v2563_v29, %v2563_v29  ;;  %v3286_v0 = vmul.f32 %v2560_v32, %v2560_v32  ;;  %v3288_v1 = vmul.f32 %v2561_v33, %v2561_v33 }
  0xc8   : > { %v2566_v51 = vadd.f32 -0.5, %v783_v34  ;;  %v2567_v52 = vadd.f32 -0.5, %v784_v37  ;;  %v2564_v59 = vadd.f32 -0.5, %v781_v47  ;;  %v2565_v60 = vadd.f32 -0.5, %v782_v48 }
  0xc9   : > { %v652_v63 = vpop.permute.xlu1 %651  ;;  %v647_v9 = vpop.permute.xlu0 %646  ;;  %v3292_v15 = vmul.f32 %v783_v34, %v783_v34  ;;  %v3294_v16 = vmul.f32 %v784_v37, %v784_v37  ;;  %v3302_v32 = vmul.f32 %v781_v47, %v781_v47  ;;  %v3304_v33 = vmul.f32 %v782_v48, %v782_v48 }
  0xca   : > { %v787_v7 = vsub.f32 %v652_v63, %v3178_v11  ;;  %v788_v8 = vsub.f32 %v652_v63, %v3181_v12  ;;  %v785_v28 = vsub.f32 %v647_v9, %v3178_v11  ;;  %v786_v29 = vsub.f32 %v647_v9, %v3181_v12 }
  0xcb   : > { %4894 = vst [vmem:[#allocation8_spill] sm:$0xff] %v3292_v15  ;;  %4895 = vst [vmem:[#allocation9_spill] sm:$0xff] %v3294_v16  ;;  %v3298_v30 = vmul.f32 %v2566_v51, %v2566_v51  ;;  %v3300_v38 = vmul.f32 %v2567_v52, %v2567_v52  ;;  %v3306_v31 = vmul.f32 %v2564_v59, %v2564_v59 }
  0xcc   : > { %4898 = vst [vmem:[#allocation12_spill] sm:$0xff] %v3302_v32  ;;  %4899 = vst [vmem:[#allocation13_spill] sm:$0xff] %v3304_v33  ;;  %v3308_v63 = vmul.f32 %v2565_v60, %v2565_v60  ;;  %v2570_v34 = vadd.f32 -0.5, %v787_v7  ;;  %v2571_v3 = vadd.f32 -0.5, %v788_v8  ;;  %v2568_v27 = vadd.f32 -0.5, %v785_v28 }
  0xcd   : > { %4896 = vst [vmem:[#allocation10_spill] sm:$0xff] %v3298_v30  ;;  %4897 = vst [vmem:[#allocation11_spill] sm:$0xff] %v3300_v38  ;;  %v662_v37 = vpop.permute.xlu1 %661  ;;  %v2569_v26 = vadd.f32 -0.5, %v786_v29  ;;  %v657_v9 = vpop.permute.xlu0 %656  ;;  %v3312_v52 = vmul.f32 %v787_v7, %v787_v7  ;;  %v3314_v47 = vmul.f32 %v788_v8, %v788_v8  ;;  %v3318_v60 = vmul.f32 %v785_v28, %v785_v28 }
  0xce   : > { %4900 = vst [vmem:[#allocation14_spill] sm:$0xff] %v3306_v31  ;;  %4901 = vst [vmem:[#allocation15_spill] sm:$0xff] %v3308_v63  ;;  %v791_v16 = vsub.f32 %v662_v37, %v3178_v11  ;;  %v792_v51 = vsub.f32 %v662_v37, %v3181_v12  ;;  %v789_v48 = vsub.f32 %v657_v9, %v3178_v11 }
  0xcf   : > { %4902 = vst [vmem:[#allocation16_spill] sm:$0xff] %v3312_v52  ;;  %4903 = vst [vmem:[#allocation17_spill] sm:$0xff] %v3314_v47  ;;  %v790_v59 = vsub.f32 %v657_v9, %v3181_v12  ;;  %v3320_v33 = vmul.f32 %v786_v29, %v786_v29  ;;  %v3322_v31 = vmul.f32 %v2570_v34, %v2570_v34 }
  0xd0   : > { %4904 = vst [vmem:[#allocation18_spill] sm:$0xff] %v3318_v60  ;;  %v2574_v32 = vadd.f32 -0.5, %v791_v16  ;;  %v2575_v63 = vadd.f32 -0.5, %v792_v51  ;;  %v3324_v15 = vmul.f32 %v2571_v3, %v2571_v3  ;;  %v2572_v37 = vadd.f32 -0.5, %v789_v48 }
  0xd1   : > { %4905 = vst [vmem:[#allocation19_spill] sm:$0xff] %v3320_v33  ;;  %4906 = vst [vmem:[#allocation20_spill] sm:$0xff] %v3322_v31  ;;  %v2573_v38 = vadd.f32 -0.5, %v790_v59  ;;  %v672_v7 = vpop.permute.xlu1 %671  ;;  %v3326_v52 = vmul.f32 %v2568_v27, %v2568_v27  ;;  %v3328_v8 = vmul.f32 %v2569_v26, %v2569_v26  ;;  %v667_v9 = vpop.permute.xlu0 %666  ;;  %v3332_v29 = vmul.f32 %v791_v16, %v791_v16 }
  0xd2   : > { %4907 = vst [vmem:[#allocation21_spill] sm:$0xff] %v3324_v15  ;;  %v795_v47 = vsub.f32 %v672_v7, %v3178_v11  ;;  %v796_v28 = vsub.f32 %v672_v7, %v3181_v12  ;;  %v3334_v33 = vmul.f32 %v792_v51, %v792_v51  ;;  %v793_v34 = vsub.f32 %v667_v9, %v3178_v11 }
  0xd3   : > { %4908 = vst [vmem:[#allocation22_spill] sm:$0xff] %v3326_v52  ;;  %4909 = vst [vmem:[#allocation23_spill] sm:$0xff] %v3328_v8  ;;  %v794_v3 = vsub.f32 %v667_v9, %v3181_v12  ;;  %v3338_v60 = vmul.f32 %v2574_v32, %v2574_v32  ;;  %v3340_v15 = vmul.f32 %v2575_v63, %v2575_v63 }
  0xd4   : > { %4910 = vst [vmem:[#allocation24_spill] sm:$0xff] %v3332_v29  ;;  %4911 = vst [vmem:[#allocation25_spill] sm:$0xff] %v3334_v33  ;;  %v3342_v27 = vmul.f32 %v789_v48, %v789_v48  ;;  %v3344_v26 = vmul.f32 %v790_v59, %v790_v59  ;;  %v3346_v8 = vmul.f32 %v2572_v37, %v2572_v37  ;;  %v2578_v16 = vadd.f32 -0.5, %v795_v47 }
  0xd5   : > { %4912 = vst [vmem:[#allocation26_spill] sm:$0xff] %v3338_v60  ;;  %4913 = vst [vmem:[#allocation27_spill] sm:$0xff] %v3340_v15  ;;  %v3348_v7 = vmul.f32 %v2573_v38, %v2573_v38  ;;  %v2579_v29 = vadd.f32 -0.5, %v796_v28  ;;  %v682_v51 = vpop.permute.xlu1 %681  ;;  %v2576_v33 = vadd.f32 -0.5, %v793_v34  ;;  %v2577_v52 = vadd.f32 -0.5, %v794_v3  ;;  %v677_v9 = vpop.permute.xlu0 %676 }
  0xd6   : > { %4914 = vst [vmem:[#allocation28_spill] sm:$0xff] %v3342_v27  ;;  %4915 = vst [vmem:[#allocation29_spill] sm:$0xff] %v3344_v26  ;;  %v799_v31 = vsub.f32 %v682_v51, %v3178_v11  ;;  %v800_v32 = vsub.f32 %v682_v51, %v3181_v12  ;;  %v3352_v63 = vmul.f32 %v795_v47, %v795_v47 }
  0xd7   : > { %4916 = vst [vmem:[#allocation30_spill] sm:$0xff] %v3346_v8  ;;  %4917 = vst [vmem:[#allocation31_spill] sm:$0xff] %v3348_v7  ;;  %v3354_v48 = vmul.f32 %v796_v28, %v796_v28  ;;  %v797_v59 = vsub.f32 %v677_v9, %v3178_v11  ;;  %v798_v37 = vsub.f32 %v677_v9, %v3181_v12 }
  0xd8   : > { %4918 = vst [vmem:[#allocation32_spill] sm:$0xff] %v3352_v63  ;;  %v3358_v38 = vmul.f32 %v793_v34, %v793_v34  ;;  %v3360_v26 = vmul.f32 %v794_v3, %v794_v3  ;;  %v2582_v27 = vadd.f32 -0.5, %v799_v31  ;;  %v2583_v7 = vadd.f32 -0.5, %v800_v32 }
  0xd9   : > { %4919 = vst [vmem:[#allocation33_spill] sm:$0xff] %v3354_v48  ;;  %v3362_v8 = vmul.f32 %v2578_v16, %v2578_v16  ;;  %v3364_v15 = vmul.f32 %v2579_v29, %v2579_v29  ;;  %v2580_v51 = vadd.f32 -0.5, %v797_v59  ;;  %v2581_v60 = vadd.f32 -0.5, %v798_v37  ;;  %v692_v47 = vpop.permute.xlu1 %691  ;;  %v687_v9 = vpop.permute.xlu0 %686 }
  0xda   : > { %4920 = vst [vmem:[#allocation34_spill] sm:$0xff] %v3358_v38  ;;  %4921 = vst [vmem:[#allocation35_spill] sm:$0xff] %v3360_v26  ;;  %v3366_v63 = vmul.f32 %v2576_v33, %v2576_v33  ;;  %v3368_v28 = vmul.f32 %v2577_v52, %v2577_v52  ;;  %v803_v48 = vsub.f32 %v692_v47, %v3178_v11 }
  0xdb   : > { %4922 = vst [vmem:[#allocation36_spill] sm:$0xff] %v3362_v8  ;;  %4923 = vst [vmem:[#allocation37_spill] sm:$0xff] %v3364_v15  ;;  %v804_v34 = vsub.f32 %v692_v47, %v3181_v12  ;;  %v3372_v3 = vmul.f32 %v799_v31, %v799_v31  ;;  %v3374_v26 = vmul.f32 %v800_v32, %v800_v32 }
  0xdc   : > { %4924 = vst [vmem:[#allocation38_spill] sm:$0xff] %v3366_v63  ;;  %4925 = vst [vmem:[#allocation39_spill] sm:$0xff] %v3368_v28  ;;  %v801_v16 = vsub.f32 %v687_v9, %v3178_v11  ;;  %v802_v29 = vsub.f32 %v687_v9, %v3181_v12  ;;  %v3378_v38 = vmul.f32 %v2582_v27, %v2582_v27  ;;  %v2586_v31 = vadd.f32 -0.5, %v803_v48 }
  0xdd   : > { %4926 = vst [vmem:[#allocation40_spill] sm:$0xff] %v3372_v3  ;;  %4927 = vst [vmem:[#allocation41_spill] sm:$0xff] %v3374_v26  ;;  %v3380_v15 = vmul.f32 %v2583_v7, %v2583_v7  ;;  %v3382_v33 = vmul.f32 %v797_v59, %v797_v59  ;;  %v3384_v52 = vmul.f32 %v798_v37, %v798_v37  ;;  %v2587_v3 = vadd.f32 -0.5, %v804_v34  ;;  %v702_v32 = vpop.permute.xlu1 %701  ;;  %v697_v9 = vpop.permute.xlu0 %696 }
  0xde   : > { %4928 = vst [vmem:[#allocation42_spill] sm:$0xff] %v3378_v38  ;;  %v3386_v28 = vmul.f32 %v2580_v51, %v2580_v51  ;;  %v3388_v47 = vmul.f32 %v2581_v60, %v2581_v60  ;;  %v2584_v26 = vadd.f32 -0.5, %v801_v16  ;;  %v2585_v63 = vadd.f32 -0.5, %v802_v29 }
  0xdf   : > { %4929 = vst [vmem:[#allocation43_spill] sm:$0xff] %v3380_v15  ;;  %4930 = vst [vmem:[#allocation44_spill] sm:$0xff] %v3382_v33  ;;  %v807_v8 = vsub.f32 %v702_v32, %v3178_v11  ;;  %v808_v27 = vsub.f32 %v702_v32, %v3181_v12  ;;  %v3392_v7 = vmul.f32 %v803_v48, %v803_v48 }
  0xe0   : > { %4931 = vst [vmem:[#allocation45_spill] sm:$0xff] %v3384_v52  ;;  %4932 = vst [vmem:[#allocation46_spill] sm:$0xff] %v3386_v28  ;;  %v3394_v59 = vmul.f32 %v804_v34, %v804_v34  ;;  %v805_v37 = vsub.f32 %v697_v9, %v3178_v11  ;;  %v806_v51 = vsub.f32 %v697_v9, %v3181_v12 }
  0xe1   : > { %4933 = vst [vmem:[#allocation47_spill] sm:$0xff] %v3388_v47  ;;  %4934 = vst [vmem:[#allocation48_spill] sm:$0xff] %v3392_v7  ;;  %v3398_v60 = vmul.f32 %v801_v16, %v801_v16  ;;  %v3400_v52 = vmul.f32 %v802_v29, %v802_v29  ;;  %v2590_v33 = vadd.f32 -0.5, %v807_v8  ;;  %v2591_v47 = vadd.f32 -0.5, %v808_v27  ;;  %v712_v48 = vpop.permute.xlu1 %711  ;;  %v707_v9 = vpop.permute.xlu0 %706 }
  0xe2   : > { %4935 = vst [vmem:[#allocation49_spill] sm:$0xff] %v3394_v59  ;;  %v3402_v28 = vmul.f32 %v2586_v31, %v2586_v31  ;;  %v3404_v15 = vmul.f32 %v2587_v3, %v2587_v3  ;;  %v2588_v32 = vadd.f32 -0.5, %v805_v37  ;;  %v2589_v38 = vadd.f32 -0.5, %v806_v51 }
  0xe3   : > { %4936 = vst [vmem:[#allocation50_spill] sm:$0xff] %v3398_v60  ;;  %4937 = vst [vmem:[#allocation51_spill] sm:$0xff] %v3400_v52  ;;  %v3406_v7 = vmul.f32 %v2584_v26, %v2584_v26  ;;  %v3408_v34 = vmul.f32 %v2585_v63, %v2585_v63  ;;  %v811_v59 = vsub.f32 %v712_v48, %v3178_v11 }
  0xe4   : > { %4938 = vst [vmem:[#allocation52_spill] sm:$0xff] %v3402_v28  ;;  %4939 = vst [vmem:[#allocation53_spill] sm:$0xff] %v3404_v15  ;;  %v812_v16 = vsub.f32 %v712_v48, %v3181_v12  ;;  %v3412_v29 = vmul.f32 %v807_v8, %v807_v8  ;;  %v3414_v52 = vmul.f32 %v808_v27, %v808_v27 }
  0xe5   : > { %4940 = vst [vmem:[#allocation54_spill] sm:$0xff] %v3406_v7  ;;  %4941 = vst [vmem:[#allocation55_spill] sm:$0xff] %v3408_v34  ;;  %v809_v31 = vsub.f32 %v707_v9, %v3178_v11  ;;  %v810_v3 = vsub.f32 %v707_v9, %v3181_v12  ;;  %v3418_v60 = vmul.f32 %v2590_v33, %v2590_v33  ;;  %v2594_v8 = vadd.f32 -0.5, %v811_v59  ;;  %v722_v27 = vpop.permute.xlu1 %721  ;;  %v717_v9 = vpop.permute.xlu0 %716 }
  0xe6   : > { %4942 = vst [vmem:[#allocation56_spill] sm:$0xff] %v3412_v29  ;;  %4943 = vst [vmem:[#allocation57_spill] sm:$0xff] %v3414_v52  ;;  %v3420_v15 = vmul.f32 %v2591_v47, %v2591_v47  ;;  %v3422_v26 = vmul.f32 %v805_v37, %v805_v37  ;;  %v3424_v63 = vmul.f32 %v806_v51, %v806_v51  ;;  %v2595_v29 = vadd.f32 -0.5, %v812_v16 }
  0xe7   : > { %4944 = vst [vmem:[#allocation58_spill] sm:$0xff] %v3418_v60  ;;  %v3426_v34 = vmul.f32 %v2588_v32, %v2588_v32  ;;  %v3428_v48 = vmul.f32 %v2589_v38, %v2589_v38  ;;  %v2592_v52 = vadd.f32 -0.5, %v809_v31  ;;  %v2593_v7 = vadd.f32 -0.5, %v810_v3 }
  0xe8   : > { %4945 = vst [vmem:[#allocation59_spill] sm:$0xff] %v3420_v15  ;;  %4946 = vst [vmem:[#allocation60_spill] sm:$0xff] %v3422_v26  ;;  %v815_v28 = vsub.f32 %v722_v27, %v3178_v11  ;;  %v816_v33 = vsub.f32 %v722_v27, %v3181_v12  ;;  %v3432_v47 = vmul.f32 %v811_v59, %v811_v59 }
  0xe9   : > { %4947 = vst [vmem:[#allocation61_spill] sm:$0xff] %v3424_v63  ;;  %4948 = vst [vmem:[#allocation62_spill] sm:$0xff] %v3426_v34  ;;  %v3434_v37 = vmul.f32 %v812_v16, %v812_v16  ;;  %v813_v51 = vsub.f32 %v717_v9, %v3178_v11  ;;  %v814_v32 = vsub.f32 %v717_v9, %v3181_v12  ;;  %v732_v59 = vpop.permute.xlu1 %731  ;;  %v727_v9 = vpop.permute.xlu0 %726 }
  0xea   : > { %4949 = vst [vmem:[#allocation63_spill] sm:$0xff] %v3428_v48  ;;  %4950 = vst [vmem:[#allocation64_spill] sm:$0xff] %v3432_v47  ;;  %v3438_v38 = vmul.f32 %v809_v31, %v809_v31  ;;  %v3440_v63 = vmul.f32 %v810_v3, %v810_v3  ;;  %v2598_v26 = vadd.f32 -0.5, %v815_v28  ;;  %v2599_v48 = vadd.f32 -0.5, %v816_v33 }
  0xeb   : > { %4951 = vst [vmem:[#allocation65_spill] sm:$0xff] %v3434_v37  ;;  %v3442_v34 = vmul.f32 %v2594_v8, %v2594_v8  ;;  %v3444_v15 = vmul.f32 %v2595_v29, %v2595_v29  ;;  %v2596_v27 = vadd.f32 -0.5, %v813_v51  ;;  %v2597_v60 = vadd.f32 -0.5, %v814_v32 }
  0xec   : > { %4952 = vst [vmem:[#allocation66_spill] sm:$0xff] %v3438_v38  ;;  %4953 = vst [vmem:[#allocation67_spill] sm:$0xff] %v3440_v63  ;;  %v3446_v47 = vmul.f32 %v2592_v52, %v2592_v52  ;;  %v3448_v16 = vmul.f32 %v2593_v7, %v2593_v7  ;;  %v819_v37 = vsub.f32 %v732_v59, %v3178_v11 }
  0xed   : > { %4954 = vst [vmem:[#allocation68_spill] sm:$0xff] %v3442_v34  ;;  %4955 = vst [vmem:[#allocation69_spill] sm:$0xff] %v3444_v15  ;;  %v820_v31 = vsub.f32 %v732_v59, %v3181_v12  ;;  %v3452_v3 = vmul.f32 %v815_v28, %v815_v28  ;;  %v3454_v63 = vmul.f32 %v816_v33, %v816_v33  ;;  %v742_v33 = vpop.permute.xlu1 %741 }
  0xee   : > { %4956 = vst [vmem:[#allocation70_spill] sm:$0xff] %v3446_v47  ;;  %4957 = vst [vmem:[#allocation71_spill] sm:$0xff] %v3448_v16  ;;  %v817_v8 = vsub.f32 %v727_v9, %v3178_v11  ;;  %v818_v29 = vsub.f32 %v727_v9, %v3181_v12  ;;  %v3458_v38 = vmul.f32 %v2598_v26, %v2598_v26  ;;  %v2602_v28 = vadd.f32 -0.5, %v819_v37  ;;  %v737_v9 = vpop.permute.xlu0 %736 }
  0xef   : > { %4958 = vst [vmem:[#allocation72_spill] sm:$0xff] %v3452_v3  ;;  %4959 = vst [vmem:[#allocation73_spill] sm:$0xff] %v3454_v63  ;;  %v3460_v15 = vmul.f32 %v2599_v48, %v2599_v48  ;;  %v3462_v52 = vmul.f32 %v813_v51, %v813_v51  ;;  %v3464_v7 = vmul.f32 %v814_v32, %v814_v32  ;;  %v2603_v3 = vadd.f32 -0.5, %v820_v31 }
  0xf0   : > { %4960 = vst [vmem:[#allocation74_spill] sm:$0xff] %v3458_v38  ;;  %v3466_v16 = vmul.f32 %v2596_v27, %v2596_v27  ;;  %v3468_v59 = vmul.f32 %v2597_v60, %v2597_v60  ;;  %v2600_v63 = vadd.f32 -0.5, %v817_v8  ;;  %v2601_v47 = vadd.f32 -0.5, %v818_v29 }
  0xf1   : > { %4961 = vst [vmem:[#allocation75_spill] sm:$0xff] %v3460_v15  ;;  %4962 = vst [vmem:[#allocation76_spill] sm:$0xff] %v3462_v52  ;;  %v823_v34 = vsub.f32 %v742_v33, %v3178_v11  ;;  %v824_v26 = vsub.f32 %v742_v33, %v3181_v12  ;;  %v3472_v48 = vmul.f32 %v819_v37, %v819_v37  ;;  %v752_v37 = vpop.permute.xlu1 %751 }
  0xf2   : > { %4963 = vst [vmem:[#allocation77_spill] sm:$0xff] %v3464_v7  ;;  %4964 = vst [vmem:[#allocation78_spill] sm:$0xff] %v3466_v16  ;;  %v3474_v51 = vmul.f32 %v820_v31, %v820_v31  ;;  %v821_v32 = vsub.f32 %v737_v9, %v3178_v11  ;;  %v822_v27 = vsub.f32 %v737_v9, %v3181_v12  ;;  %v747_v9 = vpop.permute.xlu0 %746 }
  0xf3   : > { %4965 = vst [vmem:[#allocation79_spill] sm:$0xff] %v3468_v59  ;;  %4966 = vst [vmem:[#allocation80_spill] sm:$0xff] %v3472_v48  ;;  %v3478_v60 = vmul.f32 %v817_v8, %v817_v8  ;;  %v3480_v7 = vmul.f32 %v818_v29, %v818_v29  ;;  %v2606_v52 = vadd.f32 -0.5, %v823_v34  ;;  %v2607_v59 = vadd.f32 -0.5, %v824_v26 }
  0xf4   : > { %4967 = vst [vmem:[#allocation81_spill] sm:$0xff] %v3474_v51  ;;  %v3482_v16 = vmul.f32 %v2602_v28, %v2602_v28  ;;  %v3484_v15 = vmul.f32 %v2603_v3, %v2603_v3  ;;  %v2604_v33 = vadd.f32 -0.5, %v821_v32  ;;  %v2605_v38 = vadd.f32 -0.5, %v822_v27 }
  0xf5   : > { %4968 = vst [vmem:[#allocation82_spill] sm:$0xff] %v3478_v60  ;;  %4969 = vst [vmem:[#allocation83_spill] sm:$0xff] %v3480_v7  ;;  %v3486_v48 = vmul.f32 %v2600_v63, %v2600_v63  ;;  %v3488_v31 = vmul.f32 %v2601_v47, %v2601_v47  ;;  %v827_v51 = vsub.f32 %v752_v37, %v3178_v11 }
  0xf6   : > { %4970 = vst [vmem:[#allocation84_spill] sm:$0xff] %v3482_v16  ;;  %4971 = vst [vmem:[#allocation85_spill] sm:$0xff] %v3484_v15  ;;  %v828_v8 = vsub.f32 %v752_v37, %v3181_v12  ;;  %v3492_v29 = vmul.f32 %v823_v34, %v823_v34  ;;  %v3494_v7 = vmul.f32 %v824_v26, %v824_v26  ;;  %v837_v26 = vpop.permute.xlu1 %836 }
  0xf7   : > { %4972 = vst [vmem:[#allocation86_spill] sm:$0xff] %v3486_v48  ;;  %4973 = vst [vmem:[#allocation87_spill] sm:$0xff] %v3488_v31  ;;  %v825_v28 = vsub.f32 %v747_v9, %v3178_v11  ;;  %v826_v3 = vsub.f32 %v747_v9, %v3181_v12  ;;  %v3498_v60 = vmul.f32 %v2606_v52, %v2606_v52  ;;  %v2610_v34 = vadd.f32 -0.5, %v827_v51 }
  0xf8   : > { %4974 = vst [vmem:[#allocation88_spill] sm:$0xff] %v3492_v29  ;;  %4975 = vst [vmem:[#allocation89_spill] sm:$0xff] %v3494_v7  ;;  %v3500_v15 = vmul.f32 %v2607_v59, %v2607_v59  ;;  %v3502_v63 = vmul.f32 %v821_v32, %v821_v32  ;;  %v3504_v47 = vmul.f32 %v822_v27, %v822_v27  ;;  %v2611_v29 = vadd.f32 -0.5, %v828_v8  ;;  %v832_v59 = vpop.permute.xlu0 %831 }
  0xf9   : > { %4976 = vst [vmem:[#allocation90_spill] sm:$0xff] %v3498_v60  ;;  %v3506_v31 = vmul.f32 %v2604_v33, %v2604_v33  ;;  %v3508_v37 = vmul.f32 %v2605_v38, %v2605_v38  ;;  %v3510_v7 = vmul.f32 %v827_v51, %v827_v51  ;;  %v3512_v11 = vmul.f32 %v828_v8, %v828_v8 }
  0xfa   : > { %4977 = vst [vmem:[#allocation91_spill] sm:$0xff] %v3500_v15  ;;  %4978 = vst [vmem:[#allocation92_spill] sm:$0xff] %v3502_v63  ;;  %v1002_v12 = vsub.f32 %v837_v26, %v3197_v22  ;;  %v1003_v52 = vsub.f32 %v837_v26, %v3200_v23  ;;  %v2608_v32 = vadd.f32 -0.5, %v825_v28  ;;  %v2609_v9 = vadd.f32 -0.5, %v826_v3 }
  0xfb   : > { %4979 = vst [vmem:[#allocation93_spill] sm:$0xff] %v3504_v47  ;;  %4980 = vst [vmem:[#allocation94_spill] sm:$0xff] %v3506_v31  ;;  %v1000_v27 = vsub.f32 %v832_v59, %v3197_v22  ;;  %v1001_v33 = vsub.f32 %v832_v59, %v3200_v23  ;;  %v3518_v31 = vmul.f32 %v825_v28, %v825_v28 }
  0xfc   : > { %4981 = vst [vmem:[#allocation95_spill] sm:$0xff] %v3508_v37  ;;  %4982 = vst [vmem:[#allocation96_spill] sm:$0xff] %v3510_v7  ;;  %v1194_v38 = vmul.f32 %v1002_v12, %v1002_v12  ;;  %v1195_v47 = vmul.f32 %v1003_v52, %v1003_v52  ;;  %v2614_v63 = vadd.f32 -0.5, %v1002_v12  ;;  %v2615_v37 = vadd.f32 -0.5, %v1003_v52  ;;  %v847_v7 = vpop.permute.xlu1 %846  ;;  %v842_v16 = vpop.permute.xlu0 %841 }
  0xfd   : > { %4983 = vst [vmem:[#allocation97_spill] sm:$0xff] %v3512_v11  ;;  %4984 = vst [vmem:[#allocation98_spill] sm:$0xff] %v3518_v31  ;;  %v3520_v51 = vmul.f32 %v826_v3, %v826_v3  ;;  %v2612_v8 = vadd.f32 -0.5, %v1000_v27  ;;  %v2613_v11 = vadd.f32 -0.5, %v1001_v33  ;;  %v3522_v15 = vmul.f32 %v2610_v34, %v2610_v34 }
  0xfe   : > { %v3524_v26 = vmul.f32 %v2611_v29, %v2611_v29  ;;  %v1192_v60 = vmul.f32 %v1000_v27, %v1000_v27  ;;  %v1193_v48 = vmul.f32 %v1001_v33, %v1001_v33  ;;  %v3526_v30 = vmul.f32 %v2608_v32, %v2608_v32 }
  0xff   : > { %4985 = vst [vmem:[#allocation99_spill] sm:$0xff] %v3520_v51  ;;  %v3528_v59 = vmul.f32 %v2609_v9, %v2609_v9  ;;  %v3531_v12 = vadd.f32 %v1194_v38, %v3246_v2  ;;  %v3534_v28 = vadd.f32 %v1195_v47, %v3248_v6  ;;  %v1450_v3 = vmul.f32 %v2614_v63, %v2614_v63 }
 0x100   : > { %4986 = vst [vmem:[#allocation100_spill] sm:$0xff] %v3524_v26  ;;  %4987 = vst [vmem:[#allocation101_spill] sm:$0xff] %v3526_v30  ;;  %v1451_v52 = vmul.f32 %v2615_v37, %v2615_v37  ;;  %v1006_v34 = vsub.f32 %v847_v7, %v3197_v22  ;;  %v1007_v29 = vsub.f32 %v847_v7, %v3200_v23 }
 0x101   : > { %4988 = vst [vmem:[#allocation102_spill] sm:$0xff] %v3528_v59  ;;  %v1448_v51 = vmul.f32 %v2612_v8, %v2612_v8  ;;  %v1449_v27 = vmul.f32 %v2613_v11, %v2613_v11  ;;  %v1004_v33 = vsub.f32 %v842_v16, %v3197_v22  ;;  %v1005_v32 = vsub.f32 %v842_v16, %v3200_v23  ;;  %v857_v59 = vpop.permute.xlu1 %856 }
 0x102   : > { %v3541_v9 = vadd.f32 %v1192_v60, %v3226_v43  ;;  %v3544_v2 = vadd.f32 %v1193_v48, %v3228_v44  ;;  %v2618_v6 = vadd.f32 -0.5, %v1006_v34  ;;  %v2619_v47 = vadd.f32 -0.5, %v1007_v29  ;;  %v852_v43 = vpop.permute.xlu0 %851 }
 0x103   : > { %v1198_v63 = vmul.f32 %v1006_v34, %v1006_v34  ;;  %v1199_v37 = vmul.f32 %v1007_v29, %v1007_v29  ;;  %v2616_v38 = vadd.f32 -0.5, %v1004_v33  ;;  %v2617_v31 = vadd.f32 -0.5, %v1005_v32 }
 0x104   : > { %v3547_v7 = vadd.f32 %v1450_v3, %v3238_v57  ;;  %v3550_v11 = vadd.f32 %v1451_v52, %v3240_v58  ;;  %v1196_v16 = vmul.f32 %v1004_v33, %v1004_v33  ;;  %v1197_v8 = vmul.f32 %v1005_v32, %v1005_v32 }
 0x105   : > { %v3553_v60 = vadd.f32 %v1448_v51, %v3222_v41  ;;  %v3556_v44 = vadd.f32 %v1449_v27, %v3224_v42  ;;  %v1454_v48 = vmul.f32 %v2618_v6, %v2618_v6  ;;  %v1455_v34 = vmul.f32 %v2619_v47, %v2619_v47 }
 0x106   : > { %v1452_v29 = vmul.f32 %v2616_v38, %v2616_v38  ;;  %v1453_v30 = vmul.f32 %v2617_v31, %v2617_v31  ;;  %v1010_v26 = vsub.f32 %v857_v59, %v3197_v22  ;;  %v1011_v57 = vsub.f32 %v857_v59, %v3200_v23 }
 0x107   : > { %v4989_v58 = vrot.slane %v3187_v14, %v3162_v4  ;;  %v3568_v41 = vadd.f32 %v1198_v63, %v3242_v61  ;;  %v3571_v42 = vadd.f32 %v1199_v37, %v3244_v62  ;;  %v1008_v51 = vsub.f32 %v852_v43, %v3197_v22  ;;  %v1888_v61 = vld [vmem:[#allocation2 + $0x10] sm:$0xff] }
 0x108   : > { %v1009_v31 = vsub.f32 %v852_v43, %v3200_v23  ;;  %v4992_v59 = vrot.slane %v3187_v14, %v3164_v5  ;;  %v4995_v27 = vrot.slane %v3194_v21, %v3162_v4  ;;  %v4998_v62 = vrot.slane %v3194_v21, %v3164_v5  ;;  %v867_v43 = vpop.permute.xlu1 %866 }
 0x109   : > { %vm3563_vm4 = vcmp.eq.s32.totalorder %v4989_v58, 1  ;;  %v3597_v14 = vadd.f32 %v1196_v16, %v3218_v39  ;;  %v3600_v32 = vadd.f32 %v1197_v8, %v3220_v40  ;;  %v2622_v6 = vadd.f32 -0.5, %v1010_v26  ;;  %v862_v40 = vpop.permute.xlu0 %861 }
 0x10a   : > { %vm3578_vm5 = vcmp.eq.s32.totalorder %v4992_v59, 1  ;;  %vm3585_vm6 = vcmp.eq.s32.totalorder %v4995_v27, 1  ;;  %vm3592_vm7 = vcmp.eq.s32.totalorder %v4998_v62, 1  ;;  %v2623_v47 = vadd.f32 -0.5, %v1011_v57 }
 0x10b   : > { %v1202_v4 = vmul.f32 %v1010_v26, %v1010_v26  ;;  %v1203_v63 = vmul.f32 %v1011_v57, %v1011_v57  ;;  %v2620_v37 = vadd.f32 -0.5, %v1008_v51  ;;  %v2621_v38 = vadd.f32 -0.5, %v1009_v31 }
 0x10c   : > { %v3603_v58 = vadd.f32 %v1454_v48, %v3232_v53  ;;  %v3606_v5 = vadd.f32 %v1455_v34, %v3234_v54  ;;  %v3609_v21 = vadd.f32 %v1452_v29, %v3212_v35  ;;  %v3612_v39 = vadd.f32 %v1453_v30, %v3214_v36 }
 0x10d   : > { %v1458_v16 = vmul.f32 %v2622_v6, %v2622_v6  ;;  %v1459_v8 = vmul.f32 %v2623_v47, %v2623_v47  ;;  %v1200_v26 = vmul.f32 %v1008_v51, %v1008_v51  ;;  %v1201_v57 = vmul.f32 %v1009_v31, %v1009_v31 }
 0x10e   : > { %v1456_v59 = vmul.f32 %v2620_v37, %v2620_v37  ;;  %v1457_v27 = vmul.f32 %v2621_v38, %v2621_v38  ;;  %v1014_v62 = vsub.f32 %v867_v43, %v3197_v22  ;;  %v1015_v53 = vsub.f32 %v867_v43, %v3200_v23 }
 0x10f   : > { %v3617_v54 = vadd.f32 %v1202_v4, %v3258_v17  ;;  %v3620_v35 = vadd.f32 %v1203_v63, %v3260_v18  ;;  %v1012_v36 = vsub.f32 %v862_v40, %v3197_v22  ;;  %v1013_v30 = vsub.f32 %v862_v40, %v3200_v23 }
 0x110   : > { %v1206_v48 = vmul.f32 %v1014_v62, %v1014_v62  ;;  %v1207_v34 = vmul.f32 %v1015_v53, %v1015_v53  ;;  %v2626_v29 = vadd.f32 -0.5, %v1014_v62  ;;  %v2627_v51 = vadd.f32 -0.5, %v1015_v53 }
 0x111   : > { %v3625_v31 = vadd.f32 %v1200_v26, %v3266_v24  ;;  %v3628_v6 = vadd.f32 %v1201_v57, %v3268_v25  ;;  %v2624_v47 = vadd.f32 -0.5, %v1012_v36  ;;  %v2625_v17 = vadd.f32 -0.5, %v1013_v30  ;;  %v872_v26 = vpop.permute.xlu0 %871 }
 0x112   : > { %v3631_v4 = vadd.f32 %v1458_v16, %v3252_v10  ;;  %v3634_v18 = vadd.f32 %v1459_v8, %v3254_v13  ;;  %v3637_v63 = vadd.f32 %v1456_v59, %v3262_v19  ;;  %v3640_v37 = vadd.f32 %v1457_v27, %v3264_v20  ;;  %v877_v19 = vpop.permute.xlu1 %876 }
 0x113   : > { %v3643_v24 = vadd.f32 %v1206_v48, %v3282_v55  ;;  %v3646_v25 = vadd.f32 %v1207_v34, %v3284_v56  ;;  %v1204_v38 = vmul.f32 %v1012_v36, %v1012_v36  ;;  %v1205_v43 = vmul.f32 %v1013_v30, %v1013_v30 }
 0x114   : > { %v1462_v40 = vmul.f32 %v2626_v29, %v2626_v29  ;;  %v1463_v10 = vmul.f32 %v2627_v51, %v2627_v51  ;;  %v1460_v16 = vmul.f32 %v2624_v47, %v2624_v47  ;;  %v1589_v13 = vsel %vm3563_vm4, %v3531_v12, 1e+18 }
 0x115   : > { %v1461_v8 = vmul.f32 %v2625_v17, %v2625_v17  ;;  %v1590_v20 = vsel %vm3578_vm5, %v3534_v28, 1e+18  ;;  %v1664_v55 = vsel %vm3585_vm6, %v3547_v7, 1e+18  ;;  %v1665_v56 = vsel %vm3592_vm7, %v3550_v11, 1e+18 }
 0x116   : > { %v1728_v57 = vmin.f32 %v1589_v13, %v1664_v55  ;;  %v1729_v59 = vmin.f32 %v1590_v20, %v1665_v56  ;;  %v1587_v12 = vsel %vm3563_vm4, %v3541_v9, 1e+18  ;;  %v1588_v27 = vsel %vm3578_vm5, %v3544_v2, 1e+18  ;;  %v887_v56 = vpop.permute.xlu1 %886 }
 0x117   : > { %v1662_v28 = vsel %vm3585_vm6, %v3553_v60, 1e+18  ;;  %v1663_v7 = vsel %vm3592_vm7, %v3556_v44, 1e+18  ;;  %v1018_v11 = vsub.f32 %v877_v19, %v3197_v22  ;;  %v1019_v62 = vsub.f32 %v877_v19, %v3200_v23 }
 0x118   : > { %v1793_v53 = vmin.f32 %v1728_v57, %v1729_v59  ;;  %v1726_v36 = vmin.f32 %v1587_v12, %v1662_v28  ;;  %v1727_v30 = vmin.f32 %v1588_v27, %v1663_v7  ;;  %v1016_v9 = vsub.f32 %v872_v26, %v3197_v22  ;;  %v5002_v28 = vld [vmem:[#allocation11_spill] sm:$0xff] }
 0x119   : > { %v3676_v48 = vadd.f32 %v1204_v38, %v3286_v0  ;;  %v1210_v2 = vmul.f32 %v1018_v11, %v1018_v11  ;;  %v2630_v34 = vadd.f32 -0.5, %v1018_v11  ;;  %v2631_v29 = vadd.f32 -0.5, %v1019_v62 }
 0x11a   : > { %v3679_v60 = vadd.f32 %v1205_v43, %v3288_v1  ;;  %1794 = vmin.xlane.f32.xlu1 %v1793_v53  ;;  %v1790_v44 = vmin.f32 %v1726_v36, %v1727_v30  ;;  %v1017_v51 = vsub.f32 %v872_v26, %v3200_v23  ;;  %v2628_v47 = vadd.f32 -0.5, %v1016_v9  ;;  %v5001_v43 = vld [vmem:[#allocation10_spill] sm:$0xff]  ;;  %v5003_v30 = vld [vmem:[#allocation8_spill] sm:$0xff] }
 0x11b   : > { %v3683_v17 = vadd.f32 %v1462_v40, %v3272_v45  ;;  %v3686_v13 = vadd.f32 %v1463_v10, %v3274_v46  ;;  %v3689_v0 = vadd.f32 %v1460_v16, %v3278_v49  ;;  %v3692_v38 = vadd.f32 %v1461_v8, %v3280_v50  ;;  %v882_v46 = vpop.permute.xlu0 %881 }
 0x11c   : > { %1791 = vmin.xlane.f32.xlu0 %v1790_v44  ;;  %v1211_v1 = vmul.f32 %v1019_v62, %v1019_v62  ;;  %v3695_v19 = vadd.f32 %v1210_v2, %v5001_v43  ;;  %v1208_v20 = vmul.f32 %v1016_v9, %v1016_v9  ;;  %v2629_v55 = vadd.f32 -0.5, %v1017_v51  ;;  %v5005_v44 = vld [vmem:[#allocation9_spill] sm:$0xff]  ;;  %v5007_v43 = vld [vmem:[#allocation12_spill] sm:$0xff] }
 0x11d   : > { %v1466_v26 = vmul.f32 %v2630_v34, %v2630_v34  ;;  %v1467_v45 = vmul.f32 %v2631_v29, %v2631_v29  ;;  %v1209_v40 = vmul.f32 %v1017_v51, %v1017_v51  ;;  %v1464_v57 = vmul.f32 %v2628_v47, %v2628_v47  ;;  %v5006_v47 = vld [vmem:[#allocation15_spill] sm:$0xff] }
 0x11e   : > { %v1465_v10 = vmul.f32 %v2629_v55, %v2629_v55  ;;  %v1591_v49 = vsel %vm3563_vm4, %v3597_v14, 1e+18  ;;  %v1592_v50 = vsel %vm3578_vm5, %v3600_v32, 1e+18  ;;  %v1666_v16 = vsel %vm3585_vm6, %v3609_v21, 1e+18 }
 0x11f   : > { %v1667_v8 = vsel %vm3592_vm7, %v3612_v39, 1e+18  ;;  %v1730_v59 = vmin.f32 %v1591_v49, %v1666_v16  ;;  %v1022_v12 = vsub.f32 %v887_v56, %v3197_v22  ;;  %v1023_v27 = vsub.f32 %v887_v56, %v3200_v23  ;;  %v5004_v39 = vld [vmem:[#allocation14_spill] sm:$0xff]  ;;  %v5008_v56 = vld [vmem:[#allocation13_spill] sm:$0xff] }
 0x120   : > { %v3712_v7 = vadd.f32 %v1211_v1, %v5002_v28  ;;  %v1731_v14 = vmin.f32 %v1592_v50, %v1667_v8  ;;  %v1020_v11 = vsub.f32 %v882_v46, %v3197_v22  ;;  %v1021_v32 = vsub.f32 %v882_v46, %v3200_v23  ;;  %v5010_v8 = vld [vmem:[#allocation21_spill] sm:$0xff] }
 0x121   : > { %v1214_v62 = vmul.f32 %v1022_v12, %v1022_v12  ;;  %v1215_v53 = vmul.f32 %v1023_v27, %v1023_v27  ;;  %v2634_v21 = vadd.f32 -0.5, %v1022_v12  ;;  %v2635_v36 = vadd.f32 -0.5, %v1023_v27 }
 0x122   : > { %v3717_v9 = vadd.f32 %v1466_v26, %v5003_v30  ;;  %v3720_v2 = vadd.f32 %v1208_v20, %v5004_v39  ;;  %v1796_v34 = vmin.f32 %v1730_v59, %v1731_v14  ;;  %v2632_v29 = vadd.f32 -0.5, %v1020_v11  ;;  %v5009_v26 = vld [vmem:[#allocation20_spill] sm:$0xff] }
 0x123   : > { %v3723_v51 = vadd.f32 %v1467_v45, %v5005_v44  ;;  %v3726_v1 = vadd.f32 %v1209_v40, %v5006_v47  ;;  %v3729_v55 = vadd.f32 %v1464_v57, %v5007_v43  ;;  %v3732_v46 = vadd.f32 %v1465_v10, %v5008_v56  ;;  %v897_v57 = vpop.permute.xlu1 %896  ;;  %v5011_v47 = vld [vmem:[#allocation22_spill] sm:$0xff] }
 0x124   : > { %1797 = vmin.xlane.f32.xlu0 %v1796_v34  ;;  %v3735_v49 = vadd.f32 %v1214_v62, %v5009_v26  ;;  %v1212_v20 = vmul.f32 %v1020_v11, %v1020_v11  ;;  %v1213_v50 = vmul.f32 %v1021_v32, %v1021_v32  ;;  %v2633_v16 = vadd.f32 -0.5, %v1021_v32  ;;  %v5012_v26 = vld [vmem:[#allocation16_spill] sm:$0xff] }
 0x125   : > { %v3738_v59 = vadd.f32 %v1215_v53, %v5010_v8  ;;  %v1470_v45 = vmul.f32 %v2634_v21, %v2634_v21  ;;  %v1471_v12 = vmul.f32 %v2635_v36, %v2635_v36  ;;  %v1595_v40 = vsel %vm3563_vm4, %v3625_v31, 1e+18  ;;  %v892_v53 = vpop.permute.xlu0 %891  ;;  %v5013_v8 = vld [vmem:[#allocation17_spill] sm:$0xff] }
 0x126   : > { %v1468_v27 = vmul.f32 %v2632_v29, %v2632_v29  ;;  %v1596_v10 = vsel %vm3578_vm5, %v3628_v6, 1e+18  ;;  %v1670_v28 = vsel %vm3585_vm6, %v3637_v63, 1e+18  ;;  %v1671_v14 = vsel %vm3592_vm7, %v3640_v37, 1e+18 }
 0x127   : > { %v1469_v11 = vmul.f32 %v2633_v16, %v2633_v16  ;;  %v1734_v32 = vmin.f32 %v1595_v40, %v1670_v28  ;;  %v1735_v62 = vmin.f32 %v1596_v10, %v1671_v14  ;;  %v1593_v31 = vsel %vm3563_vm4, %v3568_v41, 1e+18  ;;  %v5015_v28 = vld [vmem:[#allocation18_spill] sm:$0xff] }
 0x128   : > { %v1594_v6 = vsel %vm3578_vm5, %v3571_v42, 1e+18  ;;  %v1668_v63 = vsel %vm3585_vm6, %v3603_v58, 1e+18  ;;  %v1669_v37 = vsel %vm3592_vm7, %v3606_v5, 1e+18  ;;  %v1026_v21 = vsub.f32 %v897_v57, %v3197_v22 }
 0x129   : > { %v1802_v36 = vmin.f32 %v1734_v32, %v1735_v62  ;;  %v1732_v30 = vmin.f32 %v1593_v31, %v1668_v63  ;;  %v1733_v39 = vmin.f32 %v1594_v6, %v1669_v37  ;;  %v1027_v41 = vsub.f32 %v897_v57, %v3200_v23  ;;  %v5014_v57 = vld [vmem:[#allocation23_spill] sm:$0xff] }
 0x12a   : > { %v1218_v34 = vmul.f32 %v1026_v21, %v1026_v21  ;;  %v2638_v29 = vadd.f32 -0.5, %v1026_v21  ;;  %v1024_v44 = vsub.f32 %v892_v53, %v3197_v22  ;;  %v1025_v42 = vsub.f32 %v892_v53, %v3200_v23  ;;  %v5016_v32 = vld [vmem:[#allocation19_spill] sm:$0xff]  ;;  %v5017_v53 = vld [vmem:[#allocation26_spill] sm:$0xff] }
 0x12b   : > { %v3769_v43 = vadd.f32 %v1212_v20, %v5011_v47  ;;  %1803 = vmin.xlane.f32.xlu1 %v1802_v36  ;;  %v1799_v58 = vmin.f32 %v1732_v30, %v1733_v39  ;;  %v1219_v56 = vmul.f32 %v1027_v41, %v1027_v41  ;;  %v2639_v5 = vadd.f32 -0.5, %v1027_v41  ;;  %v5018_v37 = vld [vmem:[#allocation27_spill] sm:$0xff]  ;;  %v907_v30 = vpop.permute.xlu1 %906 }
 0x12c   : > { %v3772_v16 = vadd.f32 %v1470_v45, %v5012_v26  ;;  %v3775_v40 = vadd.f32 %v1471_v12, %v5013_v8  ;;  %v3778_v10 = vadd.f32 %v1213_v50, %v5014_v57  ;;  %v3781_v14 = vadd.f32 %v1468_v27, %v5015_v28 }
 0x12d   : > { %v3784_v62 = vadd.f32 %v1469_v11, %v5016_v32  ;;  %1800 = vmin.xlane.f32.xlu0 %v1799_v58  ;;  %v2636_v20 = vadd.f32 -0.5, %v1024_v44  ;;  %v2637_v31 = vadd.f32 -0.5, %v1025_v42  ;;  %v1599_v45 = vsel %vm3563_vm4, %v3676_v48, 1e+18 }
 0x12e   : > { %v3790_v6 = vadd.f32 %v1218_v34, %v5017_v53  ;;  %v1474_v12 = vmul.f32 %v2638_v29, %v2638_v29  ;;  %v1216_v63 = vmul.f32 %v1024_v44, %v1024_v44  ;;  %v1217_v50 = vmul.f32 %v1025_v42, %v1025_v42  ;;  %v902_v29 = vpop.permute.xlu0 %901 }
 0x12f   : > { %v3793_v21 = vadd.f32 %v1219_v56, %v5018_v37  ;;  %v1475_v27 = vmul.f32 %v2639_v5, %v2639_v5  ;;  %v1600_v11 = vsel %vm3578_vm5, %v3679_v60, 1e+18  ;;  %v1674_v36 = vsel %vm3585_vm6, %v3689_v0, 1e+18  ;;  %v5021_v37 = vld [vmem:[#allocation25_spill] sm:$0xff] }
 0x130   : > { %v1472_v48 = vmul.f32 %v2636_v20, %v2636_v20  ;;  %v1473_v39 = vmul.f32 %v2637_v31, %v2637_v31  ;;  %v1675_v41 = vsel %vm3592_vm7, %v3692_v38, 1e+18  ;;  %v1738_v34 = vmin.f32 %v1599_v45, %v1674_v36  ;;  %v5020_v31 = vld [vmem:[#allocation30_spill] sm:$0xff]  ;;  %v5022_v36 = vld [vmem:[#allocation31_spill] sm:$0xff] }
 0x131   : > { %v1739_v44 = vmin.f32 %v1600_v11, %v1675_v41  ;;  %v1597_v42 = vsel %vm3563_vm4, %v3617_v54, 1e+18  ;;  %v1598_v60 = vsel %vm3578_vm5, %v3620_v35, 1e+18  ;;  %v1672_v0 = vsel %vm3585_vm6, %v3631_v4, 1e+18 }
 0x132   : > { %v1673_v47 = vsel %vm3592_vm7, %v3634_v18, 1e+18  ;;  %v1736_v38 = vmin.f32 %v1597_v42, %v1672_v0  ;;  %v1030_v58 = vsub.f32 %v907_v30, %v3197_v22  ;;  %v1031_v56 = vsub.f32 %v907_v30, %v3200_v23  ;;  %v5019_v4 = vld [vmem:[#allocation24_spill] sm:$0xff] }
 0x133   : > { %v1808_v5 = vmin.f32 %v1738_v34, %v1739_v44  ;;  %v1737_v26 = vmin.f32 %v1598_v60, %v1673_v47  ;;  %v1028_v54 = vsub.f32 %v902_v29, %v3197_v22  ;;  %v1029_v8 = vsub.f32 %v902_v29, %v3200_v23  ;;  %v5023_v41 = vld [vmem:[#allocation28_spill] sm:$0xff]  ;;  %v5024_v29 = vld [vmem:[#allocation29_spill] sm:$0xff] }
 0x134   : > { %v1222_v35 = vmul.f32 %v1030_v58, %v1030_v58  ;;  %v1223_v57 = vmul.f32 %v1031_v56, %v1031_v56  ;;  %v2642_v28 = vadd.f32 -0.5, %v1030_v58  ;;  %v2643_v32 = vadd.f32 -0.5, %v1031_v56  ;;  %v5026_v47 = vld [vmem:[#allocation37_spill] sm:$0xff] }
 0x135   : > { %v3821_v20 = vadd.f32 %v1474_v12, %v5019_v4  ;;  %v3824_v18 = vadd.f32 %v1216_v63, %v5020_v31  ;;  %1809 = vmin.xlane.f32.xlu1 %v1808_v5  ;;  %v1805_v45 = vmin.f32 %v1736_v38, %v1737_v26  ;;  %v2640_v53 = vadd.f32 -0.5, %v1028_v54  ;;  %v5025_v12 = vld [vmem:[#allocation36_spill] sm:$0xff] }
 0x136   : > { %v3827_v11 = vadd.f32 %v1475_v27, %v5021_v37  ;;  %v3830_v30 = vadd.f32 %v1217_v50, %v5022_v36  ;;  %v3833_v34 = vadd.f32 %v1472_v48, %v5023_v41  ;;  %v3836_v44 = vadd.f32 %v1473_v39, %v5024_v29  ;;  %v917_v48 = vpop.permute.xlu1 %916  ;;  %v5027_v36 = vld [vmem:[#allocation38_spill] sm:$0xff] }
 0x137   : > { %1806 = vmin.xlane.f32.xlu0 %v1805_v45  ;;  %v3839_v42 = vadd.f32 %v1222_v35, %v5025_v12  ;;  %v1220_v63 = vmul.f32 %v1028_v54, %v1028_v54  ;;  %v1221_v60 = vmul.f32 %v1029_v8, %v1029_v8  ;;  %v2641_v0 = vadd.f32 -0.5, %v1029_v8  ;;  %v5028_v12 = vld [vmem:[#allocation32_spill] sm:$0xff] }
 0x138   : > { %v3842_v38 = vadd.f32 %v1223_v57, %v5026_v47  ;;  %v1478_v27 = vmul.f32 %v2642_v28, %v2642_v28  ;;  %v1479_v58 = vmul.f32 %v2643_v32, %v2643_v32  ;;  %v1603_v50 = vsel %vm3563_vm4, %v3720_v2, 1e+18  ;;  %v912_v57 = vpop.permute.xlu0 %911  ;;  %v5029_v47 = vld [vmem:[#allocation33_spill] sm:$0xff] }
 0x139   : > { %v1476_v56 = vmul.f32 %v2640_v53, %v2640_v53  ;;  %v1604_v39 = vsel %vm3578_vm5, %v3726_v1, 1e+18  ;;  %v1678_v5 = vsel %vm3585_vm6, %v3729_v55, 1e+18  ;;  %v1679_v26 = vsel %vm3592_vm7, %v3732_v46, 1e+18 }
 0x13a   : > { %v1477_v54 = vmul.f32 %v2641_v0, %v2641_v0  ;;  %v1742_v8 = vmin.f32 %v1603_v50, %v1678_v5  ;;  %v1743_v35 = vmin.f32 %v1604_v39, %v1679_v26  ;;  %v1601_v2 = vsel %vm3563_vm4, %v3643_v24, 1e+18  ;;  %v5031_v5 = vld [vmem:[#allocation34_spill] sm:$0xff] }
 0x13b   : > { %v1602_v1 = vsel %vm3578_vm5, %v3646_v25, 1e+18  ;;  %v1676_v55 = vsel %vm3585_vm6, %v3683_v17, 1e+18  ;;  %v1677_v46 = vsel %vm3592_vm7, %v3686_v13, 1e+18  ;;  %v1034_v28 = vsub.f32 %v917_v48, %v3197_v22 }
 0x13c   : > { %v1814_v32 = vmin.f32 %v1742_v8, %v1743_v35  ;;  %v1740_v4 = vmin.f32 %v1601_v2, %v1676_v55  ;;  %v1741_v31 = vmin.f32 %v1602_v1, %v1677_v46  ;;  %v1035_v24 = vsub.f32 %v917_v48, %v3200_v23  ;;  %v5030_v48 = vld [vmem:[#allocation39_spill] sm:$0xff] }
 0x13d   : > { %v1226_v45 = vmul.f32 %v1034_v28, %v1034_v28  ;;  %v2646_v53 = vadd.f32 -0.5, %v1034_v28  ;;  %v1032_v37 = vsub.f32 %v912_v57, %v3197_v22  ;;  %v1033_v25 = vsub.f32 %v912_v57, %v3200_v23  ;;  %v5032_v8 = vld [vmem:[#allocation35_spill] sm:$0xff]  ;;  %v5033_v57 = vld [vmem:[#allocation42_spill] sm:$0xff] }
 0x13e   : > { %v3873_v41 = vadd.f32 %v1220_v63, %v5027_v36  ;;  %1815 = vmin.xlane.f32.xlu1 %v1814_v32  ;;  %v1811_v17 = vmin.f32 %v1740_v4, %v1741_v31  ;;  %v1227_v29 = vmul.f32 %v1035_v24, %v1035_v24  ;;  %v2647_v13 = vadd.f32 -0.5, %v1035_v24  ;;  %v5034_v46 = vld [vmem:[#allocation43_spill] sm:$0xff]  ;;  %v927_v4 = vpop.permute.xlu1 %926 }
 0x13f   : > { %v3876_v0 = vadd.f32 %v1478_v27, %v5028_v12  ;;  %v3879_v50 = vadd.f32 %v1479_v58, %v5029_v47  ;;  %v3882_v39 = vadd.f32 %v1221_v60, %v5030_v48  ;;  %v3885_v26 = vadd.f32 %v1476_v56, %v5031_v5 }
 0x140   : > { %v3888_v35 = vadd.f32 %v1477_v54, %v5032_v8  ;;  %1812 = vmin.xlane.f32.xlu0 %v1811_v17  ;;  %v2644_v63 = vadd.f32 -0.5, %v1032_v37  ;;  %v2645_v2 = vadd.f32 -0.5, %v1033_v25  ;;  %v1607_v27 = vsel %vm3563_vm4, %v3769_v43, 1e+18 }
 0x141   : > { %v3894_v1 = vadd.f32 %v1226_v45, %v5033_v57  ;;  %v1482_v58 = vmul.f32 %v2646_v53, %v2646_v53  ;;  %v1224_v55 = vmul.f32 %v1032_v37, %v1032_v37  ;;  %v1225_v60 = vmul.f32 %v1033_v25, %v1033_v25  ;;  %v922_v53 = vpop.permute.xlu0 %921 }
 0x142   : > { %v3897_v28 = vadd.f32 %v1227_v29, %v5034_v46  ;;  %v1483_v56 = vmul.f32 %v2647_v13, %v2647_v13  ;;  %v1608_v54 = vsel %vm3578_vm5, %v3778_v10, 1e+18  ;;  %v1682_v32 = vsel %vm3585_vm6, %v3781_v14, 1e+18  ;;  %v5037_v46 = vld [vmem:[#allocation41_spill] sm:$0xff] }
 0x143   : > { %v1480_v43 = vmul.f32 %v2644_v63, %v2644_v63  ;;  %v1481_v31 = vmul.f32 %v2645_v2, %v2645_v2  ;;  %v1683_v24 = vsel %vm3592_vm7, %v3784_v62, 1e+18  ;;  %v1746_v45 = vmin.f32 %v1607_v27, %v1682_v32  ;;  %v5036_v2 = vld [vmem:[#allocation46_spill] sm:$0xff]  ;;  %v5038_v32 = vld [vmem:[#allocation47_spill] sm:$0xff] }
 0x144   : > { %v1747_v37 = vmin.f32 %v1608_v54, %v1683_v24  ;;  %v1605_v25 = vsel %vm3563_vm4, %v3695_v19, 1e+18  ;;  %v1606_v10 = vsel %vm3578_vm5, %v3712_v7, 1e+18  ;;  %v1680_v14 = vsel %vm3585_vm6, %v3717_v9, 1e+18 }
 0x145   : > { %v1681_v36 = vsel %vm3592_vm7, %v3723_v51, 1e+18  ;;  %v1744_v62 = vmin.f32 %v1605_v25, %v1680_v14  ;;  %v1038_v17 = vsub.f32 %v927_v4, %v3197_v22  ;;  %v1039_v29 = vsub.f32 %v927_v4, %v3200_v23  ;;  %v5035_v9 = vld [vmem:[#allocation40_spill] sm:$0xff] }
 0x146   : > { %v1820_v13 = vmin.f32 %v1746_v45, %v1747_v37  ;;  %v1745_v12 = vmin.f32 %v1606_v10, %v1681_v36  ;;  %v1036_v19 = vsub.f32 %v922_v53, %v3197_v22  ;;  %v1037_v47 = vsub.f32 %v922_v53, %v3200_v23  ;;  %v5039_v24 = vld [vmem:[#allocation44_spill] sm:$0xff]  ;;  %v5040_v53 = vld [vmem:[#allocation45_spill] sm:$0xff] }
 0x147   : > { %v1230_v7 = vmul.f32 %v1038_v17, %v1038_v17  ;;  %v1231_v48 = vmul.f32 %v1039_v29, %v1039_v29  ;;  %v2650_v5 = vadd.f32 -0.5, %v1038_v17  ;;  %v2651_v8 = vadd.f32 -0.5, %v1039_v29  ;;  %v5042_v36 = vld [vmem:[#allocation53_spill] sm:$0xff] }
 0x148   : > { %v3925_v63 = vadd.f32 %v1482_v58, %v5035_v9  ;;  %v3928_v51 = vadd.f32 %v1224_v55, %v5036_v2  ;;  %1821 = vmin.xlane.f32.xlu1 %v1820_v13  ;;  %v1817_v27 = vmin.f32 %v1744_v62, %v1745_v12  ;;  %v2648_v57 = vadd.f32 -0.5, %v1036_v19  ;;  %v5041_v58 = vld [vmem:[#allocation52_spill] sm:$0xff] }
 0x149   : > { %v3931_v54 = vadd.f32 %v1483_v56, %v5037_v46  ;;  %v3934_v4 = vadd.f32 %v1225_v60, %v5038_v32  ;;  %v3937_v45 = vadd.f32 %v1480_v43, %v5039_v24  ;;  %v3940_v37 = vadd.f32 %v1481_v31, %v5040_v53  ;;  %v937_v43 = vpop.permute.xlu1 %936  ;;  %v5043_v32 = vld [vmem:[#allocation54_spill] sm:$0xff] }
 0x14a   : > { %1818 = vmin.xlane.f32.xlu0 %v1817_v27  ;;  %v3943_v25 = vadd.f32 %v1230_v7, %v5041_v58  ;;  %v1228_v55 = vmul.f32 %v1036_v19, %v1036_v19  ;;  %v1229_v10 = vmul.f32 %v1037_v47, %v1037_v47  ;;  %v2649_v14 = vadd.f32 -0.5, %v1037_v47  ;;  %v5044_v58 = vld [vmem:[#allocation48_spill] sm:$0xff] }
 0x14b   : > { %v3946_v62 = vadd.f32 %v1231_v48, %v5042_v36  ;;  %v1486_v56 = vmul.f32 %v2650_v5, %v2650_v5  ;;  %v1487_v17 = vmul.f32 %v2651_v8, %v2651_v8  ;;  %v1611_v60 = vsel %vm3563_vm4, %v3824_v18, 1e+18  ;;  %v932_v48 = vpop.permute.xlu0 %931  ;;  %v5045_v36 = vld [vmem:[#allocation49_spill] sm:$0xff] }
 0x14c   : > { %v1484_v29 = vmul.f32 %v2648_v57, %v2648_v57  ;;  %v1612_v31 = vsel %vm3578_vm5, %v3830_v30, 1e+18  ;;  %v1686_v13 = vsel %vm3585_vm6, %v3833_v34, 1e+18  ;;  %v1687_v12 = vsel %vm3592_vm7, %v3836_v44, 1e+18 }
 0x14d   : > { %v1485_v19 = vmul.f32 %v2649_v14, %v2649_v14  ;;  %v1750_v47 = vmin.f32 %v1611_v60, %v1686_v13  ;;  %v1751_v7 = vmin.f32 %v1612_v31, %v1687_v12  ;;  %v1609_v18 = vsel %vm3563_vm4, %v3735_v49, 1e+18  ;;  %v5047_v13 = vld [vmem:[#allocation50_spill] sm:$0xff] }
 0x14e   : > { %v1610_v30 = vsel %vm3578_vm5, %v3738_v59, 1e+18  ;;  %v1684_v34 = vsel %vm3585_vm6, %v3772_v16, 1e+18  ;;  %v1685_v44 = vsel %vm3592_vm7, %v3775_v40, 1e+18  ;;  %v1042_v5 = vsub.f32 %v937_v43, %v3197_v22 }
 0x14f   : > { %v1826_v8 = vmin.f32 %v1750_v47, %v1751_v7  ;;  %v1748_v9 = vmin.f32 %v1609_v18, %v1684_v34  ;;  %v1749_v2 = vmin.f32 %v1610_v30, %v1685_v44  ;;  %v1043_v49 = vsub.f32 %v937_v43, %v3200_v23  ;;  %v5046_v43 = vld [vmem:[#allocation55_spill] sm:$0xff] }
 0x150   : > { %v1234_v27 = vmul.f32 %v1042_v5, %v1042_v5  ;;  %v2654_v57 = vadd.f32 -0.5, %v1042_v5  ;;  %v1040_v46 = vsub.f32 %v932_v48, %v3197_v22  ;;  %v1041_v59 = vsub.f32 %v932_v48, %v3200_v23  ;;  %v5048_v47 = vld [vmem:[#allocation51_spill] sm:$0xff]  ;;  %v5049_v48 = vld [vmem:[#allocation58_spill] sm:$0xff] }
 0x151   : > { %v3977_v24 = vadd.f32 %v1228_v55, %v5043_v32  ;;  %1827 = vmin.xlane.f32.xlu1 %v1826_v8  ;;  %v1823_v16 = vmin.f32 %v1748_v9, %v1749_v2  ;;  %v1235_v53 = vmul.f32 %v1043_v49, %v1043_v49  ;;  %v2655_v40 = vadd.f32 -0.5, %v1043_v49  ;;  %v5050_v44 = vld [vmem:[#allocation59_spill] sm:$0xff]  ;;  %v947_v9 = vpop.permute.xlu1 %946 }
 0x152   : > { %v3980_v14 = vadd.f32 %v1486_v56, %v5044_v58  ;;  %v3983_v60 = vadd.f32 %v1487_v17, %v5045_v36  ;;  %v3986_v31 = vadd.f32 %v1229_v10, %v5046_v43  ;;  %v3989_v12 = vadd.f32 %v1484_v29, %v5047_v13 }
 0x153   : > { %v3992_v7 = vadd.f32 %v1485_v19, %v5048_v47  ;;  %1824 = vmin.xlane.f32.xlu0 %v1823_v16  ;;  %v2652_v55 = vadd.f32 -0.5, %v1040_v46  ;;  %v2653_v18 = vadd.f32 -0.5, %v1041_v59  ;;  %v1615_v56 = vsel %vm3563_vm4, %v3873_v41, 1e+18 }
 0x154   : > { %v3998_v30 = vadd.f32 %v1234_v27, %v5049_v48  ;;  %v1490_v17 = vmul.f32 %v2654_v57, %v2654_v57  ;;  %v1232_v34 = vmul.f32 %v1040_v46, %v1040_v46  ;;  %v1233_v10 = vmul.f32 %v1041_v59, %v1041_v59  ;;  %v942_v57 = vpop.permute.xlu0 %941 }
 0x155   : > { %v4001_v5 = vadd.f32 %v1235_v53, %v5050_v44  ;;  %v1491_v29 = vmul.f32 %v2655_v40, %v2655_v40  ;;  %v1616_v19 = vsel %vm3578_vm5, %v3882_v39, 1e+18  ;;  %v1690_v8 = vsel %vm3585_vm6, %v3885_v26, 1e+18  ;;  %v5053_v44 = vld [vmem:[#allocation57_spill] sm:$0xff] }
 0x156   : > { %v1488_v41 = vmul.f32 %v2652_v55, %v2652_v55  ;;  %v1489_v2 = vmul.f32 %v2653_v18, %v2653_v18  ;;  %v1691_v49 = vsel %vm3592_vm7, %v3888_v35, 1e+18  ;;  %v1754_v27 = vmin.f32 %v1615_v56, %v1690_v8  ;;  %v5052_v18 = vld [vmem:[#allocation62_spill] sm:$0xff]  ;;  %v5054_v8 = vld [vmem:[#allocation63_spill] sm:$0xff] }
 0x157   : > { %v1755_v46 = vmin.f32 %v1616_v19, %v1691_v49  ;;  %v1613_v59 = vsel %vm3563_vm4, %v3790_v6, 1e+18  ;;  %v1614_v39 = vsel %vm3578_vm5, %v3793_v21, 1e+18  ;;  %v1688_v26 = vsel %vm3585_vm6, %v3821_v20, 1e+18 }
 0x158   : > { %v1689_v32 = vsel %vm3592_vm7, %v3827_v11, 1e+18  ;;  %v1752_v35 = vmin.f32 %v1613_v59, %v1688_v26  ;;  %v1046_v16 = vsub.f32 %v947_v9, %v3197_v22  ;;  %v1047_v53 = vsub.f32 %v947_v9, %v3200_v23  ;;  %v5051_v20 = vld [vmem:[#allocation56_spill] sm:$0xff] }
 0x159   : > { %v1832_v40 = vmin.f32 %v1754_v27, %v1755_v46  ;;  %v1753_v58 = vmin.f32 %v1614_v39, %v1689_v32  ;;  %v1044_v6 = vsub.f32 %v942_v57, %v3197_v22  ;;  %v1045_v36 = vsub.f32 %v942_v57, %v3200_v23  ;;  %v5055_v49 = vld [vmem:[#allocation60_spill] sm:$0xff]  ;;  %v5056_v57 = vld [vmem:[#allocation61_spill] sm:$0xff] }
 0x15a   : > { %v1238_v21 = vmul.f32 %v1046_v16, %v1046_v16  ;;  %v1239_v43 = vmul.f32 %v1047_v53, %v1047_v53  ;;  %v2658_v13 = vadd.f32 -0.5, %v1046_v16  ;;  %v2659_v47 = vadd.f32 -0.5, %v1047_v53  ;;  %v5058_v32 = vld [vmem:[#allocation69_spill] sm:$0xff] }
 0x15b   : > { %v4029_v55 = vadd.f32 %v1490_v17, %v5051_v20  ;;  %v4032_v11 = vadd.f32 %v1232_v34, %v5052_v18  ;;  %1833 = vmin.xlane.f32.xlu1 %v1832_v40  ;;  %v1829_v56 = vmin.f32 %v1752_v35, %v1753_v58  ;;  %v2656_v48 = vadd.f32 -0.5, %v1044_v6  ;;  %v5057_v17 = vld [vmem:[#allocation68_spill] sm:$0xff] }
 0x15c   : > { %v4035_v19 = vadd.f32 %v1491_v29, %v5053_v44  ;;  %v4038_v9 = vadd.f32 %v1233_v10, %v5054_v8  ;;  %v4041_v27 = vadd.f32 %v1488_v41, %v5055_v49  ;;  %v4044_v46 = vadd.f32 %v1489_v2, %v5056_v57  ;;  %v957_v41 = vpop.permute.xlu1 %956  ;;  %v5059_v8 = vld [vmem:[#allocation70_spill] sm:$0xff] }
 0x15d   : > { %1830 = vmin.xlane.f32.xlu0 %v1829_v56  ;;  %v4047_v59 = vadd.f32 %v1238_v21, %v5057_v17  ;;  %v1236_v34 = vmul.f32 %v1044_v6, %v1044_v6  ;;  %v1237_v39 = vmul.f32 %v1045_v36, %v1045_v36  ;;  %v2657_v26 = vadd.f32 -0.5, %v1045_v36  ;;  %v5060_v17 = vld [vmem:[#allocation64_spill] sm:$0xff] }
 0x15e   : > { %v4050_v35 = vadd.f32 %v1239_v43, %v5058_v32  ;;  %v1494_v29 = vmul.f32 %v2658_v13, %v2658_v13  ;;  %v1495_v16 = vmul.f32 %v2659_v47, %v2659_v47  ;;  %v1619_v10 = vsel %vm3563_vm4, %v3928_v51, 1e+18  ;;  %v952_v43 = vpop.permute.xlu0 %951  ;;  %v5061_v32 = vld [vmem:[#allocation65_spill] sm:$0xff] }
 0x15f   : > { %v1492_v53 = vmul.f32 %v2656_v48, %v2656_v48  ;;  %v1620_v2 = vsel %vm3578_vm5, %v3934_v4, 1e+18  ;;  %v1694_v40 = vsel %vm3585_vm6, %v3937_v45, 1e+18  ;;  %v1695_v58 = vsel %vm3592_vm7, %v3940_v37, 1e+18 }
 0x160   : > { %v1493_v6 = vmul.f32 %v2657_v26, %v2657_v26  ;;  %v1758_v36 = vmin.f32 %v1619_v10, %v1694_v40  ;;  %v1759_v21 = vmin.f32 %v1620_v2, %v1695_v58  ;;  %v1617_v51 = vsel %vm3563_vm4, %v3839_v42, 1e+18  ;;  %v5063_v40 = vld [vmem:[#allocation66_spill] sm:$0xff] }
 0x161   : > { %v1618_v4 = vsel %vm3578_vm5, %v3842_v38, 1e+18  ;;  %v1692_v45 = vsel %vm3585_vm6, %v3876_v0, 1e+18  ;;  %v1693_v37 = vsel %vm3592_vm7, %v3879_v50, 1e+18  ;;  %v1050_v13 = vsub.f32 %v957_v41, %v3197_v22 }
 0x162   : > { %v1838_v47 = vmin.f32 %v1758_v36, %v1759_v21  ;;  %v1756_v20 = vmin.f32 %v1617_v51, %v1692_v45  ;;  %v1757_v18 = vmin.f32 %v1618_v4, %v1693_v37  ;;  %v1051_v42 = vsub.f32 %v957_v41, %v3200_v23  ;;  %v5062_v41 = vld [vmem:[#allocation71_spill] sm:$0xff] }
 0x163   : > { %v1242_v56 = vmul.f32 %v1050_v13, %v1050_v13  ;;  %v2662_v48 = vadd.f32 -0.5, %v1050_v13  ;;  %v1048_v44 = vsub.f32 %v952_v43, %v3197_v22  ;;  %v1049_v38 = vsub.f32 %v952_v43, %v3200_v23  ;;  %v5064_v36 = vld [vmem:[#allocation67_spill] sm:$0xff]  ;;  %v5065_v43 = vld [vmem:[#allocation74_spill] sm:$0xff] }
 0x164   : > { %v4081_v49 = vadd.f32 %v1236_v34, %v5059_v8  ;;  %1839 = vmin.xlane.f32.xlu1 %v1838_v47  ;;  %v1835_v0 = vmin.f32 %v1756_v20, %v1757_v18  ;;  %v1243_v57 = vmul.f32 %v1051_v42, %v1051_v42  ;;  %v2663_v50 = vadd.f32 -0.5, %v1051_v42  ;;  %v5066_v37 = vld [vmem:[#allocation75_spill] sm:$0xff]  ;;  %v967_v20 = vpop.permute.xlu1 %966 }
 0x165   : > { %v4084_v26 = vadd.f32 %v1494_v29, %v5060_v17  ;;  %v4087_v10 = vadd.f32 %v1495_v16, %v5061_v32  ;;  %v4090_v2 = vadd.f32 %v1237_v39, %v5062_v41  ;;  %v4093_v58 = vadd.f32 %v1492_v53, %v5063_v40 }
 0x166   : > { %v4096_v21 = vadd.f32 %v1493_v6, %v5064_v36  ;;  %1836 = vmin.xlane.f32.xlu0 %v1835_v0  ;;  %v2660_v34 = vadd.f32 -0.5, %v1048_v44  ;;  %v2661_v51 = vadd.f32 -0.5, %v1049_v38  ;;  %v1623_v29 = vsel %vm3563_vm4, %v3977_v24, 1e+18 }
 0x167   : > { %v4102_v4 = vadd.f32 %v1242_v56, %v5065_v43  ;;  %v1498_v16 = vmul.f32 %v2662_v48, %v2662_v48  ;;  %v1240_v45 = vmul.f32 %v1048_v44, %v1048_v44  ;;  %v1241_v39 = vmul.f32 %v1049_v38, %v1049_v38  ;;  %v962_v48 = vpop.permute.xlu0 %961 }
 0x168   : > { %v4105_v13 = vadd.f32 %v1243_v57, %v5066_v37  ;;  %v1499_v53 = vmul.f32 %v2663_v50, %v2663_v50  ;;  %v1624_v6 = vsel %vm3578_vm5, %v3986_v31, 1e+18  ;;  %v1698_v47 = vsel %vm3585_vm6, %v3989_v12, 1e+18  ;;  %v5069_v37 = vld [vmem:[#allocation73_spill] sm:$0xff] }
 0x169   : > { %v1496_v24 = vmul.f32 %v2660_v34, %v2660_v34  ;;  %v1497_v18 = vmul.f32 %v2661_v51, %v2661_v51  ;;  %v1699_v42 = vsel %vm3592_vm7, %v3992_v7, 1e+18  ;;  %v1762_v56 = vmin.f32 %v1623_v29, %v1698_v47  ;;  %v5068_v51 = vld [vmem:[#allocation78_spill] sm:$0xff]  ;;  %v5070_v47 = vld [vmem:[#allocation79_spill] sm:$0xff] }
 0x16a   : > { %v1763_v44 = vmin.f32 %v1624_v6, %v1699_v42  ;;  %v1621_v38 = vsel %vm3563_vm4, %v3894_v1, 1e+18  ;;  %v1622_v31 = vsel %vm3578_vm5, %v3897_v28, 1e+18  ;;  %v1696_v12 = vsel %vm3585_vm6, %v3925_v63, 1e+18 }
 0x16b   : > { %v1697_v8 = vsel %vm3592_vm7, %v3931_v54, 1e+18  ;;  %v1760_v7 = vmin.f32 %v1621_v38, %v1696_v12  ;;  %v1054_v0 = vsub.f32 %v967_v20, %v3197_v22  ;;  %v1055_v57 = vsub.f32 %v967_v20, %v3200_v23  ;;  %v5067_v63 = vld [vmem:[#allocation72_spill] sm:$0xff] }
 0x16c   : > { %v1844_v50 = vmin.f32 %v1762_v56, %v1763_v44  ;;  %v1761_v17 = vmin.f32 %v1622_v31, %v1697_v8  ;;  %v1052_v1 = vsub.f32 %v962_v48, %v3197_v22  ;;  %v1053_v32 = vsub.f32 %v962_v48, %v3200_v23  ;;  %v5071_v42 = vld [vmem:[#allocation76_spill] sm:$0xff]  ;;  %v5072_v48 = vld [vmem:[#allocation77_spill] sm:$0xff] }
 0x16d   : > { %v1246_v28 = vmul.f32 %v1054_v0, %v1054_v0  ;;  %v1247_v41 = vmul.f32 %v1055_v57, %v1055_v57  ;;  %v2666_v40 = vadd.f32 -0.5, %v1054_v0  ;;  %v2667_v36 = vadd.f32 -0.5, %v1055_v57  ;;  %v5074_v8 = vld [vmem:[#allocation85_spill] sm:$0xff] }
 0x16e   : > { %v4133_v34 = vadd.f32 %v1498_v16, %v5067_v63  ;;  %v4136_v54 = vadd.f32 %v1240_v45, %v5068_v51  ;;  %1845 = vmin.xlane.f32.xlu1 %v1844_v50  ;;  %v1841_v29 = vmin.f32 %v1760_v7, %v1761_v17  ;;  %v2664_v43 = vadd.f32 -0.5, %v1052_v1  ;;  %v5073_v16 = vld [vmem:[#allocation84_spill] sm:$0xff] }
 0x16f   : > { %v4139_v6 = vadd.f32 %v1499_v53, %v5069_v37  ;;  %v4142_v20 = vadd.f32 %v1241_v39, %v5070_v47  ;;  %v4145_v56 = vadd.f32 %v1496_v24, %v5071_v42  ;;  %v4148_v44 = vadd.f32 %v1497_v18, %v5072_v48  ;;  %v977_v24 = vpop.permute.xlu1 %976  ;;  %v5075_v47 = vld [vmem:[#allocation86_spill] sm:$0xff] }
 0x170   : > { %1842 = vmin.xlane.f32.xlu0 %v1841_v29  ;;  %v4151_v38 = vadd.f32 %v1246_v28, %v5073_v16  ;;  %v1244_v45 = vmul.f32 %v1052_v1, %v1052_v1  ;;  %v1245_v31 = vmul.f32 %v1053_v32, %v1053_v32  ;;  %v2665_v12 = vadd.f32 -0.5, %v1053_v32  ;;  %v5076_v16 = vld [vmem:[#allocation80_spill] sm:$0xff] }
 0x171   : > { %v4154_v7 = vadd.f32 %v1247_v41, %v5074_v8  ;;  %v1502_v53 = vmul.f32 %v2666_v40, %v2666_v40  ;;  %v1503_v0 = vmul.f32 %v2667_v36, %v2667_v36  ;;  %v1627_v39 = vsel %vm3563_vm4, %v4032_v11, 1e+18  ;;  %v972_v41 = vpop.permute.xlu0 %971  ;;  %v5077_v8 = vld [vmem:[#allocation81_spill] sm:$0xff] }
 0x172   : > { %v1500_v57 = vmul.f32 %v2664_v43, %v2664_v43  ;;  %v1628_v18 = vsel %vm3578_vm5, %v4038_v9, 1e+18  ;;  %v1702_v50 = vsel %vm3585_vm6, %v4041_v27, 1e+18  ;;  %v1703_v17 = vsel %vm3592_vm7, %v4044_v46, 1e+18 }
 0x173   : > { %v1501_v1 = vmul.f32 %v2665_v12, %v2665_v12  ;;  %v1766_v32 = vmin.f32 %v1627_v39, %v1702_v50  ;;  %v1767_v28 = vmin.f32 %v1628_v18, %v1703_v17  ;;  %v1625_v11 = vsel %vm3563_vm4, %v3943_v25, 1e+18  ;;  %v5079_v50 = vld [vmem:[#allocation82_spill] sm:$0xff] }
 0x174   : > { %v1626_v9 = vsel %vm3578_vm5, %v3946_v62, 1e+18  ;;  %v1700_v27 = vsel %vm3585_vm6, %v3980_v14, 1e+18  ;;  %v1701_v46 = vsel %vm3592_vm7, %v3983_v60, 1e+18  ;;  %v1058_v40 = vsub.f32 %v977_v24, %v3197_v22 }
 0x175   : > { %v1850_v36 = vmin.f32 %v1766_v32, %v1767_v28  ;;  %v1764_v63 = vmin.f32 %v1625_v11, %v1700_v27  ;;  %v1765_v51 = vmin.f32 %v1626_v9, %v1701_v46  ;;  %v1059_v25 = vsub.f32 %v977_v24, %v3200_v23  ;;  %v5078_v24 = vld [vmem:[#allocation87_spill] sm:$0xff] }
 0x176   : > { %v1250_v29 = vmul.f32 %v1058_v40, %v1058_v40  ;;  %v2670_v43 = vadd.f32 -0.5, %v1058_v40  ;;  %v1056_v37 = vsub.f32 %v972_v41, %v3197_v22  ;;  %v1057_v62 = vsub.f32 %v972_v41, %v3200_v23  ;;  %v5080_v32 = vld [vmem:[#allocation83_spill] sm:$0xff]  ;;  %v5081_v41 = vld [vmem:[#allocation90_spill] sm:$0xff] }
 0x177   : > { %v4185_v42 = vadd.f32 %v1244_v45, %v5075_v47  ;;  %1851 = vmin.xlane.f32.xlu1 %v1850_v36  ;;  %v1847_v14 = vmin.f32 %v1764_v63, %v1765_v51  ;;  %v1251_v48 = vmul.f32 %v1059_v25, %v1059_v25  ;;  %v2671_v60 = vadd.f32 -0.5, %v1059_v25  ;;  %v5082_v46 = vld [vmem:[#allocation91_spill] sm:$0xff]  ;;  %v987_v63 = vpop.permute.xlu1 %986 }
 0x178   : > { %v4188_v12 = vadd.f32 %v1502_v53, %v5076_v16  ;;  %v4191_v39 = vadd.f32 %v1503_v0, %v5077_v8  ;;  %v4194_v18 = vadd.f32 %v1245_v31, %v5078_v24  ;;  %v4197_v17 = vadd.f32 %v1500_v57, %v5079_v50 }
 0x179   : > { %v4200_v28 = vadd.f32 %v1501_v1, %v5080_v32  ;;  %1848 = vmin.xlane.f32.xlu0 %v1847_v14  ;;  %v2668_v45 = vadd.f32 -0.5, %v1056_v37  ;;  %v2669_v11 = vadd.f32 -0.5, %v1057_v62  ;;  %v1631_v53 = vsel %vm3563_vm4, %v4081_v49, 1e+18 }
 0x17a   : > { %v4206_v9 = vadd.f32 %v1250_v29, %v5081_v41  ;;  %v1506_v0 = vmul.f32 %v2670_v43, %v2670_v43  ;;  %v1248_v27 = vmul.f32 %v1056_v37, %v1056_v37  ;;  %v1249_v31 = vmul.f32 %v1057_v62, %v1057_v62  ;;  %v982_v43 = vpop.permute.xlu0 %981 }
 0x17b   : > { %v4209_v40 = vadd.f32 %v1251_v48, %v5082_v46  ;;  %v1507_v57 = vmul.f32 %v2671_v60, %v2671_v60  ;;  %v1632_v1 = vsel %vm3578_vm5, %v4090_v2, 1e+18  ;;  %v1706_v36 = vsel %vm3585_vm6, %v4093_v58, 1e+18  ;;  %v5085_v46 = vld [vmem:[#allocation89_spill] sm:$0xff] }
 0x17c   : > { %v1504_v49 = vmul.f32 %v2668_v45, %v2668_v45  ;;  %v1505_v51 = vmul.f32 %v2669_v11, %v2669_v11  ;;  %v1707_v25 = vsel %vm3592_vm7, %v4096_v21, 1e+18  ;;  %v1770_v29 = vmin.f32 %v1631_v53, %v1706_v36  ;;  %v5084_v11 = vld [vmem:[#allocation94_spill] sm:$0xff]  ;;  %v5086_v36 = vld [vmem:[#allocation95_spill] sm:$0xff] }
 0x17d   : > { %v1771_v37 = vmin.f32 %v1632_v1, %v1707_v25  ;;  %v1629_v62 = vsel %vm3563_vm4, %v3998_v30, 1e+18  ;;  %v1630_v2 = vsel %vm3578_vm5, %v4001_v5, 1e+18  ;;  %v1704_v58 = vsel %vm3585_vm6, %v4029_v55, 1e+18 }
 0x17e   : > { %v1705_v47 = vsel %vm3592_vm7, %v4035_v19, 1e+18  ;;  %v1768_v21 = vmin.f32 %v1629_v62, %v1704_v58  ;;  %v1062_v14 = vsub.f32 %v987_v63, %v3197_v22  ;;  %v1063_v48 = vsub.f32 %v987_v63, %v3200_v23  ;;  %v5083_v55 = vld [vmem:[#allocation88_spill] sm:$0xff] }
 0x17f   : > { %v1856_v60 = vmin.f32 %v1770_v29, %v1771_v37  ;;  %v1769_v16 = vmin.f32 %v1630_v2, %v1705_v47  ;;  %v1060_v30 = vsub.f32 %v982_v43, %v3197_v22  ;;  %v1061_v8 = vsub.f32 %v982_v43, %v3200_v23  ;;  %v5087_v22 = vld [vmem:[#allocation92_spill] sm:$0xff]  ;;  %v5088_v29 = vld [vmem:[#allocation93_spill] sm:$0xff] }
 0x180   : > { %v1254_v5 = vmul.f32 %v1062_v14, %v1062_v14  ;;  %v1255_v24 = vmul.f32 %v1063_v48, %v1063_v48  ;;  %v2674_v50 = vadd.f32 -0.5, %v1062_v14  ;;  %v2675_v32 = vadd.f32 -0.5, %v1063_v48  ;;  %v5091_v14 = vld [vmem:[#allocation102_spill] sm:$0xff] }
 0x181   : > { %v4237_v45 = vadd.f32 %v1506_v0, %v5083_v55  ;;  %v1312_v19 = vadd.f32 %v1248_v27, %v5084_v11  ;;  %1857 = vmin.xlane.f32.xlu1 %v1856_v60  ;;  %v1853_v53 = vmin.f32 %v1768_v21, %v1769_v16  ;;  %v1252_v41 = vmul.f32 %v1060_v30, %v1060_v30  ;;  %v5089_v0 = vld [vmem:[#allocation100_spill] sm:$0xff] }
 0x182   : > { %v4241_v1 = vadd.f32 %v1507_v57, %v5085_v46  ;;  %v1313_v63 = vadd.f32 %v1249_v31, %v5086_v36  ;;  %v1568_v25 = vadd.f32 %v1504_v49, %v5087_v22  ;;  %v1253_v23 = vmul.f32 %v1061_v8, %v1061_v8  ;;  %v5090_v57 = vld [vmem:[#allocation101_spill] sm:$0xff] }
 0x183   : > { %v1569_v43 = vadd.f32 %v1505_v51, %v5088_v29  ;;  %1854 = vmin.xlane.f32.xlu0 %v1853_v53  ;;  %v4247_v37 = vadd.f32 %v1254_v5, %v3522_v15  ;;  %v4250_v62 = vadd.f32 %v1255_v24, %v5089_v0  ;;  %v2672_v27 = vadd.f32 -0.5, %v1060_v30  ;;  %v5092_v53 = vld [vmem:[#allocation98_spill] sm:$0xff] }
 0x184   : > { %v1510_v2 = vmul.f32 %v2674_v50, %v2674_v50  ;;  %v1511_v58 = vmul.f32 %v2675_v32, %v2675_v32  ;;  %v2673_v47 = vadd.f32 -0.5, %v1061_v8  ;;  %v1635_v31 = vsel %vm3563_vm4, %v4136_v54, 1e+18 }
 0x185   : > { %v1316_v49 = vadd.f32 %v1252_v41, %v5090_v57  ;;  %v1636_v51 = vsel %vm3578_vm5, %v4142_v20, 1e+18  ;;  %v1710_v15 = vsel %vm3585_vm6, %v4145_v56, 1e+18  ;;  %v1711_v21 = vsel %vm3592_vm7, %v4148_v44, 1e+18 }
 0x186   : > { %v1317_v48 = vadd.f32 %v1253_v23, %v5091_v14  ;;  %v1774_v60 = vmin.f32 %v1635_v31, %v1710_v15  ;;  %v1775_v16 = vmin.f32 %v1636_v51, %v1711_v21  ;;  %v1633_v54 = vsel %vm3563_vm4, %v4047_v59, 1e+18  ;;  %v5093_v23 = vld [vmem:[#allocation99_spill] sm:$0xff] }
 0x187   : > { %v1508_v30 = vmul.f32 %v2672_v27, %v2672_v27  ;;  %v1634_v20 = vsel %vm3578_vm5, %v4050_v35, 1e+18  ;;  %v1708_v56 = vsel %vm3585_vm6, %v4084_v26, 1e+18  ;;  %v1709_v44 = vsel %vm3592_vm7, %v4087_v10, 1e+18 }
 0x188   : > { %v1862_v8 = vmin.f32 %v1774_v60, %v1775_v16  ;;  %v1772_v5 = vmin.f32 %v1633_v54, %v1708_v56  ;;  %v1773_v24 = vmin.f32 %v1634_v20, %v1709_v44  ;;  %v1639_v59 = vsel %vm3563_vm4, %v4185_v42, 1e+18 }
 0x189   : > { %v1509_v50 = vmul.f32 %v2673_v47, %v2673_v47  ;;  %v1640_v35 = vsel %vm3578_vm5, %v4194_v18, 1e+18  ;;  %v1714_v26 = vsel %vm3585_vm6, %v4197_v17, 1e+18  ;;  %v1715_v10 = vsel %vm3592_vm7, %v4200_v28, 1e+18 }
 0x18a   : > { %1863 = vmin.xlane.f32.xlu1 %v1862_v8  ;;  %v1859_v32 = vmin.f32 %v1772_v5, %v1773_v24  ;;  %v1778_v55 = vmin.f32 %v1639_v59, %v1714_v26  ;;  %v1779_v11 = vmin.f32 %v1640_v35, %v1715_v10  ;;  %v1637_v42 = vsel %vm3563_vm4, %v4102_v4, 1e+18  ;;  %v1890_v10 = vld [vmem:[#allocation2 + $0x20] sm:$0xff] }
 0x18b   : > { %v1572_v41 = vadd.f32 %v1508_v30, %v5092_v53  ;;  %v1638_v18 = vsel %vm3578_vm5, %v4105_v13, 1e+18  ;;  %v1712_v17 = vsel %vm3585_vm6, %v4133_v34, 1e+18  ;;  %v1713_v28 = vsel %vm3592_vm7, %v4139_v6, 1e+18 }
 0x18c   : > { %1860 = vmin.xlane.f32.xlu0 %v1859_v32  ;;  %v1868_v46 = vmin.f32 %v1778_v55, %v1779_v11  ;;  %v1776_v36 = vmin.f32 %v1637_v42, %v1712_v17  ;;  %v1777_v22 = vmin.f32 %v1638_v18, %v1713_v28  ;;  %v1643_v4 = vsel %vm3563_vm4, %v1312_v19, 1e+18  ;;  %v5094_v19 = vld [vmem:[#allocation96_spill] sm:$0xff]  ;;  %v1889_v55 = vld [vmem:[#allocation2 + $0x18] sm:$0xff] }
 0x18d   : > { %v1573_v29 = vadd.f32 %v1509_v50, %v5093_v23  ;;  %v1644_v13 = vsel %vm3578_vm5, %v1313_v63, 1e+18  ;;  %v1718_v0 = vsel %vm3585_vm6, %v1568_v25, 1e+18  ;;  %v1719_v34 = vsel %vm3592_vm7, %v1569_v43, 1e+18 }
 0x18e   : > { %1869 = vmin.xlane.f32.xlu1 %v1868_v46  ;;  %v1865_v6 = vmin.f32 %v1776_v36, %v1777_v22  ;;  %v1782_v27 = vmin.f32 %v1643_v4, %v1718_v0  ;;  %v1783_v47 = vmin.f32 %v1644_v13, %v1719_v34  ;;  %v1641_v31 = vsel %vm3563_vm4, %v4151_v38, 1e+18  ;;  %v1887_v50 = vld [vmem:[#allocation2 + $0x8] sm:$0xff]  ;;  %v1894_v22 = vld [vmem:[#allocation2 + $0x40] sm:$0xff]  ;;  %v1893_v23 = vld [vmem:[#allocation2 + $0x38] sm:$0xff] }
 0x18f   : > { %v1574_v57 = vadd.f32 %v1510_v2, %v5094_v19  ;;  %v1642_v63 = vsel %vm3578_vm5, %v4154_v7, 1e+18  ;;  %v1716_v25 = vsel %vm3585_vm6, %v4188_v12, 1e+18  ;;  %v1717_v43 = vsel %vm3592_vm7, %v4191_v39, 1e+18 }
 0x190   : > { %1866 = vmin.xlane.f32.xlu0 %v1865_v6  ;;  %v1874_v51 = vmin.f32 %v1782_v27, %v1783_v47  ;;  %v1780_v15 = vmin.f32 %v1641_v31, %v1716_v25  ;;  %v1781_v21 = vmin.f32 %v1642_v63, %v1717_v43  ;;  %v1647_v38 = vsel %vm3563_vm4, %v1316_v49, 1e+18  ;;  %v5095_v2 = vld [vmem:[#allocation97_spill] sm:$0xff]  ;;  %v1897_v25 = vld [vmem:[#allocation2 + $0x58] sm:$0xff] }
 0x191   : > { %v1575_v14 = vadd.f32 %v1511_v58, %v5095_v2  ;;  %v1648_v7 = vsel %vm3578_vm5, %v1317_v48, 1e+18  ;;  %v1722_v60 = vsel %vm3585_vm6, %v1572_v41, 1e+18  ;;  %v1723_v12 = vsel %vm3592_vm7, %v1573_v29, 1e+18 }
 0x192   : > { %1875 = vmin.xlane.f32.xlu1 %v1874_v51  ;;  %v1871_v39 = vmin.f32 %v1780_v15, %v1781_v21  ;;  %v1786_v16 = vmin.f32 %v1647_v38, %v1722_v60  ;;  %v1787_v54 = vmin.f32 %v1648_v7, %v1723_v12  ;;  %v1645_v30 = vsel %vm3563_vm4, %v4206_v9, 1e+18  ;;  %v1892_v41 = vld [vmem:[#allocation2 + $0x30] sm:$0xff]  ;;  %v1891_v17 = vld [vmem:[#allocation2 + $0x28] sm:$0xff]  ;;  %v1902_v12 = vld [vmem:[#allocation2 + $0x80] sm:$0xff] }
 0x193   : > { %v1646_v58 = vsel %vm3578_vm5, %v4209_v40, 1e+18  ;;  %v1720_v49 = vsel %vm3585_vm6, %v4237_v45, 1e+18  ;;  %v1721_v48 = vsel %vm3592_vm7, %v4241_v1, 1e+18 }
 0x194   : > { %1872 = vmin.xlane.f32.xlu0 %v1871_v39  ;;  %v1880_v20 = vmin.f32 %v1786_v16, %v1787_v54  ;;  %v1784_v56 = vmin.f32 %v1645_v30, %v1720_v49  ;;  %v1785_v44 = vmin.f32 %v1646_v58, %v1721_v48  ;;  %v1649_v9 = vsel %vm3563_vm4, %v4247_v37, 1e+18  ;;  %v1886_v37 = vld [vmem:[#allocation2] sm:$0xff]  ;;  %v1896_v34 = vld [vmem:[#allocation2 + $0x50] sm:$0xff]  ;;  %v1895_v27 = vld [vmem:[#allocation2 + $0x48] sm:$0xff] }
 0x195   : > { %v1650_v40 = vsel %vm3578_vm5, %v4250_v62, 1e+18  ;;  %v1724_v8 = vsel %vm3585_vm6, %v1574_v57, 1e+18  ;;  %v1725_v45 = vsel %vm3592_vm7, %v1575_v14, 1e+18 }
 0x196   : > { %1881 = vmin.xlane.f32.xlu1 %v1880_v20  ;;  %v1877_v1 = vmin.f32 %v1784_v56, %v1785_v44  ;;  %v1788_v5 = vmin.f32 %v1649_v9, %v1724_v8  ;;  %v1789_v24 = vmin.f32 %v1650_v40, %v1725_v45  ;;  %v1898_v57 = vld [vmem:[#allocation2 + $0x60] sm:$0xff]  ;;  %v1900_v21 = vld [vmem:[#allocation2 + $0x70] sm:$0xff]  ;;  %v1899_v2 = vld [vmem:[#allocation2 + $0x68] sm:$0xff] }
 0x197   : > { %v1901_v16 = vld [vmem:[#allocation2 + $0x78] sm:$0xff]  ;;  %v1904_v49 = vld [vmem:[#allocation2 + $0x90] sm:$0xff]  ;;  %v1903_v20 = vld [vmem:[#allocation2 + $0x88] sm:$0xff] }
 0x198   : > { %1878 = vmin.xlane.f32.xlu0 %v1877_v1  ;;  %v1883_v59 = vmin.f32 %v1788_v5, %v1789_v24  ;;  %v1906_v40 = vld [vmem:[#allocation2 + $0xa0] sm:$0xff]  ;;  %v1905_v45 = vld [vmem:[#allocation2 + $0x98] sm:$0xff] }
 0x19c   : > { %1884 = vmin.xlane.f32.xlu0 %v1883_v59  ;;  %v1908_v59 = vld [vmem:[#allocation2 + $0xb0] sm:$0xff] }
 0x1a7   : > { %v1795_v3 = vpop.xlane.xlu1 %1794 }
 0x1a8   : > { %v1919_v35 = vmin.f32 %v1887_v50, %v1795_v3  ;;  %v1907_v3 = vld [vmem:[#allocation2 + $0xa8] sm:$0xff] }
 0x1a9   : > { %v1792_v26 = vpop.xlane.xlu0 %1791 }
 0x1aa   : > { %1952 = vst.msk [vmem:[#allocation2 + $0x8] sm:$0xff] %vm4893_vm1, %v1919_v35  ;;  %v1918_v52 = vmin.f32 %v1886_v37, %v1792_v26 }
 0x1ac   : > { %1951 = vst.msk [vmem:[#allocation2] sm:$0xff] %vm4893_vm1, %v1918_v52  ;;  %v1910_v52 = vld [vmem:[#allocation2 + $0xc0] sm:$0xff] }
 0x1b1   : > { %v1798_v33 = vpop.xlane.xlu0 %1797 }
 0x1b2   : > { %v1920_v62 = vmin.f32 %v1888_v61, %v1798_v33  ;;  %v1909_v33 = vld [vmem:[#allocation2 + $0xb8] sm:$0xff] }
 0x1b4   : > { %1953 = vst.msk [vmem:[#allocation2 + $0x10] sm:$0xff] %vm4893_vm1, %v1920_v62 }
 0x1b8   : > { %v1804_v32 = vpop.xlane.xlu1 %1803 }
 0x1b9   : > { %v1922_v11 = vmin.f32 %v1890_v10, %v1804_v32  ;;  %v1912_v32 = vld [vmem:[#allocation2 + $0xd0] sm:$0xff] }
 0x1ba   : > { %v1801_v42 = vpop.xlane.xlu0 %1800 }
 0x1bb   : > { %1955 = vst.msk [vmem:[#allocation2 + $0x20] sm:$0xff] %vm4893_vm1, %v1922_v11  ;;  %v1921_v53 = vmin.f32 %v1889_v55, %v1801_v42  ;;  %v1911_v42 = vld [vmem:[#allocation2 + $0xc8] sm:$0xff] }
 0x1bd   : > { %1954 = vst.msk [vmem:[#allocation2 + $0x18] sm:$0xff] %vm4893_vm1, %v1921_v53 }
 0x1c2   : > { %v1810_v18 = vpop.xlane.xlu1 %1809 }
 0x1c3   : > { %v1924_v28 = vmin.f32 %v1892_v41, %v1810_v18  ;;  %v1914_v18 = vld [vmem:[#allocation2 + $0xe0] sm:$0xff] }
 0x1c4   : > { %v1807_v46 = vpop.xlane.xlu0 %1806 }
 0x1c5   : > { %1957 = vst.msk [vmem:[#allocation2 + $0x30] sm:$0xff] %vm4893_vm1, %v1924_v28  ;;  %v1923_v36 = vmin.f32 %v1891_v17, %v1807_v46  ;;  %v1913_v46 = vld [vmem:[#allocation2 + $0xd8] sm:$0xff] }
 0x1c7   : > { %1956 = vst.msk [vmem:[#allocation2 + $0x28] sm:$0xff] %vm4893_vm1, %v1923_v36 }
 0x1cb   : > { %v1816_v4 = vpop.xlane.xlu1 %1815 }
 0x1cc   : > { %v1926_v29 = vmin.f32 %v1894_v22, %v1816_v4  ;;  %v1916_v4 = vld [vmem:[#allocation2 + $0xf0] sm:$0xff] }
 0x1cd   : > { %v1813_v13 = vpop.xlane.xlu0 %1812 }
 0x1ce   : > { %1959 = vst.msk [vmem:[#allocation2 + $0x40] sm:$0xff] %vm4893_vm1, %v1926_v29  ;;  %v1925_v0 = vmin.f32 %v1893_v23, %v1813_v13  ;;  %v1915_v13 = vld [vmem:[#allocation2 + $0xe8] sm:$0xff] }
 0x1d0   : > { %1958 = vst.msk [vmem:[#allocation2 + $0x38] sm:$0xff] %vm4893_vm1, %v1925_v0 }
 0x1d5   : > { %v1822_v6 = vpop.xlane.xlu1 %1821 }
 0x1d6   : > { %v1928_v47 = vmin.f32 %v1896_v34, %v1822_v6 }
 0x1d7   : > { %v1819_v31 = vpop.xlane.xlu0 %1818 }
 0x1d8   : > { %1961 = vst.msk [vmem:[#allocation2 + $0x50] sm:$0xff] %vm4893_vm1, %v1928_v47  ;;  %v1927_v19 = vmin.f32 %v1895_v27, %v1819_v31  ;;  %v1917_v27 = vld [vmem:[#allocation2 + $0xf8] sm:$0xff] }
 0x1da   : > { %1960 = vst.msk [vmem:[#allocation2 + $0x48] sm:$0xff] %vm4893_vm1, %v1927_v19 }
 0x1de   : > { %v1828_v63 = vpop.xlane.xlu1 %1827 }
 0x1df   : > { %v1930_v43 = vmin.f32 %v1898_v57, %v1828_v63 }
 0x1e0   : > { %v1825_v51 = vpop.xlane.xlu0 %1824 }
 0x1e1   : > { %1963 = vst.msk [vmem:[#allocation2 + $0x60] sm:$0xff] %vm4893_vm1, %v1930_v43  ;;  %v1929_v15 = vmin.f32 %v1897_v25, %v1825_v51 }
 0x1e3   : > { %1962 = vst.msk [vmem:[#allocation2 + $0x58] sm:$0xff] %vm4893_vm1, %v1929_v15 }
 0x1e8   : > { %v1834_v38 = vpop.xlane.xlu1 %1833 }
 0x1e9   : > { %v1932_v14 = vmin.f32 %v1900_v21, %v1834_v38 }
 0x1ea   : > { %v1831_v7 = vpop.xlane.xlu0 %1830 }
 0x1eb   : > { %1965 = vst.msk [vmem:[#allocation2 + $0x70] sm:$0xff] %vm4893_vm1, %v1932_v14  ;;  %v1931_v60 = vmin.f32 %v1899_v2, %v1831_v7 }
 0x1ed   : > { %1964 = vst.msk [vmem:[#allocation2 + $0x68] sm:$0xff] %vm4893_vm1, %v1931_v60 }
 0x1f1   : > { %v1840_v39 = vpop.xlane.xlu1 %1839 }
 0x1f2   : > { %v1934_v54 = vmin.f32 %v1902_v12, %v1840_v39 }
 0x1f3   : > { %v1837_v30 = vpop.xlane.xlu0 %1836 }
 0x1f4   : > { %1967 = vst.msk [vmem:[#allocation2 + $0x80] sm:$0xff] %vm4893_vm1, %v1934_v54  ;;  %v1933_v58 = vmin.f32 %v1901_v16, %v1837_v30 }
 0x1f6   : > { %1966 = vst.msk [vmem:[#allocation2 + $0x78] sm:$0xff] %vm4893_vm1, %v1933_v58 }
 0x1fb   : > { %v1846_v48 = vpop.xlane.xlu1 %1845 }
 0x1fc   : > { %v1936_v56 = vmin.f32 %v1904_v49, %v1846_v48 }
 0x1fd   : > { %v1843_v44 = vpop.xlane.xlu0 %1842 }
 0x1fe   : > { %1969 = vst.msk [vmem:[#allocation2 + $0x90] sm:$0xff] %vm4893_vm1, %v1936_v56  ;;  %v1935_v9 = vmin.f32 %v1903_v20, %v1843_v44 }
 0x200   : > { %1968 = vst.msk [vmem:[#allocation2 + $0x88] sm:$0xff] %vm4893_vm1, %v1935_v9 }
 0x204   : > { %v1852_v8 = vpop.xlane.xlu1 %1851 }
 0x205   : > { %v1938_v1 = vmin.f32 %v1906_v40, %v1852_v8 }
 0x206   : > { %v1849_v5 = vpop.xlane.xlu0 %1848 }
 0x207   : > { %1971 = vst.msk [vmem:[#allocation2 + $0xa0] sm:$0xff] %vm4893_vm1, %v1938_v1  ;;  %v1937_v24 = vmin.f32 %v1905_v45, %v1849_v5 }
 0x209   : > { %1970 = vst.msk [vmem:[#allocation2 + $0x98] sm:$0xff] %vm4893_vm1, %v1937_v24 }
 0x20e   : > { %v1858_v50 = vpop.xlane.xlu1 %1857 }
 0x20f   : > { %v1940_v37 = vmin.f32 %v1908_v59, %v1858_v50 }
 0x210   : > { %v1855_v35 = vpop.xlane.xlu0 %1854 }
 0x211   : > { %1973 = vst.msk [vmem:[#allocation2 + $0xb0] sm:$0xff] %vm4893_vm1, %v1940_v37  ;;  %v1939_v26 = vmin.f32 %v1907_v3, %v1855_v35 }
 0x213   : > { %1972 = vst.msk [vmem:[#allocation2 + $0xa8] sm:$0xff] %vm4893_vm1, %v1939_v26 }
 0x217   : > { %v1864_v61 = vpop.xlane.xlu1 %1863 }
 0x218   : > { %v1942_v62 = vmin.f32 %v1910_v52, %v1864_v61 }
 0x219   : > { %v1861_v10 = vpop.xlane.xlu0 %1860 }
 0x21a   : > { %1975 = vst.msk [vmem:[#allocation2 + $0xc0] sm:$0xff] %vm4893_vm1, %v1942_v62  ;;  %v1941_v55 = vmin.f32 %v1909_v33, %v1861_v10 }
 0x21b   : > { %v1870_v11 = vpop.xlane.xlu1 %1869 }
 0x21c   : > { %1974 = vst.msk [vmem:[#allocation2 + $0xb8] sm:$0xff] %vm4893_vm1, %v1941_v55  ;;  %v1944_v53 = vmin.f32 %v1912_v32, %v1870_v11 }
 0x21d   : > { %v1867_v41 = vpop.xlane.xlu0 %1866 }
 0x21e   : > { %1977 = vst.msk [vmem:[#allocation2 + $0xd0] sm:$0xff] %vm4893_vm1, %v1944_v53  ;;  %v1943_v17 = vmin.f32 %v1911_v42, %v1867_v41 }
 0x21f   : > { %v1876_v28 = vpop.xlane.xlu1 %1875 }
 0x220   : > { %1976 = vst.msk [vmem:[#allocation2 + $0xc8] sm:$0xff] %vm4893_vm1, %v1943_v17  ;;  %v1946_v36 = vmin.f32 %v1914_v18, %v1876_v28 }
 0x221   : > { %v1873_v22 = vpop.xlane.xlu0 %1872 }
 0x222   : > { %1979 = vst.msk [vmem:[#allocation2 + $0xe0] sm:$0xff] %vm4893_vm1, %v1946_v36  ;;  %v1945_v23 = vmin.f32 %v1913_v46, %v1873_v22 }
 0x223   : > { %v1882_v29 = vpop.xlane.xlu1 %1881 }
 0x224   : > { %1978 = vst.msk [vmem:[#allocation2 + $0xd8] sm:$0xff] %vm4893_vm1, %v1945_v23  ;;  %v1948_v0 = vmin.f32 %v1916_v4, %v1882_v29 }
 0x225   : > { %v1879_v34 = vpop.xlane.xlu0 %1878 }
 0x226   : > { %1981 = vst.msk [vmem:[#allocation2 + $0xf0] sm:$0xff] %vm4893_vm1, %v1948_v0  ;;  %v1947_v6 = vmin.f32 %v1915_v13, %v1879_v34 }
 0x228   : > { %1980 = vst.msk [vmem:[#allocation2 + $0xe8] sm:$0xff] %vm4893_vm1, %v1947_v6 }
 0x229   : > { %v1885_v47 = vpop.xlane.xlu0 %1884 }
 0x22a   : > { %v1949_v31 = vmin.f32 %v1917_v27, %v1885_v47 }
 0x22c   : > { %1982 = vst.msk [vmem:[#allocation2 + $0xf8] sm:$0xff] %vm4893_vm1, %v1949_v31 }
 0x22d PF: > { %1986 = sbr.rel (!%p519_p2) target bundleno = 666 (0x29a), region = 64  ;;  %v4390_v19 = vld [vmem:[#allocation2] sm:$0xff] (%p519_p2)  ;;  %v4392_v57 = vld [vmem:[#allocation2 + $0x8] sm:$0xff] (%p519_p2)  ;;  %v4394_v63 = vld [vmem:[#allocation2 + $0x10] sm:$0xff] (%p519_p2) }
 0x22e   : > { %v4396_v25 = vld [vmem:[#allocation2 + $0x18] sm:$0xff] (%p519_p2)  ;;  %2712 = vrsqrt.f32 (%p519_p2), %v4390_v19  ;;  %v4399_v43 = vld [vmem:[#allocation2 + $0x20] sm:$0xff] (%p519_p2)  ;;  %v4402_v51 = vld [vmem:[#allocation2 + $0x28] sm:$0xff] (%p519_p2)  ;;  %vm2021_vm8 = vcmp.eq.f32.partialorder (%p519_p2), %v4390_v19, inf  ;;  %vm2023_vm9 = vcmp.eq.f32.partialorder (%p519_p2), %v4390_v19, 0.0  ;;  %v2024_v60 = vand.u32 (%p519_p2), 2147483648, %v4390_v19 }
 0x22f   : > { %2714 = vrsqrt.f32 (%p519_p2), %v4392_v57  ;;  %v4405_v15 = vld [vmem:[#allocation2 + $0x30] sm:$0xff] (%p519_p2)  ;;  %v4408_v21 = vld [vmem:[#allocation2 + $0x38] sm:$0xff] (%p519_p2)  ;;  %v4413_v38 = vld [vmem:[#allocation2 + $0x40] sm:$0xff] (%p519_p2)  ;;  %vm2028_vm10 = vcmp.eq.f32.partialorder (%p519_p2), %v4392_v57, inf  ;;  %vm2030_vm11 = vcmp.eq.f32.partialorder (%p519_p2), %v4392_v57, 0.0  ;;  %v2031_v16 = vand.u32 (%p519_p2), 2147483648, %v4392_v57 }
 0x230   : > { %2716 = vrsqrt.f32 (%p519_p2), %v4394_v63  ;;  %v4416_v2 = vld [vmem:[#allocation2 + $0x48] sm:$0xff] (%p519_p2)  ;;  %v4424_v39 = vld [vmem:[#allocation2 + $0x50] sm:$0xff] (%p519_p2)  ;;  %vm2035_vm12 = vcmp.eq.f32.partialorder (%p519_p2), %v4394_v63, inf  ;;  %vm2037_vm13 = vcmp.eq.f32.partialorder (%p519_p2), %v4394_v63, 0.0  ;;  %v4430_v30 = vld [vmem:[#allocation2 + $0x58] sm:$0xff] (%p519_p2)  ;;  %v2038_v58 = vand.u32 (%p519_p2), 2147483648, %v4394_v63 }
 0x231   : > { %2718 = vrsqrt.f32 (%p519_p2), %v4396_v25  ;;  %vm2042_vm14 = vcmp.eq.f32.partialorder (%p519_p2), %v4396_v25, inf  ;;  %vm2044_vm15 = vcmp.eq.f32.partialorder (%p519_p2), %v4396_v25, 0.0  ;;  %v2045_v49 = vand.u32 (%p519_p2), 2147483648, %v4396_v25  ;;  %v4436_v20 = vld [vmem:[#allocation2 + $0x60] sm:$0xff] (%p519_p2)  ;;  %v4447_v5 = vld [vmem:[#allocation2 + $0x68] sm:$0xff] (%p519_p2)  ;;  %v4472_v62 = vld [vmem:[#allocation2 + $0x70] sm:$0xff] (%p519_p2) }
 0x232   : > { %2720 = vrsqrt.f32 (%p519_p2), %v4399_v43  ;;  %vm2049_vm2 = vcmp.eq.f32.partialorder (%p519_p2), %v4399_v43, inf  ;;  %v2052_v9 = vand.u32 (%p519_p2), 2147483648, %v4399_v43  ;;  %vm2051_vm3 = vcmp.eq.f32.partialorder (%p519_p2), %v4399_v43, 0.0  ;;  %v2243_v36 = vld [vmem:[%s2955_s27] sm:$0xff] (%p519_p2)  ;;  %v2244_v22 = vld [vmem:[%s2955_s27 + $0x8] sm:$0xff] (%p519_p2)  ;;  %v2245_v13 = vld [vmem:[%s2955_s27 + $0x10] sm:$0xff] (%p519_p2) }
 0x233   : > { %2722 = vrsqrt.f32 (%p519_p2), %v4402_v51  ;;  %vm2056_vm4 = vcmp.eq.f32.partialorder (%p519_p2), %v4402_v51, inf  ;;  %v2059_v45 = vand.u32 (%p519_p2), 2147483648, %v4402_v51  ;;  %vm2058_vm5 = vcmp.eq.f32.partialorder (%p519_p2), %v4402_v51, 0.0  ;;  %v2246_v47 = vld [vmem:[%s2955_s27 + $0x18] sm:$0xff] (%p519_p2) }
 0x234   : > { %2724 = vrsqrt.f32 %v4405_v15  ;;  %vm2063_vm6 = vcmp.eq.f32.partialorder %v4405_v15, inf  ;;  %v2066_v50 = vand.u32 2147483648, %v4405_v15  ;;  %vm2070_vm0 = vcmp.eq.f32.partialorder %v4408_v21, inf }
 0x235   : > { %2726 = vrsqrt.f32 %v4408_v21  ;;  %vm2072_vm1 = vcmp.eq.f32.partialorder %v4408_v21, 0.0  ;;  %v2073_v35 = vand.u32 2147483648, %v4408_v21  ;;  %vm2077_vm7 = vcmp.eq.f32.partialorder %v4413_v38, inf }
 0x236   : > { %2728 = vrsqrt.f32 %v4413_v38  ;;  %v2080_v11 = vand.u32 2147483648, %v4413_v38  ;;  %v2087_v53 = vand.u32 2147483648, %v4416_v2  ;;  %v2094_v41 = vand.u32 2147483648, %v4424_v39 }
 0x237   : > { %2730 = vrsqrt.f32 %v4416_v2  ;;  %v2101_v46 = vand.u32 2147483648, %v4430_v30 }
 0x238   : > { %v2713_v14 = vpop.eup %2712  ;;  %2732 = vrsqrt.f32 %v4424_v39 }
 0x239   : > { %v2715_v7 = vpop.eup %2714  ;;  %v2020_v56 = vmul.f32 %v2713_v14, %v4390_v19  ;;  %2734 = vrsqrt.f32 %v4430_v30 }
 0x23a   : > { %v2717_v12 = vpop.eup %2716  ;;  %v2027_v44 = vmul.f32 %v2715_v7, %v4392_v57  ;;  %2736 = vrsqrt.f32 %v4436_v20 }
 0x23b   : > { %v2719_v54 = vpop.eup %2718  ;;  %v2034_v8 = vmul.f32 %v2717_v12, %v4394_v63  ;;  %v2022_v3 = vsel %vm2021_vm8, %v4390_v19, %v2020_v56  ;;  %2738 = vrsqrt.f32 %v4447_v5  ;;  %vm2098_vm8 = vcmp.eq.f32.partialorder %v4430_v30, inf  ;;  %v4516_v19 = vld [vmem:[#allocation2 + $0x78] sm:$0xff]  ;;  %v2247_v12 = vld [vmem:[%s2955_s27 + $0x20] sm:$0xff] }
 0x23c   : > { %v2721_v48 = vpop.eup %2720  ;;  %v2041_v24 = vmul.f32 %v2719_v54, %v4396_v25  ;;  %v2029_v37 = vsel %vm2028_vm10, %v4392_v57, %v2027_v44  ;;  %vm2084_vm10 = vcmp.eq.f32.partialorder %v4416_v2, inf  ;;  %v2025_v18 = vsel %vm2023_vm9, %v2024_v60, %v2022_v3 }
 0x23d   : > { %v2723_v40 = vpop.eup %2722  ;;  %v2036_v26 = vsel %vm2035_vm12, %v4394_v63, %v2034_v8  ;;  %v2048_v52 = vmul.f32 %v2721_v48, %v4399_v43  ;;  %vm2091_vm12 = vcmp.eq.f32.partialorder %v4424_v39, inf  ;;  %v2032_v17 = vsel %vm2030_vm11, %v2031_v16, %v2029_v37 }
 0x23e   : > { %v2725_v1 = vpop.eup %2724  ;;  %v2055_v61 = vmul.f32 %v2723_v40, %v4402_v51  ;;  %v2043_v10 = vsel %vm2042_vm14, %v4396_v25, %v2041_v24  ;;  %v2039_v28 = vsel %vm2037_vm13, %v2038_v58, %v2036_v26  ;;  %vm2086_vm14 = vcmp.eq.f32.partialorder %v4416_v2, 0.0  ;;  %v4529_v58 = vld [vmem:[#allocation2 + $0x80] sm:$0xff] }
 0x23f   : > { %v2727_v59 = vpop.eup %2726  ;;  %v2062_v32 = vmul.f32 %v2725_v1, %v4405_v15  ;;  %v2046_v4 = vsel %vm2044_vm15, %v2045_v49, %v2043_v10  ;;  %v2050_v23 = vsel %vm2049_vm2, %v4399_v43, %v2048_v52  ;;  %2740 = vrsqrt.f32 %v4472_v62 }
 0x240   : > { %v2729_v33 = vpop.eup %2728  ;;  %v2069_v55 = vmul.f32 %v2727_v59, %v4408_v21  ;;  %v2057_v29 = vsel %vm2056_vm4, %v4402_v51, %v2055_v61  ;;  %vm2093_vm9 = vcmp.eq.f32.partialorder %v4424_v39, 0.0  ;;  %vm2100_vm11 = vcmp.eq.f32.partialorder %v4430_v30, 0.0  ;;  %v2248_v51 = vld [vmem:[%s2955_s27 + $0x28] sm:$0xff] }
 0x241   : > { %v2731_v42 = vpop.eup %2730  ;;  %v2064_v0 = vsel %vm2063_vm6, %v4405_v15, %v2062_v32  ;;  %v2076_v6 = vmul.f32 %v2729_v33, %v4413_v38  ;;  %vm2105_vm13 = vcmp.eq.f32.partialorder %v4436_v20, inf  ;;  %v2108_v57 = vand.u32 2147483648, %v4436_v20 }
 0x242   : > { %v2071_v34 = vsel %vm2070_vm0, %v4408_v21, %v2069_v55  ;;  %v2083_v27 = vmul.f32 %v2731_v42, %v4416_v2  ;;  %v2733_v31 = vpop.eup %2732  ;;  %v2275_v63 = vmul.f32 %v2243_v36, %v2025_v18  ;;  %v2276_v25 = vmul.f32 %v2244_v22, %v2032_v17  ;;  %v4549_v21 = vld [vmem:[#allocation2 + $0x88] sm:$0xff]  ;;  %v2250_v55 = vld [vmem:[%s2955_s27 + $0x38] sm:$0xff] }
 0x243   : > { %v2735_v14 = vpop.eup %2734  ;;  %v2053_v7 = vsel %vm2051_vm3, %v2052_v9, %v2050_v23  ;;  %vm2107_vm0 = vcmp.eq.f32.partialorder %v4436_v20, 0.0  ;;  %vm2112_vm15 = vcmp.eq.f32.partialorder %v4447_v5, inf  ;;  %v2115_v60 = vand.u32 2147483648, %v4447_v5  ;;  %v4573_v17 = vld [vmem:[#allocation2 + $0x98] sm:$0xff] }
 0x244   : > { %v2277_v16 = vmul.f32 %v2245_v13, %v2039_v28  ;;  %v2737_v54 = vpop.eup %2736  ;;  %v2060_v49 = vsel %vm2058_vm5, %v2059_v45, %v2057_v29  ;;  %vm5096_vm2 = vcmp.eq.f32.partialorder %v4405_v15, 0.0  ;;  %v2074_v48 = vsel %vm2072_vm1, %v2073_v35, %v2071_v34  ;;  %v4559_v35 = vld [vmem:[#allocation2 + $0x90] sm:$0xff] }
 0x245   : > { %v2067_v43 = vsel %vm5096_vm2, %v2066_v50, %v2064_v0  ;;  %v2278_v56 = vmul.f32 %v2246_v47, %v2046_v4  ;;  %v2078_v44 = vsel %vm2077_vm7, %v4413_v38, %v2076_v6  ;;  %v2085_v9 = vsel %vm2084_vm10, %v4416_v2, %v2083_v27  ;;  %v2739_v15 = vpop.eup %2738  ;;  %v2249_v50 = vld [vmem:[%s2955_s27 + $0x30] sm:$0xff]  ;;  %v2251_v2 = vld [vmem:[%s2955_s27 + $0x40] sm:$0xff]  ;;  %v2252_v27 = vld [vmem:[%s2955_s27 + $0x48] sm:$0xff] }
 0x246   : > { %v2090_v40 = vmul.f32 %v2733_v31, %v4424_v39  ;;  %vm2114_vm3 = vcmp.eq.f32.partialorder %v4447_v5, 0.0  ;;  %2742 = vrsqrt.f32 %v4516_v19  ;;  %v2097_v8 = vmul.f32 %v2735_v14, %v4430_v30  ;;  %v4590_v4 = vld [vmem:[#allocation2 + $0xa0] sm:$0xff]  ;;  %v2253_v14 = vld [vmem:[%s2955_s27 + $0x50] sm:$0xff] }
 0x247   : > { %v2279_v45 = vmul.f32 %v2247_v12, %v2053_v7  ;;  %vm5097_vm1 = vcmask 7168   ;;  %v2104_v59 = vmul.f32 %v2737_v54, %v4436_v20  ;;  %vm2119_vm5 = vcmp.eq.f32.partialorder %v4472_v62, inf  ;;  %v4620_v12 = vld [vmem:[#allocation2 + $0xb0] sm:$0xff] }
 0x248   : > { %v2308_v1 = vsel %vm5097_vm1, %v2275_v63, 0.0  ;;  %vm5098_vm4 = vmmov %vm5097_vm1  ;;  %2744 = vrsqrt.f32 %v4529_v58  ;;  %vm5100_vm7 = vcmp.eq.f32.partialorder %v4413_v38, 0.0  ;;  %v2122_v52 = vand.u32 2147483648, %v4472_v62 }
 0x249   : > { %v2309_v24 = vsel %vm5098_vm4, %v2276_v25, 0.0  ;;  %vm5099_vm6 = vmmov %vm5097_vm1  ;;  %v2081_v26 = vsel %vm5100_vm7, %v2080_v11, %v2078_v44  ;;  %v2280_v61 = vmul.f32 %v2248_v51, %v2060_v49  ;;  %v2092_v10 = vsel %vm2091_vm12, %v4424_v39, %v2090_v40  ;;  %v2741_v18 = vpop.eup %2740 }
 0x24a   : > { %v2310_v3 = vadd.f32 %v2309_v24, %v2308_v1  ;;  %v2311_v37 = vsel %vm5099_vm6, %v2277_v16, 0.0  ;;  %vm5101_vm10 = vmmov %vm5097_vm1  ;;  %v2111_v32 = vmul.f32 %v2739_v15, %v4447_v5  ;;  %2746 = vrsqrt.f32 %v4549_v21  ;;  %v2255_v15 = vld [vmem:[%s2955_s27 + $0x60] sm:$0xff] }
 0x24b   : > { %v2313_v33 = vsel %vm5101_vm10, %v2278_v56, 0.0  ;;  %v2088_v38 = vsel %vm2086_vm14, %v2087_v53, %v2085_v9  ;;  %v2099_v11 = vsel %vm2098_vm8, %v4430_v30, %v2097_v8  ;;  %vm2121_vm12 = vcmp.eq.f32.partialorder %v4472_v62, 0.0  ;;  %vm5102_vm2 = vmmov %vm5097_vm1  ;;  %v4633_v56 = vld [vmem:[#allocation2 + $0xb8] sm:$0xff] }
 0x24c   : > { %v2312_v42 = vadd.f32 %v2311_v37, %v2310_v3  ;;  %v2281_v28 = vmul.f32 %v2249_v50, %v2067_v43  ;;  %v2315_v36 = vsel %vm5102_vm2, %v2279_v45, 0.0  ;;  %v2106_v22 = vsel %vm2105_vm13, %v4436_v20, %v2104_v59  ;;  %vm5103_vm8 = vmmov %vm5102_vm2  ;;  %v2254_v43 = vld [vmem:[%s2955_s27 + $0x58] sm:$0xff]  ;;  %v4645_v45 = vld [vmem:[#allocation2 + $0xc0] sm:$0xff] }
 0x24d   : > { %vm2126_vm1 = vcmp.eq.f32.partialorder %v4516_v19, inf  ;;  %2748 = vrsqrt.f32 %v4559_v35  ;;  %v2095_v23 = vsel %vm2093_vm9, %v2094_v41, %v2092_v10  ;;  %v2129_v29 = vand.u32 2147483648, %v4516_v19  ;;  %v4607_v41 = vld [vmem:[#allocation2 + $0xa8] sm:$0xff]  ;;  %vm5104_vm9 = vmmov %vm5102_vm2 }
 0x24e   : > { %v2314_v53 = vadd.f32 %v2313_v33, %v2312_v42  ;;  %v2282_v13 = vmul.f32 %v2250_v55, %v2074_v48  ;;  %v2317_v0 = vsel %vm5103_vm8, %v2280_v61, 0.0  ;;  %v2102_v34 = vsel %vm2100_vm11, %v2101_v46, %v2099_v11  ;;  %vm5106_vm6 = vmmov %vm5102_vm2  ;;  %v2256_v61 = vld [vmem:[%s2955_s27 + $0x68] sm:$0xff] }
 0x24f   : > { %v2113_v6 = vsel %vm2112_vm15, %v4447_v5, %v2111_v32  ;;  %2750 = vrsqrt.f32 %v4573_v17  ;;  %v2109_v47 = vsel %vm2107_vm0, %v2108_v57, %v2106_v22  ;;  %v2118_v31 = vmul.f32 %v2741_v18, %v4472_v62  ;;  %vm5105_vm15 = vmmov %vm5102_vm2  ;;  %v4659_v10 = vld [vmem:[#allocation2 + $0xc8] sm:$0xff] }
 0x250   : > { %v2316_v39 = vadd.f32 %v2315_v36, %v2314_v53  ;;  %vm2128_vm14 = vcmp.eq.f32.partialorder %v4516_v19, 0.0  ;;  %v2283_v30 = vmul.f32 %v2251_v2, %v2081_v26  ;;  %v2319_v46 = vsel %vm5104_vm9, %v2281_v28, 0.0  ;;  %v2743_v63 = vpop.eup %2742  ;;  %vm5107_vm10 = vmmov %vm5102_vm2  ;;  %v4671_v28 = vld [vmem:[#allocation2 + $0xd0] sm:$0xff] }
 0x251   : > { %vm2133_vm11 = vcmp.eq.f32.partialorder %v4529_v58, inf  ;;  %v2136_v25 = vand.u32 2147483648, %v4529_v58  ;;  %2752 = vrsqrt.f32 %v4590_v4  ;;  %v2116_v20 = vsel %vm2114_vm3, %v2115_v60, %v2113_v6 }
 0x252   : > { %v2318_v7 = vadd.f32 %v2317_v0, %v2316_v39  ;;  %vm2135_vm13 = vcmp.eq.f32.partialorder %v4529_v58, 0.0  ;;  %vm2140_vm0 = vcmp.eq.f32.partialorder %v4549_v21, inf  ;;  %v2284_v57 = vmul.f32 %v2252_v27, %v2088_v38  ;;  %v2745_v54 = vpop.eup %2744  ;;  %v2257_v38 = vld [vmem:[%s2955_s27 + $0x70] sm:$0xff]  ;;  %v4687_v27 = vld [vmem:[#allocation2 + $0xd8] sm:$0xff] }
 0x253   : > { %v2321_v16 = vsel %vm5105_vm15, %v2282_v13, 0.0  ;;  %v2143_v49 = vand.u32 2147483648, %v4549_v21  ;;  %vm2147_vm4 = vcmp.eq.f32.partialorder %v4559_v35, inf  ;;  %2754 = vrsqrt.f32 %v4607_v41  ;;  %vm5109_vm15 = vmmov %vm5106_vm6 }
 0x254   : > { %v2320_v48 = vadd.f32 %v2319_v46, %v2318_v7  ;;  %v2120_v5 = vsel %vm2119_vm5, %v4472_v62, %v2118_v31  ;;  %v2125_v60 = vmul.f32 %v2743_v63, %v4516_v19  ;;  %vm2142_vm3 = vcmp.eq.f32.partialorder %v4549_v21, 0.0  ;;  %v2747_v40 = vpop.eup %2746  ;;  %v2259_v63 = vld [vmem:[%s2955_s27 + $0x80] sm:$0xff] }
 0x255   : > { %v2285_v44 = vmul.f32 %v2253_v14, %v2095_v23  ;;  %v2323_v9 = vsel %vm5106_vm6, %v2283_v30, 0.0  ;;  %v2150_v51 = vand.u32 2147483648, %v4559_v35  ;;  %vm2154_vm7 = vcmp.eq.f32.partialorder %v4573_v17, inf  ;;  %v4703_v7 = vld [vmem:[#allocation2 + $0xe0] sm:$0xff] }
 0x256   : > { %2756 = vrsqrt.f32 %v4620_v12  ;;  %v2322_v8 = vadd.f32 %v2321_v16, %v2320_v48  ;;  %v2132_v1 = vmul.f32 %v2745_v54, %v4529_v58  ;;  %vm2149_vm5 = vcmp.eq.f32.partialorder %v4559_v35, 0.0 }
 0x257   : > { %v2157_v24 = vand.u32 2147483648, %v4573_v17  ;;  %v2286_v59 = vmul.f32 %v2254_v43, %v2102_v34  ;;  %v2325_v50 = vsel %vm5107_vm10, %v2284_v57, 0.0  ;;  %v2749_v3 = vpop.eup %2748  ;;  %v2123_v37 = vsel %vm2121_vm12, %v2122_v52, %v2120_v5  ;;  %vm5108_vm12 = vmmov %vm5106_vm6  ;;  %v2258_v34 = vld [vmem:[%s2955_s27 + $0x78] sm:$0xff]  ;;  %v2260_v43 = vld [vmem:[%s2955_s27 + $0x88] sm:$0xff] }
 0x258   : > { %vm2161_vm2 = vcmp.eq.f32.partialorder %v4590_v4, inf  ;;  %v2164_v26 = vand.u32 2147483648, %v4590_v4  ;;  %2758 = vrsqrt.f32 %v4633_v56  ;;  %v2324_v33 = vadd.f32 %v2323_v9, %v2322_v8  ;;  %v4718_v5 = vld [vmem:[#allocation2 + $0xe8] sm:$0xff]  ;;  %v2261_v8 = vld [vmem:[%s2955_s27 + $0x90] sm:$0xff] }
 0x259   : > { %v2127_v32 = vsel %vm2126_vm1, %v4516_v19, %v2125_v60  ;;  %v2139_v55 = vmul.f32 %v2747_v40, %v4549_v21  ;;  %vm2156_vm8 = vcmp.eq.f32.partialorder %v4573_v17, 0.0  ;;  %v2287_v62 = vmul.f32 %v2255_v15, %v2109_v47  ;;  %v2751_v42 = vpop.eup %2750 }
 0x25a   : > { %v2327_v52 = vsel %vm5108_vm12, %v2285_v44, 0.0  ;;  %vm2168_vm9 = vcmp.eq.f32.partialorder %v4607_v41, inf  ;;  %v2171_v18 = vand.u32 2147483648, %v4607_v41  ;;  %2760 = vrsqrt.f32 %v4645_v45 }
 0x25b   : > { %v2326_v11 = vadd.f32 %v2325_v50, %v2324_v33  ;;  %v2134_v36 = vsel %vm2133_vm11, %v4529_v58, %v2132_v1  ;;  %v2146_v22 = vmul.f32 %v2749_v3, %v4559_v35  ;;  %vm2163_vm1 = vcmp.eq.f32.partialorder %v4590_v4, 0.0  ;;  %v2753_v23 = vpop.eup %2752  ;;  %v2262_v33 = vld [vmem:[%s2955_s27 + $0x98] sm:$0xff] }
 0x25c   : > { %v2288_v2 = vmul.f32 %v2256_v61, %v2116_v20  ;;  %v2329_v53 = vsel %vm5109_vm15, %v2286_v59, 0.0  ;;  %v2130_v13 = vsel %vm2128_vm14, %v2129_v29, %v2127_v32  ;;  %vm2175_vm6 = vcmp.eq.f32.partialorder %v4620_v12, inf  ;;  %vm5110_vm14 = vmmov %vm5107_vm10  ;;  %v4733_v59 = vld [vmem:[#allocation2 + $0xf0] sm:$0xff] }
 0x25d   : > { %v2178_v0 = vand.u32 2147483648, %v4620_v12  ;;  %2762 = vrsqrt.f32 %v4659_v10  ;;  %v2328_v6 = vadd.f32 %v2327_v52, %v2326_v11  ;;  %v2141_v39 = vsel %vm2140_vm0, %v4549_v21, %v2139_v55  ;;  %v2755_v31 = vpop.eup %2754  ;;  %v4748_v55 = vld [vmem:[#allocation2 + $0xf8] sm:$0xff] }
 0x25e   : > { %v2153_v47 = vmul.f32 %v2751_v42, %v4573_v17  ;;  %vm2170_vm11 = vcmp.eq.f32.partialorder %v4607_v41, 0.0  ;;  %v2289_v19 = vmul.f32 %v2257_v38, %v2123_v37  ;;  %v2331_v29 = vsel %vm5110_vm14, %v2287_v62, 0.0 }
 0x25f   : > { %v2137_v30 = vsel %vm2135_vm13, %v2136_v25, %v2134_v36  ;;  %vm2182_vm10 = vcmp.eq.f32.partialorder %v4633_v56, inf  ;;  %v2185_v46 = vand.u32 2147483648, %v4633_v56  ;;  %2764 = vrsqrt.f32 %v4671_v28  ;;  %vm5111_vm13 = vmmov %vm5108_vm12  ;;  %v2263_v36 = vld [vmem:[%s2955_s27 + $0xa0] sm:$0xff] }
 0x260   : > { %v2330_v14 = vadd.f32 %v2329_v53, %v2328_v6  ;;  %v2148_v20 = vsel %vm2147_vm4, %v4559_v35, %v2146_v22  ;;  %v2160_v57 = vmul.f32 %v2753_v23, %v4590_v4  ;;  %vm2177_vm0 = vcmp.eq.f32.partialorder %v4620_v12, 0.0  ;;  %v2757_v16 = vpop.eup %2756  ;;  %vm5112_vm15 = vmmov %vm5111_vm13 }
 0x261   : > { %v2290_v58 = vmul.f32 %v2258_v34, %v2130_v13  ;;  %v2333_v25 = vsel %vm5111_vm13, %v2288_v2, 0.0  ;;  %v2144_v54 = vsel %vm2142_vm3, %v2143_v49, %v2141_v39  ;;  %vm2189_vm12 = vcmp.eq.f32.partialorder %v4645_v45, inf }
 0x262   : > { %2766 = vrsqrt.f32 %v4687_v27  ;;  %v2332_v48 = vadd.f32 %v2331_v29, %v2330_v14  ;;  %v2155_v60 = vsel %vm2154_vm7, %v4573_v17, %v2153_v47  ;;  %v2167_v44 = vmul.f32 %v2755_v31, %v4607_v41  ;;  %v2759_v49 = vpop.eup %2758  ;;  %vm5113_vm7 = vmmov %vm5111_vm13 }
 0x263   : > { %vm2184_vm4 = vcmp.eq.f32.partialorder %v4633_v56, 0.0  ;;  %v2291_v9 = vmul.f32 %v2259_v63, %v2137_v30  ;;  %v2335_v21 = vsel %vm5112_vm15, %v2289_v19, 0.0  ;;  %v2151_v40 = vsel %vm2149_vm5, %v2150_v51, %v2148_v20  ;;  %vm5114_vm14 = vmmov %vm5113_vm7  ;;  %v2265_v30 = vld [vmem:[%s2955_s27 + $0xb0] sm:$0xff] }
 0x264   : > { %v2192_v15 = vand.u32 2147483648, %v4645_v45  ;;  %2768 = vrsqrt.f32 %v4703_v7  ;;  %v2334_v1 = vadd.f32 %v2333_v25, %v2332_v48  ;;  %v2162_v50 = vsel %vm2161_vm2, %v4590_v4, %v2160_v57  ;;  %v2761_v51 = vpop.eup %2760 }
 0x265   : > { %v2174_v3 = vmul.f32 %v2757_v16, %v4620_v12  ;;  %vm2191_vm3 = vcmp.eq.f32.partialorder %v4645_v45, 0.0  ;;  %v2292_v37 = vmul.f32 %v2260_v43, %v2144_v54  ;;  %v2337_v35 = vsel %vm5113_vm7, %v2290_v58, 0.0 }
 0x266   : > { %v2158_v61 = vsel %vm2156_vm8, %v2157_v24, %v2155_v60  ;;  %vm2196_vm5 = vcmp.eq.f32.partialorder %v4659_v10, inf  ;;  %2770 = vrsqrt.f32 %v4718_v5  ;;  %v2336_v32 = vadd.f32 %v2335_v21, %v2334_v1  ;;  %vm5115_vm8 = vmmov %vm5113_vm7 }
 0x267   : > { %v2169_v62 = vsel %vm2168_vm9, %v4607_v41, %v2167_v44  ;;  %v2181_v52 = vmul.f32 %v2759_v49, %v4633_v56  ;;  %vm2198_vm2 = vcmp.eq.f32.partialorder %v4659_v10, 0.0  ;;  %v2293_v42 = vmul.f32 %v2261_v8, %v2151_v40  ;;  %v2763_v24 = vpop.eup %2762 }
 0x268   : > { %v2339_v17 = vsel %vm5114_vm14, %v2291_v9, 0.0  ;;  %v2165_v38 = vsel %vm2163_vm1, %v2164_v26, %v2162_v50  ;;  %v2199_v11 = vand.u32 2147483648, %v4659_v10  ;;  %2772 = vrsqrt.f32 %v4733_v59  ;;  %v2264_v26 = vld [vmem:[%s2955_s27 + $0xa8] sm:$0xff]  ;;  %vm5116_vm1 = vmmov %vm5113_vm7  ;;  %v2267_v9 = vld [vmem:[%s2955_s27 + $0xc0] sm:$0xff] }
 0x269   : > { %v2338_v22 = vadd.f32 %v2337_v35, %v2336_v32  ;;  %v2176_v2 = vsel %vm2175_vm6, %v4620_v12, %v2174_v3  ;;  %v2188_v53 = vmul.f32 %v2761_v51, %v4645_v45  ;;  %v2294_v23 = vmul.f32 %v2262_v33, %v2158_v61  ;;  %v2765_v34 = vpop.eup %2764  ;;  %vm5118_vm13 = vmmov %vm5116_vm1  ;;  %v2268_v3 = vld [vmem:[%s2955_s27 + $0xc8] sm:$0xff] }
 0x26a   : > { %v2341_v13 = vsel %vm5115_vm8, %v2292_v37, 0.0  ;;  %v2172_v4 = vsel %vm2170_vm11, %v2171_v18, %v2169_v62  ;;  %vm2203_vm9 = vcmp.eq.f32.partialorder %v4671_v28, inf  ;;  %2774 = vrsqrt.f32 %v4748_v55  ;;  %vm5117_vm11 = vmmov %vm5116_vm1  ;;  %v2269_v62 = vld [vmem:[%s2955_s27 + $0xd0] sm:$0xff] }
 0x26b   : > { %v2340_v6 = vadd.f32 %v2339_v17, %v2338_v22  ;;  %v2183_v39 = vsel %vm2182_vm10, %v4633_v56, %v2181_v52  ;;  %v2195_v47 = vmul.f32 %v2763_v24, %v4659_v10  ;;  %v2295_v19 = vmul.f32 %v2263_v36, %v2165_v38  ;;  %v2270_v36 = vld [vmem:[%s2955_s27 + $0xd8] sm:$0xff]  ;;  %vm5122_vm8 = vmmov %vm5116_vm1 }
 0x26c   : > { %v2343_v29 = vsel %vm5116_vm1, %v2293_v42, 0.0  ;;  %v2767_v31 = vpop.eup %2766  ;;  %v2179_v41 = vsel %vm2177_vm0, %v2178_v0, %v2176_v2  ;;  %vm2205_vm6 = vcmp.eq.f32.partialorder %v4671_v28, 0.0  ;;  %v2206_v18 = vand.u32 2147483648, %v4671_v28  ;;  %v2266_v0 = vld [vmem:[%s2955_s27 + $0xb8] sm:$0xff] }
 0x26d   : > { %v2342_v63 = vadd.f32 %v2341_v13, %v2340_v6  ;;  %v2190_v14 = vsel %vm2189_vm12, %v4645_v45, %v2188_v53  ;;  %v2202_v20 = vmul.f32 %v2765_v34, %v4671_v28  ;;  %v2296_v57 = vmul.f32 %v2264_v26, %v2172_v4  ;;  %v2271_v4 = vld [vmem:[%s2955_s27 + $0xe0] sm:$0xff] }
 0x26e   : > { %v2345_v58 = vsel %vm5117_vm11, %v2294_v23, 0.0  ;;  %v2769_v25 = vpop.eup %2768  ;;  %v2186_v12 = vsel %vm2184_vm4, %v2185_v46, %v2183_v39  ;;  %vm2210_vm10 = vcmp.eq.f32.partialorder %v4687_v27, inf  ;;  %vm2212_vm0 = vcmp.eq.f32.partialorder %v4687_v27, 0.0  ;;  %vm5119_vm4 = vmmov %vm5116_vm1 }
 0x26f   : > { %v2344_v16 = vadd.f32 %v2343_v29, %v2342_v63  ;;  %v2197_v54 = vsel %vm2196_vm5, %v4659_v10, %v2195_v47  ;;  %v2209_v43 = vmul.f32 %v2767_v31, %v4687_v27  ;;  %v2297_v48 = vmul.f32 %v2265_v30, %v2179_v41  ;;  %v2272_v29 = vld [vmem:[%s2955_s27 + $0xe8] sm:$0xff] }
 0x270   : > { %v2347_v60 = vsel %vm5118_vm13, %v2295_v19, 0.0  ;;  %v2771_v44 = vpop.eup %2770  ;;  %v2193_v56 = vsel %vm2191_vm3, %v2192_v15, %v2190_v14  ;;  %v2213_v46 = vand.u32 2147483648, %v4687_v27  ;;  %vm2217_vm12 = vcmp.eq.f32.partialorder %v4703_v7, inf  ;;  %vm5120_vm3 = vmmov %vm5116_vm1 }
 0x271   : > { %v2346_v21 = vadd.f32 %v2345_v58, %v2344_v16  ;;  %v2204_v49 = vsel %vm2203_vm9, %v4671_v28, %v2202_v20  ;;  %v2216_v40 = vmul.f32 %v2769_v25, %v4703_v7  ;;  %v2298_v8 = vmul.f32 %v2266_v0, %v2186_v12 }
 0x272   : > { %v2349_v1 = vsel %vm5119_vm4, %v2296_v57, 0.0  ;;  %v2773_v50 = vpop.eup %2772  ;;  %v2200_v45 = vsel %vm2198_vm2, %v2199_v11, %v2197_v54  ;;  %vm2219_vm15 = vcmp.eq.f32.partialorder %v4703_v7, 0.0  ;;  %v2220_v15 = vand.u32 2147483648, %v4703_v7  ;;  %vm5121_vm2 = vmmov %vm5116_vm1 }
 0x273   : > { %v2348_v37 = vadd.f32 %v2347_v60, %v2346_v21  ;;  %v2211_v35 = vsel %vm2210_vm10, %v4687_v27, %v2209_v43  ;;  %v2223_v51 = vmul.f32 %v2771_v44, %v4718_v5  ;;  %v2299_v61 = vmul.f32 %v2267_v9, %v2193_v56  ;;  %vm5124_vm10 = vmmov %vm5121_vm2 }
 0x274   : > { %v2351_v33 = vsel %vm5120_vm3, %v2297_v48, 0.0  ;;  %v2775_v32 = vpop.eup %2774  ;;  %v2207_v10 = vsel %vm2205_vm6, %v2206_v18, %v2204_v49  ;;  %vm2224_vm7 = vcmp.eq.f32.partialorder %v4718_v5, inf  ;;  %vm2226_vm5 = vcmp.eq.f32.partialorder %v4718_v5, 0.0  ;;  %vm5123_vm6 = vmmov %vm5121_vm2 }
 0x275   : > { %v2350_v52 = vadd.f32 %v2349_v1, %v2348_v37  ;;  %v2218_v42 = vsel %vm2217_vm12, %v4703_v7, %v2216_v40  ;;  %v2230_v17 = vmul.f32 %v2773_v50, %v4733_v59  ;;  %v2300_v24 = vmul.f32 %v2268_v3, %v2200_v45  ;;  %v2377_v1 = vld [vmem:[#allocation3] sm:$0x1] }
 0x276   : > { %v2353_v38 = vsel %vm5121_vm2, %v2298_v8, 0.0  ;;  %v2214_v28 = vsel %vm2212_vm0, %v2213_v46, %v2211_v35  ;;  %v2227_v11 = vand.u32 2147483648, %v4718_v5  ;;  %vm2231_vm14 = vcmp.eq.f32.partialorder %v4733_v59, inf  ;;  %vm5125_vm0 = vmmov %vm5121_vm2 }
 0x277   : > { %v2352_v22 = vadd.f32 %v2351_v33, %v2350_v52  ;;  %v2225_v2 = vsel %vm2224_vm7, %v4718_v5, %v2223_v51  ;;  %v2237_v53 = vmul.f32 %v2775_v32, %v4748_v55  ;;  %v2301_v23 = vmul.f32 %v2269_v62, %v2207_v10  ;;  %v2274_v5 = vld [vmem:[%s2955_s27 + $0xf8] sm:$0xff]  ;;  %vm5126_vm13 = vmmov %vm5125_vm0 }
 0x278   : > { %v2355_v13 = vsel %vm5122_vm8, %v2299_v61, 0.0  ;;  %v2221_v34 = vsel %vm2219_vm15, %v2220_v15, %v2218_v42  ;;  %v2234_v27 = vand.u32 2147483648, %v4733_v59  ;;  %vm2238_vm9 = vcmp.eq.f32.partialorder %v4748_v55, inf  ;;  %vm5127_vm12 = vmmov %vm5125_vm0 }
 0x279   : > { %v2354_v26 = vadd.f32 %v2353_v38, %v2352_v22  ;;  %v2232_v6 = vsel %vm2231_vm14, %v4733_v59, %v2230_v17  ;;  %vm2233_vm1 = vcmp.eq.f32.partialorder %v4733_v59, 0.0  ;;  %v2302_v39 = vmul.f32 %v2270_v36, %v2214_v28  ;;  %v2273_v59 = vld [vmem:[%s2955_s27 + $0xf0] sm:$0xff]  ;;  %vm5128_vm4 = vmmov %vm5125_vm0 }
 0x27a   : > { %v2357_v47 = vsel %vm5123_vm6, %v2300_v24, 0.0  ;;  %v2228_v19 = vsel %vm2226_vm5, %v2227_v11, %v2225_v2  ;;  %v2241_v7 = vand.u32 2147483648, %v4748_v55  ;;  %v2239_v41 = vsel %vm2238_vm9, %v4748_v55, %v2237_v53  ;;  %vm5129_vm15 = vmmov %vm5125_vm0 }
 0x27b   : > { %v2356_v31 = vadd.f32 %v2355_v13, %v2354_v26  ;;  %vm2240_vm11 = vcmp.eq.f32.partialorder %v4748_v55, 0.0  ;;  %v2303_v18 = vmul.f32 %v2271_v4, %v2221_v34  ;;  %v2359_v30 = vsel %vm5124_vm10, %v2301_v23, 0.0 }
 0x27c   : > { %v2235_v63 = vsel %vm2233_vm1, %v2234_v27, %v2232_v6  ;;  %v2304_v20 = vmul.f32 %v2272_v29, %v2228_v19  ;;  %v2361_v57 = vsel %vm5125_vm0, %v2302_v39, 0.0  ;;  %v2242_v58 = vsel %vm2240_vm11, %v2241_v7, %v2239_v41 }
 0x27d   : > { %v2358_v14 = vadd.f32 %v2357_v47, %v2356_v31  ;;  %v2305_v12 = vmul.f32 %v2273_v59, %v2235_v63  ;;  %v2363_v0 = vsel %vm5126_vm13, %v2303_v18, 0.0  ;;  %v2306_v54 = vmul.f32 %v2274_v5, %v2242_v58 }
 0x27e   : > { %v2365_v43 = vsel %vm5127_vm12, %v2304_v20, 0.0  ;;  %vm5130_vm3 = vcmask 0  }
 0x27f   : > { %v2360_v25 = vadd.f32 %v2359_v30, %v2358_v14  ;;  %v2367_v48 = vsel %vm5128_vm4, %v2305_v12, 0.0  ;;  %v2369_v44 = vsel %vm5129_vm15, %v2306_v54, 0.0 }
 0x281   : > { %v2362_v16 = vadd.f32 %v2361_v57, %v2360_v25 }
 0x283   : > { %v2364_v55 = vadd.f32 %v2363_v0, %v2362_v16 }
 0x285   : > { %v2366_v60 = vadd.f32 %v2365_v43, %v2364_v55 }
 0x287   : > { %v2368_v56 = vadd.f32 %v2367_v48, %v2366_v60 }
 0x289   : > { %v2370_v46 = vadd.f32 %v2369_v44, %v2368_v56 }
 0x28b   : > { %v2371_v9 = vrot.slane %v2370_v46, 4 }
 0x28d   : > { %v2372_v21 = vadd.f32 %v2371_v9, %v2370_v46 }
 0x28f   : > { %v2373_v49 = vrot.slane %v2372_v21, 2 }
 0x291   : > { %v2374_v40 = vadd.f32 %v2373_v49, %v2372_v21 }
 0x293   : > { %v2375_v8 = vrot.slane %v2374_v40, 1 }
 0x295   : > { %v2376_v50 = vadd.f32 %v2375_v8, %v2374_v40 }
 0x297   : > { %v2378_v45 = vadd.f32 %v2377_v1, %v2376_v50 }
 0x299   : > { %2380 = vst.msk [vmem:[#allocation3] sm:$0x1] %vm5130_vm3, %v2378_v45 }
 0x29a PF: > { %vm5131_vm7 = vcmask 0  }
 0x2a0   : > { %v2383_v15 = vld [vmem:[#allocation3] sm:$0x1] }
 0x2a1   : > { %2385 = vst.msk [vmem:[%s469_s15] sm:$0x1] %vm5131_vm7, %v2383_v15 }
 0x2a2 PF: > { %s29_s19 = sadd.s32 1, %s2824_s19   ;;  %s5132_s1 = smov %s2820_s18 }
 0x2a3   : > { %p26_p4 = scmp.ge.s32.totalorder %s29_s19, 6   ;;  %s5133_s18 = smov %s5135_s20 }
 0x2a5   :  { %28 = sbr.rel (!%p26_p4) target bundleno = 27 (0x1b), region = 116 }

</bundles_post_ra>
